<compile_context>
chip_gen: v6e
topology: v6e:2x2x1
jax: 0.10.0
libtpu: 0.0.40
codegen_flags: <defaults>
</compile_context>

<pallas_src>
import functools

import jax
import jax.numpy as jnp
import numpy as np
from jax.experimental import pallas as pl
from jax.experimental.pallas import tpu as pltpu


# --------------------------------------------------------------------------------------
# Fused Pallas kernel: 4x conv3x3 + both cross-correlations + loc_adjust, one launch.
# --------------------------------------------------------------------------------------
def _rpn_fused_kernel(z_ref, x_ref, wt_ref, bt_ref, ws_ref, bs_ref,
                      keep_ref, p2_ref, bo_ref, o_ref, *, dims):
    C, Hz, Wz, Hx, Wx, K_cls, K_loc = dims
    f32 = jnp.float32
    K_all = K_cls + K_loc
    Nt = C * K_all                      # fused template-head output channels
    Ns = 2 * C                          # fused search-head output channels
    Hzo, Wzo = Hz - 2, Wz - 2           # template conv out == xcorr kernel spatial size
    Hxo, Wxo = Hx - 2, Wx - 2           # search conv out spatial size
    Ho, Wo = Hxo - Hzo + 1, Wxo - Wzo + 1
    Rt = (Hzo - 1) * Wz + Wzo           # rows of template-conv row accumulator
    Rs = (Hxo - 1) * Wx + Wxo           # rows of search-conv row accumulator
    Ro = (Ho - 1) * Wx + Wo             # rows of xcorr row accumulator

    z = z_ref[...]                      # (Hz*Wz, C)  NHWC rows flattened
    x = x_ref[...]                      # (Hx*Wx, C)
    wt = wt_ref[...]                    # (9*C, Nt)   rows ordered (di, dj, cin)
    ws = ws_ref[...]                    # (9*C, Ns)

    # ---- 3x3 convs as 9 shifted contiguous row-slab matmuls each.
    #      Row r = y*W_in + px of the accumulator is the conv output at (y, px);
    #      rows with px >= W_out are junk and are simply never read below. ----
    def conv3x3(inp, w, bias, w_in, n_rows):
        acc = None
        for ti in range(3):
            for tj in range(3):
                lhs = inp[ti * w_in + tj: ti * w_in + tj + n_rows, :]
                rhs = w[(ti * 3 + tj) * C: (ti * 3 + tj + 1) * C, :]
                d = jnp.dot(lhs, rhs, preferred_element_type=f32)
                acc = d if acc is None else acc + d
        return acc + bias

    acc_t = conv3x3(z, wt, bt_ref[...], Wz, Rt)     # (Rt, Nt)  template heads (+bias)
    acc_s = conv3x3(x, ws, bs_ref[...], Wx, Rs)     # (Rs, Ns)  search heads   (+bias)

    # ---- build the xcorr kernel matrix (Hzo*Wzo*2C, K_all) from the template conv:
    #      per tap, replicate its output row 2C times, mask each replica to its
    #      per-channel column block (constant 0/1 mask), then compact the Nt columns
    #      down to K_all with a constant 0/1 matrix (replaces an in-kernel reshape). ----
    keep = keep_ref[...]                            # (2C, Nt)
    p2 = p2_ref[...]                                # (Nt, K_all)
    reps = []
    for di in range(Hzo):
        for dj in range(Wzo):
            r = di * Wz + dj                        # template output position (di, dj)
            reps.append(jnp.broadcast_to(acc_t[r:r + 1, :], (Ns, Nt)) * keep)
    masked = jnp.concatenate(reps, axis=0)          # (Hzo*Wzo*2C, Nt)
    kmat = jnp.dot(masked, p2, preferred_element_type=f32)   # (Hzo*Wzo*2C, K_all)

    # ---- both cross-correlations as ONE matmul: gather the 16 shifted slabs of the
    #      search features along lanes and contract against the block kernel matrix. ----
    slabs = []
    for di in range(Hzo):
        for dj in range(Wzo):
            s = di * Wx + dj
            slabs.append(acc_s[s:s + Ro, :])        # (Ro, 2C)
    patches = jnp.concatenate(slabs, axis=1)        # (Ro, Hzo*Wzo*2C)
    out_rows = jnp.dot(patches, kmat, preferred_element_type=f32) + bo_ref[...]

    # ---- keep only the valid rows (x-part < Wo) and store packed [cls | loc] ----
    valid = [out_rows[oy * Wx: oy * Wx + Wo, :] for oy in range(Ho)]
    o_ref[...] = jnp.concatenate(valid, axis=0)     # (Ho*Wo, K_all)


# --------------------------------------------------------------------------------------
# One-time parameter packing (outside jit): fused heads, loc_adjust folded in,
# plus the shape-only constant mask / compaction matrices used by the kernel.
# --------------------------------------------------------------------------------------
def _conv_weight_to_mat(w):
    """(O, I, kh, kw) -> (kh*kw*I, O) with rows in (di, dj, c_in) order."""
    O, I, kh, kw = w.shape
    return w.transpose(2, 3, 1, 0).reshape(kh * kw * I, O)


def _permute_template_head(w, b, C, K):
    """Reorder a template head's output channels from PyTorch (k, c) order to (c, k)."""
    O, I, kh, kw = w.shape                                   # O == C * K
    w_ck = w.reshape(K, C, I, kh, kw).transpose(1, 0, 2, 3, 4).reshape(O, I, kh, kw)
    b_ck = b.reshape(K, C).T.reshape(O)
    return w_ck, b_ck


def _build_constants(C, K_cls, K_loc):
    K_all = K_cls + K_loc
    Nt = C * K_all
    keep = np.zeros((2 * C, Nt), np.float32)
    p2 = np.zeros((Nt, K_all), np.float32)
    for c in range(C):
        keep[c, c * K_cls:(c + 1) * K_cls] = 1.0
        keep[C + c, C * K_cls + c * K_loc: C * K_cls + (c + 1) * K_loc] = 1.0
    for col in range(Nt):
        if col < C * K_cls:
            p2[col, col % K_cls] = 1.0
        else:
            p2[col, K_cls + (col - C * K_cls) % K_loc] = 1.0
    return jnp.asarray(keep), jnp.asarray(p2)


def prepare_params(params, anchor_num=5):
    """Pack PyTorch-layout conv params into fused matmul weights (done once)."""
    w_sc, b_sc = params["search_cls_conv"]
    w_sl, b_sl = params["search_loc_conv"]
    C = w_sc.shape[0]
    K_cls, K_loc = 2 * anchor_num, 4 * anchor_num

    wtc, btc = _permute_template_head(*params["template_cls_conv"], C, K_cls)
    wtl, btl = _permute_template_head(*params["template_loc_conv"], C, K_loc)
    w_tc = _conv_weight_to_mat(wtc)                          # (9C, C*K_cls)  cols (c, k)
    w_tl = _conv_weight_to_mat(wtl)                          # (9C, C*K_loc)  cols (c, k)

    # Fold the 1x1 loc_adjust conv into the template-loc head (xcorr is linear in it).
    w_adj = params["loc_adjust"][0].reshape(K_loc, K_loc)    # [k_out, k_in]
    b_adj = params["loc_adjust"][1]
    w_tl = jnp.einsum("jck,lk->jcl", w_tl.reshape(-1, C, K_loc), w_adj).reshape(-1, C * K_loc)
    btl = jnp.einsum("ck,lk->cl", btl.reshape(C, K_loc), w_adj).reshape(C * K_loc)

    w_t = jnp.concatenate([w_tc, w_tl], axis=1)              # (9C, C*(K_cls+K_loc))
    b_t = jnp.concatenate([btc, btl]).reshape(1, -1)
    w_s = jnp.concatenate([_conv_weight_to_mat(w_sc), _conv_weight_to_mat(w_sl)], axis=1)
    b_s = jnp.concatenate([b_sc, b_sl]).reshape(1, -1)
    b_out = jnp.concatenate([jnp.zeros((K_cls,), jnp.float32),
                             b_adj.astype(jnp.float32)]).reshape(1, -1)
    keep, p2 = _build_constants(C, K_cls, K_loc)
    return {"w_t": w_t, "b_t": b_t, "w_s": w_s, "b_s": b_s,
            "b_out": b_out, "keep": keep, "p2": p2}


# --------------------------------------------------------------------------------------
# Forward pass (jit this): NCHW boundary, one fused Pallas launch inside.
# --------------------------------------------------------------------------------------
def up_channel_rpn_forward(packed, z_f, x_f, anchor_num=5):
    B, C, Hz, Wz = z_f.shape
    _, _, Hx, Wx = x_f.shape
    K_cls, K_loc = 2 * anchor_num, 4 * anchor_num
    K_all = K_cls + K_loc
    Nt, Ns = C * K_all, 2 * C
    Hzo, Wzo = Hz - 2, Wz - 2
    Hxo, Wxo = Hx - 2, Wx - 2
    Ho, Wo = Hxo - Hzo + 1, Wxo - Wzo + 1
    Rt = (Hzo - 1) * Wz + Wzo
    Rs = (Hxo - 1) * Wx + Wxo
    Ro = (Ho - 1) * Wx + Wo
    n_tap = Hzo * Wzo

    z_flat = z_f.transpose(0, 2, 3, 1).reshape(B, Hz * Wz, C)
    x_flat = x_f.transpose(0, 2, 3, 1).reshape(B, Hx * Wx, C)

    flops = 2 * B * (9 * Rt * C * Nt + 9 * Rs * C * Ns
                     + n_tap * Ns * Nt * K_all + Ro * n_tap * Ns * K_all)
    bytes_accessed = 4 * (B * (Hz * Wz * C + Hx * Wx * C + Ho * Wo * K_all)
                          + 9 * C * Nt + Nt + 9 * C * Ns + Ns
                          + Ns * Nt + Nt * K_all + K_all)

    kernel = functools.partial(_rpn_fused_kernel,
                               dims=(C, Hz, Wz, Hx, Wx, K_cls, K_loc))
    out = pl.pallas_call(
        kernel,
        out_shape=jax.ShapeDtypeStruct((B, Ho * Wo, K_all), jnp.float32),
        grid=(B,),
        in_specs=[
            pl.BlockSpec((None, Hz * Wz, C), lambda b: (b, 0, 0)),
            pl.BlockSpec((None, Hx * Wx, C), lambda b: (b, 0, 0)),
            pl.BlockSpec((9 * C, Nt), lambda b: (0, 0)),
            pl.BlockSpec((1, Nt), lambda b: (0, 0)),
            pl.BlockSpec((9 * C, Ns), lambda b: (0, 0)),
            pl.BlockSpec((1, Ns), lambda b: (0, 0)),
            pl.BlockSpec((Ns, Nt), lambda b: (0, 0)),
            pl.BlockSpec((Nt, K_all), lambda b: (0, 0)),
            pl.BlockSpec((1, K_all), lambda b: (0, 0)),
        ],
        out_specs=pl.BlockSpec((None, Ho * Wo, K_all), lambda b: (b, 0, 0)),
        compiler_params=pltpu.CompilerParams(dimension_semantics=("parallel",)),
        cost_estimate=pl.CostEstimate(flops=int(flops), transcendentals=0,
                                      bytes_accessed=int(bytes_accessed)),
    )(z_flat, x_flat, packed["w_t"], packed["b_t"], packed["w_s"], packed["b_s"],
      packed["keep"], packed["p2"], packed["b_out"])

    out = out.reshape(B, Ho, Wo, K_all)
    cls = out[..., :K_cls].transpose(0, 3, 1, 2)              # (B, 2*anchors, Ho, Wo)
    loc = out[..., K_cls:].transpose(0, 3, 1, 2)              # (B, 4*anchors, Ho, Wo)
    return cls, loc


# --------------------------------------------------------------------------------------
# Parameter init (PyTorch Conv2d layout / kaiming-uniform-ish)
# --------------------------------------------------------------------------------------
def init_params(key, anchor_num=5, in_channels=16):
    cls_out = 2 * anchor_num
    loc_out = 4 * anchor_num
    C = in_channels
    ks = jax.random.split(key, 10)

    def conv_params(kw_key, kb_key, o, i, kh, kw):
        scale = 1.0 / float(i * kh * kw) ** 0.5
        w = jax.random.uniform(kw_key, (o, i, kh, kw), jnp.float32, -scale, scale)
        b = jax.random.uniform(kb_key, (o,), jnp.float32, -scale, scale)
        return w, b

    return {
        "template_cls_conv": conv_params(ks[0], ks[1], C * cls_out, C, 3, 3),
        "template_loc_conv": conv_params(ks[2], ks[3], C * loc_out, C, 3, 3),
        "search_cls_conv": conv_params(ks[4], ks[5], C, C, 3, 3),
        "search_loc_conv": conv_params(ks[6], ks[7], C, C, 3, 3),
        "loc_adjust": conv_params(ks[8], ks[9], loc_out, loc_out, 1, 1),
    }


# --------------------------------------------------------------------------------------
# Pure-JAX reference (lax.conv) for numerical validation
# --------------------------------------------------------------------------------------
def _ref_conv(x, w, b):
    out = jax.lax.conv_general_dilated(
        x, w, window_strides=(1, 1), padding="VALID",
        dimension_numbers=("NCHW", "OIHW", "NCHW"),
        precision=jax.lax.Precision.HIGHEST,
    )
    return out + b.reshape(1, -1, 1, 1)


def _ref_xcorr(x, kernel):
    B, C, H, W = x.shape
    _, CK, kh, kw = kernel.shape
    K = CK // C
    pk = kernel.reshape(B * K, C, kh, kw)
    px = x.reshape(1, B * C, H, W)
    po = jax.lax.conv_general_dilated(
        px, pk, (1, 1), "VALID",
        dimension_numbers=("NCHW", "OIHW", "NCHW"),
        feature_group_count=B, precision=jax.lax.Precision.HIGHEST,
    )
    return po.reshape(B, K, po.shape[2], po.shape[3])


def reference_forward(params, z_f, x_f):
    cls_kernel = _ref_conv(z_f, *params["template_cls_conv"])
    loc_kernel = _ref_conv(z_f, *params["template_loc_conv"])
    cls_feature = _ref_conv(x_f, *params["search_cls_conv"])
    loc_feature = _ref_conv(x_f, *params["search_loc_conv"])
    cls = _ref_xcorr(cls_feature, cls_kernel)
    loc = _ref_conv(_ref_xcorr(loc_feature, loc_kernel), *params["loc_adjust"])
    return cls, loc


# --------------------------------------------------------------------------------------
if __name__ == "__main__":
    key = jax.random.PRNGKey(0)
    kp, kz, kx = jax.random.split(key, 3)

    anchor_num, C = 5, 16
    params = init_params(kp, anchor_num=anchor_num, in_channels=C)
    packed = prepare_params(params, anchor_num=anchor_num)    # one-time, outside jit

    # z_f: template feature (small spatial), x_f: search feature (larger spatial)
    z_f = jax.random.normal(kz, (2, C, 6, 6), jnp.float32)
    x_f = jax.random.normal(kx, (2, C, 12, 12), jnp.float32)

    fwd = jax.jit(up_channel_rpn_forward, static_argnames=("anchor_num",))
    cls, loc = fwd(packed, z_f, x_f, anchor_num=anchor_num)
    jax.block_until_ready((cls, loc))

    assert cls.shape == (2, 2 * anchor_num, 7, 7), cls.shape
    assert loc.shape == (2, 4 * anchor_num, 7, 7), loc.shape

    cls_ref, loc_ref = reference_forward(params, z_f, x_f)
    np.testing.assert_allclose(np.asarray(cls), np.asarray(cls_ref), rtol=5e-2, atol=5e-2)
    np.testing.assert_allclose(np.asarray(loc), np.asarray(loc_ref), rtol=5e-2, atol=5e-2)

    print("KERNEL_OK")
</pallas_src>

<mosaic_0001>
module attributes {stable_mosaic.version = 11 : i64} {
  func.func @_rpn_fused_kernel(%arg0: i32, %arg1: memref<1x36x16xf32, #tpu.memory_space<vmem>>, %arg2: memref<1x144x16xf32, #tpu.memory_space<vmem>>, %arg3: memref<144x480xf32, #tpu.memory_space<vmem>>, %arg4: memref<1x480xf32, #tpu.memory_space<vmem>>, %arg5: memref<144x32xf32, #tpu.memory_space<vmem>>, %arg6: memref<1x32xf32, #tpu.memory_space<vmem>>, %arg7: memref<32x480xf32, #tpu.memory_space<vmem>>, %arg8: memref<480x30xf32, #tpu.memory_space<vmem>>, %arg9: memref<1x30xf32, #tpu.memory_space<vmem>>, %arg10: memref<1x49x30xf32, #tpu.memory_space<vmem>>) attributes {dimension_semantics = [#tpu.dimension_semantics<parallel>], iteration_bounds = array<i64: 2>, scalar_prefetch = 0 : i64, scratch_operands = 0 : i64, tpu.core_type = #tpu.core_type<tc>, window_params = [{transform_indices = @transform_0, window_bounds = array<i64: 1, 36, 16>}, {transform_indices = @transform_1, window_bounds = array<i64: 1, 144, 16>}, {pipeline_mode = #tpu.pipeline_mode<synchronous>, transform_indices = @transform_2, window_bounds = array<i64: 144, 480>}, {pipeline_mode = #tpu.pipeline_mode<synchronous>, transform_indices = @transform_3, window_bounds = array<i64: 1, 480>}, {pipeline_mode = #tpu.pipeline_mode<synchronous>, transform_indices = @transform_4, window_bounds = array<i64: 144, 32>}, {pipeline_mode = #tpu.pipeline_mode<synchronous>, transform_indices = @transform_5, window_bounds = array<i64: 1, 32>}, {pipeline_mode = #tpu.pipeline_mode<synchronous>, transform_indices = @transform_6, window_bounds = array<i64: 32, 480>}, {pipeline_mode = #tpu.pipeline_mode<synchronous>, transform_indices = @transform_7, window_bounds = array<i64: 480, 30>}, {pipeline_mode = #tpu.pipeline_mode<synchronous>, transform_indices = @transform_8, window_bounds = array<i64: 1, 30>}, {transform_indices = @transform_9, window_bounds = array<i64: 1, 49, 30>}]} {
    %c0 = arith.constant 0 : index
    %c0_0 = arith.constant 0 : index
    %c0_1 = arith.constant 0 : index
    %0 = vector.load %arg1[%c0, %c0_0, %c0_1] : memref<1x36x16xf32, #tpu.memory_space<vmem>>, vector<1x36x16xf32>
    %1 = vector.shape_cast %0 : vector<1x36x16xf32> to vector<36x16xf32>
    %c0_2 = arith.constant 0 : index
    %c0_3 = arith.constant 0 : index
    %c0_4 = arith.constant 0 : index
    %2 = vector.load %arg2[%c0_2, %c0_3, %c0_4] : memref<1x144x16xf32, #tpu.memory_space<vmem>>, vector<1x144x16xf32>
    %3 = vector.shape_cast %2 : vector<1x144x16xf32> to vector<144x16xf32>
    %c0_5 = arith.constant 0 : index
    %c0_6 = arith.constant 0 : index
    %4 = vector.load %arg3[%c0_5, %c0_6] : memref<144x480xf32, #tpu.memory_space<vmem>>, vector<144x480xf32>
    %c0_7 = arith.constant 0 : index
    %c0_8 = arith.constant 0 : index
    %5 = vector.load %arg5[%c0_7, %c0_8] : memref<144x32xf32, #tpu.memory_space<vmem>>, vector<144x32xf32>
    %c0_9 = arith.constant 0 : index
    %c0_10 = arith.constant 0 : index
    %6 = vector.load %arg4[%c0_9, %c0_10] : memref<1x480xf32, #tpu.memory_space<vmem>>, vector<1x480xf32>
    %7 = vector.extract_strided_slice %1 {offsets = [0, 0], sizes = [22, 16], strides = [1, 1]} : vector<36x16xf32> to vector<22x16xf32>
    %8 = vector.extract_strided_slice %4 {offsets = [0, 0], sizes = [16, 480], strides = [1, 1]} : vector<144x480xf32> to vector<16x480xf32>
    %cst = arith.constant dense<0.000000e+00> : vector<22x480xf32>
    %9 = tpu.matmul %7, %8, %cst {dimension_numbers = #tpu.dot_dimension_numbers<[1], [0], [0], [1], [0, 0, 1, 1], [], []>} : vector<22x16xf32>, vector<16x480xf32>, vector<22x480xf32> -> vector<22x480xf32>
    %10 = vector.extract_strided_slice %1 {offsets = [1, 0], sizes = [22, 16], strides = [1, 1]} : vector<36x16xf32> to vector<22x16xf32>
    %11 = vector.extract_strided_slice %4 {offsets = [16, 0], sizes = [16, 480], strides = [1, 1]} : vector<144x480xf32> to vector<16x480xf32>
    %cst_11 = arith.constant dense<0.000000e+00> : vector<22x480xf32>
    %12 = tpu.matmul %10, %11, %cst_11 {dimension_numbers = #tpu.dot_dimension_numbers<[1], [0], [0], [1], [0, 0, 1, 1], [], []>} : vector<22x16xf32>, vector<16x480xf32>, vector<22x480xf32> -> vector<22x480xf32>
    %13 = arith.addf %9, %12 : vector<22x480xf32>
    %14 = vector.extract_strided_slice %1 {offsets = [2, 0], sizes = [22, 16], strides = [1, 1]} : vector<36x16xf32> to vector<22x16xf32>
    %15 = vector.extract_strided_slice %4 {offsets = [32, 0], sizes = [16, 480], strides = [1, 1]} : vector<144x480xf32> to vector<16x480xf32>
    %cst_12 = arith.constant dense<0.000000e+00> : vector<22x480xf32>
    %16 = tpu.matmul %14, %15, %cst_12 {dimension_numbers = #tpu.dot_dimension_numbers<[1], [0], [0], [1], [0, 0, 1, 1], [], []>} : vector<22x16xf32>, vector<16x480xf32>, vector<22x480xf32> -> vector<22x480xf32>
    %17 = arith.addf %13, %16 : vector<22x480xf32>
    %18 = vector.extract_strided_slice %1 {offsets = [6, 0], sizes = [22, 16], strides = [1, 1]} : vector<36x16xf32> to vector<22x16xf32>
    %19 = vector.extract_strided_slice %4 {offsets = [48, 0], sizes = [16, 480], strides = [1, 1]} : vector<144x480xf32> to vector<16x480xf32>
    %cst_13 = arith.constant dense<0.000000e+00> : vector<22x480xf32>
    %20 = tpu.matmul %18, %19, %cst_13 {dimension_numbers = #tpu.dot_dimension_numbers<[1], [0], [0], [1], [0, 0, 1, 1], [], []>} : vector<22x16xf32>, vector<16x480xf32>, vector<22x480xf32> -> vector<22x480xf32>
    %21 = arith.addf %17, %20 : vector<22x480xf32>
    %22 = vector.extract_strided_slice %1 {offsets = [7, 0], sizes = [22, 16], strides = [1, 1]} : vector<36x16xf32> to vector<22x16xf32>
    %23 = vector.extract_strided_slice %4 {offsets = [64, 0], sizes = [16, 480], strides = [1, 1]} : vector<144x480xf32> to vector<16x480xf32>
    %cst_14 = arith.constant dense<0.000000e+00> : vector<22x480xf32>
    %24 = tpu.matmul %22, %23, %cst_14 {dimension_numbers = #tpu.dot_dimension_numbers<[1], [0], [0], [1], [0, 0, 1, 1], [], []>} : vector<22x16xf32>, vector<16x480xf32>, vector<22x480xf32> -> vector<22x480xf32>
    %25 = arith.addf %21, %24 : vector<22x480xf32>
    %26 = vector.extract_strided_slice %1 {offsets = [8, 0], sizes = [22, 16], strides = [1, 1]} : vector<36x16xf32> to vector<22x16xf32>
    %27 = vector.extract_strided_slice %4 {offsets = [80, 0], sizes = [16, 480], strides = [1, 1]} : vector<144x480xf32> to vector<16x480xf32>
    %cst_15 = arith.constant dense<0.000000e+00> : vector<22x480xf32>
    %28 = tpu.matmul %26, %27, %cst_15 {dimension_numbers = #tpu.dot_dimension_numbers<[1], [0], [0], [1], [0, 0, 1, 1], [], []>} : vector<22x16xf32>, vector<16x480xf32>, vector<22x480xf32> -> vector<22x480xf32>
    %29 = arith.addf %25, %28 : vector<22x480xf32>
    %30 = vector.extract_strided_slice %1 {offsets = [12, 0], sizes = [22, 16], strides = [1, 1]} : vector<36x16xf32> to vector<22x16xf32>
    %31 = vector.extract_strided_slice %4 {offsets = [96, 0], sizes = [16, 480], strides = [1, 1]} : vector<144x480xf32> to vector<16x480xf32>
    %cst_16 = arith.constant dense<0.000000e+00> : vector<22x480xf32>
    %32 = tpu.matmul %30, %31, %cst_16 {dimension_numbers = #tpu.dot_dimension_numbers<[1], [0], [0], [1], [0, 0, 1, 1], [], []>} : vector<22x16xf32>, vector<16x480xf32>, vector<22x480xf32> -> vector<22x480xf32>
    %33 = arith.addf %29, %32 : vector<22x480xf32>
    %34 = vector.extract_strided_slice %1 {offsets = [13, 0], sizes = [22, 16], strides = [1, 1]} : vector<36x16xf32> to vector<22x16xf32>
    %35 = vector.extract_strided_slice %4 {offsets = [112, 0], sizes = [16, 480], strides = [1, 1]} : vector<144x480xf32> to vector<16x480xf32>
    %cst_17 = arith.constant dense<0.000000e+00> : vector<22x480xf32>
    %36 = tpu.matmul %34, %35, %cst_17 {dimension_numbers = #tpu.dot_dimension_numbers<[1], [0], [0], [1], [0, 0, 1, 1], [], []>} : vector<22x16xf32>, vector<16x480xf32>, vector<22x480xf32> -> vector<22x480xf32>
    %37 = arith.addf %33, %36 : vector<22x480xf32>
    %38 = vector.extract_strided_slice %1 {offsets = [14, 0], sizes = [22, 16], strides = [1, 1]} : vector<36x16xf32> to vector<22x16xf32>
    %39 = vector.extract_strided_slice %4 {offsets = [128, 0], sizes = [16, 480], strides = [1, 1]} : vector<144x480xf32> to vector<16x480xf32>
    %cst_18 = arith.constant dense<0.000000e+00> : vector<22x480xf32>
    %40 = tpu.matmul %38, %39, %cst_18 {dimension_numbers = #tpu.dot_dimension_numbers<[1], [0], [0], [1], [0, 0, 1, 1], [], []>} : vector<22x16xf32>, vector<16x480xf32>, vector<22x480xf32> -> vector<22x480xf32>
    %41 = arith.addf %37, %40 : vector<22x480xf32>
    %42 = vector.broadcast %6 : vector<1x480xf32> to vector<22x480xf32>
    %43 = arith.addf %41, %42 : vector<22x480xf32>
    %c0_19 = arith.constant 0 : index
    %c0_20 = arith.constant 0 : index
    %44 = vector.load %arg6[%c0_19, %c0_20] : memref<1x32xf32, #tpu.memory_space<vmem>>, vector<1x32xf32>
    %45 = vector.extract_strided_slice %3 {offsets = [0, 0], sizes = [118, 16], strides = [1, 1]} : vector<144x16xf32> to vector<118x16xf32>
    %46 = vector.extract_strided_slice %5 {offsets = [0, 0], sizes = [16, 32], strides = [1, 1]} : vector<144x32xf32> to vector<16x32xf32>
    %cst_21 = arith.constant dense<0.000000e+00> : vector<118x32xf32>
    %47 = tpu.matmul %45, %46, %cst_21 {dimension_numbers = #tpu.dot_dimension_numbers<[1], [0], [0], [1], [0, 0, 1, 1], [], []>} : vector<118x16xf32>, vector<16x32xf32>, vector<118x32xf32> -> vector<118x32xf32>
    %48 = vector.extract_strided_slice %3 {offsets = [1, 0], sizes = [118, 16], strides = [1, 1]} : vector<144x16xf32> to vector<118x16xf32>
    %49 = vector.extract_strided_slice %5 {offsets = [16, 0], sizes = [16, 32], strides = [1, 1]} : vector<144x32xf32> to vector<16x32xf32>
    %cst_22 = arith.constant dense<0.000000e+00> : vector<118x32xf32>
    %50 = tpu.matmul %48, %49, %cst_22 {dimension_numbers = #tpu.dot_dimension_numbers<[1], [0], [0], [1], [0, 0, 1, 1], [], []>} : vector<118x16xf32>, vector<16x32xf32>, vector<118x32xf32> -> vector<118x32xf32>
    %51 = arith.addf %47, %50 : vector<118x32xf32>
    %52 = vector.extract_strided_slice %3 {offsets = [2, 0], sizes = [118, 16], strides = [1, 1]} : vector<144x16xf32> to vector<118x16xf32>
    %53 = vector.extract_strided_slice %5 {offsets = [32, 0], sizes = [16, 32], strides = [1, 1]} : vector<144x32xf32> to vector<16x32xf32>
    %cst_23 = arith.constant dense<0.000000e+00> : vector<118x32xf32>
    %54 = tpu.matmul %52, %53, %cst_23 {dimension_numbers = #tpu.dot_dimension_numbers<[1], [0], [0], [1], [0, 0, 1, 1], [], []>} : vector<118x16xf32>, vector<16x32xf32>, vector<118x32xf32> -> vector<118x32xf32>
    %55 = arith.addf %51, %54 : vector<118x32xf32>
    %56 = vector.extract_strided_slice %3 {offsets = [12, 0], sizes = [118, 16], strides = [1, 1]} : vector<144x16xf32> to vector<118x16xf32>
    %57 = vector.extract_strided_slice %5 {offsets = [48, 0], sizes = [16, 32], strides = [1, 1]} : vector<144x32xf32> to vector<16x32xf32>
    %cst_24 = arith.constant dense<0.000000e+00> : vector<118x32xf32>
    %58 = tpu.matmul %56, %57, %cst_24 {dimension_numbers = #tpu.dot_dimension_numbers<[1], [0], [0], [1], [0, 0, 1, 1], [], []>} : vector<118x16xf32>, vector<16x32xf32>, vector<118x32xf32> -> vector<118x32xf32>
    %59 = arith.addf %55, %58 : vector<118x32xf32>
    %60 = vector.extract_strided_slice %3 {offsets = [13, 0], sizes = [118, 16], strides = [1, 1]} : vector<144x16xf32> to vector<118x16xf32>
    %61 = vector.extract_strided_slice %5 {offsets = [64, 0], sizes = [16, 32], strides = [1, 1]} : vector<144x32xf32> to vector<16x32xf32>
    %cst_25 = arith.constant dense<0.000000e+00> : vector<118x32xf32>
    %62 = tpu.matmul %60, %61, %cst_25 {dimension_numbers = #tpu.dot_dimension_numbers<[1], [0], [0], [1], [0, 0, 1, 1], [], []>} : vector<118x16xf32>, vector<16x32xf32>, vector<118x32xf32> -> vector<118x32xf32>
    %63 = arith.addf %59, %62 : vector<118x32xf32>
    %64 = vector.extract_strided_slice %3 {offsets = [14, 0], sizes = [118, 16], strides = [1, 1]} : vector<144x16xf32> to vector<118x16xf32>
    %65 = vector.extract_strided_slice %5 {offsets = [80, 0], sizes = [16, 32], strides = [1, 1]} : vector<144x32xf32> to vector<16x32xf32>
    %cst_26 = arith.constant dense<0.000000e+00> : vector<118x32xf32>
    %66 = tpu.matmul %64, %65, %cst_26 {dimension_numbers = #tpu.dot_dimension_numbers<[1], [0], [0], [1], [0, 0, 1, 1], [], []>} : vector<118x16xf32>, vector<16x32xf32>, vector<118x32xf32> -> vector<118x32xf32>
    %67 = arith.addf %63, %66 : vector<118x32xf32>
    %68 = vector.extract_strided_slice %3 {offsets = [24, 0], sizes = [118, 16], strides = [1, 1]} : vector<144x16xf32> to vector<118x16xf32>
    %69 = vector.extract_strided_slice %5 {offsets = [96, 0], sizes = [16, 32], strides = [1, 1]} : vector<144x32xf32> to vector<16x32xf32>
    %cst_27 = arith.constant dense<0.000000e+00> : vector<118x32xf32>
    %70 = tpu.matmul %68, %69, %cst_27 {dimension_numbers = #tpu.dot_dimension_numbers<[1], [0], [0], [1], [0, 0, 1, 1], [], []>} : vector<118x16xf32>, vector<16x32xf32>, vector<118x32xf32> -> vector<118x32xf32>
    %71 = arith.addf %67, %70 : vector<118x32xf32>
    %72 = vector.extract_strided_slice %3 {offsets = [25, 0], sizes = [118, 16], strides = [1, 1]} : vector<144x16xf32> to vector<118x16xf32>
    %73 = vector.extract_strided_slice %5 {offsets = [112, 0], sizes = [16, 32], strides = [1, 1]} : vector<144x32xf32> to vector<16x32xf32>
    %cst_28 = arith.constant dense<0.000000e+00> : vector<118x32xf32>
    %74 = tpu.matmul %72, %73, %cst_28 {dimension_numbers = #tpu.dot_dimension_numbers<[1], [0], [0], [1], [0, 0, 1, 1], [], []>} : vector<118x16xf32>, vector<16x32xf32>, vector<118x32xf32> -> vector<118x32xf32>
    %75 = arith.addf %71, %74 : vector<118x32xf32>
    %76 = vector.extract_strided_slice %3 {offsets = [26, 0], sizes = [118, 16], strides = [1, 1]} : vector<144x16xf32> to vector<118x16xf32>
    %77 = vector.extract_strided_slice %5 {offsets = [128, 0], sizes = [16, 32], strides = [1, 1]} : vector<144x32xf32> to vector<16x32xf32>
    %cst_29 = arith.constant dense<0.000000e+00> : vector<118x32xf32>
    %78 = tpu.matmul %76, %77, %cst_29 {dimension_numbers = #tpu.dot_dimension_numbers<[1], [0], [0], [1], [0, 0, 1, 1], [], []>} : vector<118x16xf32>, vector<16x32xf32>, vector<118x32xf32> -> vector<118x32xf32>
    %79 = arith.addf %75, %78 : vector<118x32xf32>
    %80 = vector.broadcast %44 : vector<1x32xf32> to vector<118x32xf32>
    %81 = arith.addf %79, %80 : vector<118x32xf32>
    %c0_30 = arith.constant 0 : index
    %c0_31 = arith.constant 0 : index
    %82 = vector.load %arg7[%c0_30, %c0_31] : memref<32x480xf32, #tpu.memory_space<vmem>>, vector<32x480xf32>
    %c0_32 = arith.constant 0 : index
    %c0_33 = arith.constant 0 : index
    %83 = vector.load %arg8[%c0_32, %c0_33] : memref<480x30xf32, #tpu.memory_space<vmem>>, vector<480x30xf32>
    %84 = vector.extract_strided_slice %43 {offsets = [0, 0], sizes = [1, 480], strides = [1, 1]} : vector<22x480xf32> to vector<1x480xf32>
    %85 = vector.shape_cast %84 : vector<1x480xf32> to vector<1x480xf32>
    %86 = vector.broadcast %85 : vector<1x480xf32> to vector<32x480xf32>
    %87 = arith.mulf %86, %82 : vector<32x480xf32>
    %88 = vector.extract_strided_slice %43 {offsets = [1, 0], sizes = [1, 480], strides = [1, 1]} : vector<22x480xf32> to vector<1x480xf32>
    %89 = vector.shape_cast %88 : vector<1x480xf32> to vector<1x480xf32>
    %90 = vector.broadcast %89 : vector<1x480xf32> to vector<32x480xf32>
    %91 = arith.mulf %90, %82 : vector<32x480xf32>
    %92 = vector.extract_strided_slice %43 {offsets = [2, 0], sizes = [1, 480], strides = [1, 1]} : vector<22x480xf32> to vector<1x480xf32>
    %93 = vector.shape_cast %92 : vector<1x480xf32> to vector<1x480xf32>
    %94 = vector.broadcast %93 : vector<1x480xf32> to vector<32x480xf32>
    %95 = arith.mulf %94, %82 : vector<32x480xf32>
    %96 = vector.extract_strided_slice %43 {offsets = [3, 0], sizes = [1, 480], strides = [1, 1]} : vector<22x480xf32> to vector<1x480xf32>
    %97 = vector.shape_cast %96 : vector<1x480xf32> to vector<1x480xf32>
    %98 = vector.broadcast %97 : vector<1x480xf32> to vector<32x480xf32>
    %99 = arith.mulf %98, %82 : vector<32x480xf32>
    %100 = vector.extract_strided_slice %43 {offsets = [6, 0], sizes = [1, 480], strides = [1, 1]} : vector<22x480xf32> to vector<1x480xf32>
    %101 = vector.shape_cast %100 : vector<1x480xf32> to vector<1x480xf32>
    %102 = vector.broadcast %101 : vector<1x480xf32> to vector<32x480xf32>
    %103 = arith.mulf %102, %82 : vector<32x480xf32>
    %104 = vector.extract_strided_slice %43 {offsets = [7, 0], sizes = [1, 480], strides = [1, 1]} : vector<22x480xf32> to vector<1x480xf32>
    %105 = vector.shape_cast %104 : vector<1x480xf32> to vector<1x480xf32>
    %106 = vector.broadcast %105 : vector<1x480xf32> to vector<32x480xf32>
    %107 = arith.mulf %106, %82 : vector<32x480xf32>
    %108 = vector.extract_strided_slice %43 {offsets = [8, 0], sizes = [1, 480], strides = [1, 1]} : vector<22x480xf32> to vector<1x480xf32>
    %109 = vector.shape_cast %108 : vector<1x480xf32> to vector<1x480xf32>
    %110 = vector.broadcast %109 : vector<1x480xf32> to vector<32x480xf32>
    %111 = arith.mulf %110, %82 : vector<32x480xf32>
    %112 = vector.extract_strided_slice %43 {offsets = [9, 0], sizes = [1, 480], strides = [1, 1]} : vector<22x480xf32> to vector<1x480xf32>
    %113 = vector.shape_cast %112 : vector<1x480xf32> to vector<1x480xf32>
    %114 = vector.broadcast %113 : vector<1x480xf32> to vector<32x480xf32>
    %115 = arith.mulf %114, %82 : vector<32x480xf32>
    %116 = vector.extract_strided_slice %43 {offsets = [12, 0], sizes = [1, 480], strides = [1, 1]} : vector<22x480xf32> to vector<1x480xf32>
    %117 = vector.shape_cast %116 : vector<1x480xf32> to vector<1x480xf32>
    %118 = vector.broadcast %117 : vector<1x480xf32> to vector<32x480xf32>
    %119 = arith.mulf %118, %82 : vector<32x480xf32>
    %120 = vector.extract_strided_slice %43 {offsets = [13, 0], sizes = [1, 480], strides = [1, 1]} : vector<22x480xf32> to vector<1x480xf32>
    %121 = vector.shape_cast %120 : vector<1x480xf32> to vector<1x480xf32>
    %122 = vector.broadcast %121 : vector<1x480xf32> to vector<32x480xf32>
    %123 = arith.mulf %122, %82 : vector<32x480xf32>
    %124 = vector.extract_strided_slice %43 {offsets = [14, 0], sizes = [1, 480], strides = [1, 1]} : vector<22x480xf32> to vector<1x480xf32>
    %125 = vector.shape_cast %124 : vector<1x480xf32> to vector<1x480xf32>
    %126 = vector.broadcast %125 : vector<1x480xf32> to vector<32x480xf32>
    %127 = arith.mulf %126, %82 : vector<32x480xf32>
    %128 = vector.extract_strided_slice %43 {offsets = [15, 0], sizes = [1, 480], strides = [1, 1]} : vector<22x480xf32> to vector<1x480xf32>
    %129 = vector.shape_cast %128 : vector<1x480xf32> to vector<1x480xf32>
    %130 = vector.broadcast %129 : vector<1x480xf32> to vector<32x480xf32>
    %131 = arith.mulf %130, %82 : vector<32x480xf32>
    %132 = vector.extract_strided_slice %43 {offsets = [18, 0], sizes = [1, 480], strides = [1, 1]} : vector<22x480xf32> to vector<1x480xf32>
    %133 = vector.shape_cast %132 : vector<1x480xf32> to vector<1x480xf32>
    %134 = vector.broadcast %133 : vector<1x480xf32> to vector<32x480xf32>
    %135 = arith.mulf %134, %82 : vector<32x480xf32>
    %136 = vector.extract_strided_slice %43 {offsets = [19, 0], sizes = [1, 480], strides = [1, 1]} : vector<22x480xf32> to vector<1x480xf32>
    %137 = vector.shape_cast %136 : vector<1x480xf32> to vector<1x480xf32>
    %138 = vector.broadcast %137 : vector<1x480xf32> to vector<32x480xf32>
    %139 = arith.mulf %138, %82 : vector<32x480xf32>
    %140 = vector.extract_strided_slice %43 {offsets = [20, 0], sizes = [1, 480], strides = [1, 1]} : vector<22x480xf32> to vector<1x480xf32>
    %141 = vector.shape_cast %140 : vector<1x480xf32> to vector<1x480xf32>
    %142 = vector.broadcast %141 : vector<1x480xf32> to vector<32x480xf32>
    %143 = arith.mulf %142, %82 : vector<32x480xf32>
    %144 = vector.extract_strided_slice %43 {offsets = [21, 0], sizes = [1, 480], strides = [1, 1]} : vector<22x480xf32> to vector<1x480xf32>
    %145 = vector.shape_cast %144 : vector<1x480xf32> to vector<1x480xf32>
    %146 = vector.broadcast %145 : vector<1x480xf32> to vector<32x480xf32>
    %147 = arith.mulf %146, %82 : vector<32x480xf32>
    %148 = tpu.concatenate %87, %91, %95, %99, %103, %107, %111, %115, %119, %123, %127, %131, %135, %139, %143, %147 in 0 : vector<32x480xf32>, vector<32x480xf32>, vector<32x480xf32>, vector<32x480xf32>, vector<32x480xf32>, vector<32x480xf32>, vector<32x480xf32>, vector<32x480xf32>, vector<32x480xf32>, vector<32x480xf32>, vector<32x480xf32>, vector<32x480xf32>, vector<32x480xf32>, vector<32x480xf32>, vector<32x480xf32>, vector<32x480xf32> -> vector<512x480xf32>
    %cst_34 = arith.constant dense<0.000000e+00> : vector<512x30xf32>
    %149 = tpu.matmul %148, %83, %cst_34 {dimension_numbers = #tpu.dot_dimension_numbers<[1], [0], [0], [1], [0, 0, 1, 1], [], []>} : vector<512x480xf32>, vector<480x30xf32>, vector<512x30xf32> -> vector<512x30xf32>
    %150 = vector.extract_strided_slice %81 {offsets = [0, 0], sizes = [79, 32], strides = [1, 1]} : vector<118x32xf32> to vector<79x32xf32>
    %151 = vector.extract_strided_slice %81 {offsets = [1, 0], sizes = [79, 32], strides = [1, 1]} : vector<118x32xf32> to vector<79x32xf32>
    %152 = vector.extract_strided_slice %81 {offsets = [2, 0], sizes = [79, 32], strides = [1, 1]} : vector<118x32xf32> to vector<79x32xf32>
    %153 = vector.extract_strided_slice %81 {offsets = [3, 0], sizes = [79, 32], strides = [1, 1]} : vector<118x32xf32> to vector<79x32xf32>
    %154 = vector.extract_strided_slice %81 {offsets = [12, 0], sizes = [79, 32], strides = [1, 1]} : vector<118x32xf32> to vector<79x32xf32>
    %155 = vector.extract_strided_slice %81 {offsets = [13, 0], sizes = [79, 32], strides = [1, 1]} : vector<118x32xf32> to vector<79x32xf32>
    %156 = vector.extract_strided_slice %81 {offsets = [14, 0], sizes = [79, 32], strides = [1, 1]} : vector<118x32xf32> to vector<79x32xf32>
    %157 = vector.extract_strided_slice %81 {offsets = [15, 0], sizes = [79, 32], strides = [1, 1]} : vector<118x32xf32> to vector<79x32xf32>
    %158 = vector.extract_strided_slice %81 {offsets = [24, 0], sizes = [79, 32], strides = [1, 1]} : vector<118x32xf32> to vector<79x32xf32>
    %159 = vector.extract_strided_slice %81 {offsets = [25, 0], sizes = [79, 32], strides = [1, 1]} : vector<118x32xf32> to vector<79x32xf32>
    %160 = vector.extract_strided_slice %81 {offsets = [26, 0], sizes = [79, 32], strides = [1, 1]} : vector<118x32xf32> to vector<79x32xf32>
    %161 = vector.extract_strided_slice %81 {offsets = [27, 0], sizes = [79, 32], strides = [1, 1]} : vector<118x32xf32> to vector<79x32xf32>
    %162 = vector.extract_strided_slice %81 {offsets = [36, 0], sizes = [79, 32], strides = [1, 1]} : vector<118x32xf32> to vector<79x32xf32>
    %163 = vector.extract_strided_slice %81 {offsets = [37, 0], sizes = [79, 32], strides = [1, 1]} : vector<118x32xf32> to vector<79x32xf32>
    %164 = vector.extract_strided_slice %81 {offsets = [38, 0], sizes = [79, 32], strides = [1, 1]} : vector<118x32xf32> to vector<79x32xf32>
    %165 = vector.extract_strided_slice %81 {offsets = [39, 0], sizes = [79, 32], strides = [1, 1]} : vector<118x32xf32> to vector<79x32xf32>
    %166 = tpu.concatenate %150, %151, %152, %153, %154, %155, %156, %157, %158, %159, %160, %161, %162, %163, %164, %165 in 1 : vector<79x32xf32>, vector<79x32xf32>, vector<79x32xf32>, vector<79x32xf32>, vector<79x32xf32>, vector<79x32xf32>, vector<79x32xf32>, vector<79x32xf32>, vector<79x32xf32>, vector<79x32xf32>, vector<79x32xf32>, vector<79x32xf32>, vector<79x32xf32>, vector<79x32xf32>, vector<79x32xf32>, vector<79x32xf32> -> vector<79x512xf32>
    %cst_35 = arith.constant dense<0.000000e+00> : vector<79x30xf32>
    %167 = tpu.matmul %166, %149, %cst_35 {dimension_numbers = #tpu.dot_dimension_numbers<[1], [0], [0], [1], [0, 0, 1, 1], [], []>} : vector<79x512xf32>, vector<512x30xf32>, vector<79x30xf32> -> vector<79x30xf32>
    %c0_36 = arith.constant 0 : index
    %c0_37 = arith.constant 0 : index
    %168 = vector.load %arg9[%c0_36, %c0_37] : memref<1x30xf32, #tpu.memory_space<vmem>>, vector<1x30xf32>
    %169 = vector.broadcast %168 : vector<1x30xf32> to vector<79x30xf32>
    %170 = arith.addf %167, %169 : vector<79x30xf32>
    %171 = vector.extract_strided_slice %170 {offsets = [0, 0], sizes = [7, 30], strides = [1, 1]} : vector<79x30xf32> to vector<7x30xf32>
    %172 = vector.extract_strided_slice %170 {offsets = [12, 0], sizes = [7, 30], strides = [1, 1]} : vector<79x30xf32> to vector<7x30xf32>
    %173 = vector.extract_strided_slice %170 {offsets = [24, 0], sizes = [7, 30], strides = [1, 1]} : vector<79x30xf32> to vector<7x30xf32>
    %174 = vector.extract_strided_slice %170 {offsets = [36, 0], sizes = [7, 30], strides = [1, 1]} : vector<79x30xf32> to vector<7x30xf32>
    %175 = vector.extract_strided_slice %170 {offsets = [48, 0], sizes = [7, 30], strides = [1, 1]} : vector<79x30xf32> to vector<7x30xf32>
    %176 = vector.extract_strided_slice %170 {offsets = [60, 0], sizes = [7, 30], strides = [1, 1]} : vector<79x30xf32> to vector<7x30xf32>
    %177 = vector.extract_strided_slice %170 {offsets = [72, 0], sizes = [7, 30], strides = [1, 1]} : vector<79x30xf32> to vector<7x30xf32>
    %178 = tpu.concatenate %171, %172, %173, %174, %175, %176, %177 in 0 : vector<7x30xf32>, vector<7x30xf32>, vector<7x30xf32>, vector<7x30xf32>, vector<7x30xf32>, vector<7x30xf32>, vector<7x30xf32> -> vector<49x30xf32>
    %c0_38 = arith.constant 0 : index
    %c0_39 = arith.constant 0 : index
    %c0_40 = arith.constant 0 : index
    %179 = vector.load %arg10[%c0_38, %c0_39, %c0_40] : memref<1x49x30xf32, #tpu.memory_space<vmem>>, vector<1x49x30xf32>
    %180 = vector.shape_cast %179 : vector<1x49x30xf32> to vector<49x30xf32>
    %181 = vector.shape_cast %178 : vector<49x30xf32> to vector<1x49x30xf32>
    tpu.vector_store %arg10[%c0_38, %c0_39, %c0_40], %181 {strides = array<i32>} : memref<1x49x30xf32, #tpu.memory_space<vmem>>, vector<1x49x30xf32>,
    return
  }
  func.func @transform_0(%arg0: i32) -> (i32, i32, i32) {
    %c0_i32 = arith.constant 0 : i32
    %c0_i32_0 = arith.constant 0 : i32
    %c0_i32_1 = arith.constant 0 : i32
    return %arg0, %c0_i32, %c0_i32_0 : i32, i32, i32
  }
  func.func @transform_1(%arg0: i32) -> (i32, i32, i32) {
    %c0_i32 = arith.constant 0 : i32
    %c0_i32_0 = arith.constant 0 : i32
    %c0_i32_1 = arith.constant 0 : i32
    return %arg0, %c0_i32, %c0_i32_0 : i32, i32, i32
  }
  func.func @transform_2(%arg0: i32) -> (i32, i32) {
    %c0_i32 = arith.constant 0 : i32
    %c0_i32_0 = arith.constant 0 : i32
    %c0_i32_1 = arith.constant 0 : i32
    return %c0_i32, %c0_i32_0 : i32, i32
  }
  func.func @transform_3(%arg0: i32) -> (i32, i32) {
    %c0_i32 = arith.constant 0 : i32
    %c0_i32_0 = arith.constant 0 : i32
    %c0_i32_1 = arith.constant 0 : i32
    return %c0_i32, %c0_i32_0 : i32, i32
  }
  func.func @transform_4(%arg0: i32) -> (i32, i32) {
    %c0_i32 = arith.constant 0 : i32
    %c0_i32_0 = arith.constant 0 : i32
    %c0_i32_1 = arith.constant 0 : i32
    return %c0_i32, %c0_i32_0 : i32, i32
  }
  func.func @transform_5(%arg0: i32) -> (i32, i32) {
    %c0_i32 = arith.constant 0 : i32
    %c0_i32_0 = arith.constant 0 : i32
    %c0_i32_1 = arith.constant 0 : i32
    return %c0_i32, %c0_i32_0 : i32, i32
  }
  func.func @transform_6(%arg0: i32) -> (i32, i32) {
    %c0_i32 = arith.constant 0 : i32
    %c0_i32_0 = arith.constant 0 : i32
    %c0_i32_1 = arith.constant 0 : i32
    return %c0_i32, %c0_i32_0 : i32, i32
  }
  func.func @transform_7(%arg0: i32) -> (i32, i32) {
    %c0_i32 = arith.constant 0 : i32
    %c0_i32_0 = arith.constant 0 : i32
    %c0_i32_1 = arith.constant 0 : i32
    return %c0_i32, %c0_i32_0 : i32, i32
  }
  func.func @transform_8(%arg0: i32) -> (i32, i32) {
    %c0_i32 = arith.constant 0 : i32
    %c0_i32_0 = arith.constant 0 : i32
    %c0_i32_1 = arith.constant 0 : i32
    return %c0_i32, %c0_i32_0 : i32, i32
  }
  func.func @transform_9(%arg0: i32) -> (i32, i32, i32) {
    %c0_i32 = arith.constant 0 : i32
    %c0_i32_0 = arith.constant 0 : i32
    %c0_i32_1 = arith.constant 0 : i32
    return %arg0, %c0_i32, %c0_i32_0 : i32, i32, i32
  }
}

</mosaic_0001>

<bundles_post_ra>
// kernel: up_channel_rpn_forward.1
= control target key start
LH: loop header
LB: loop body
LE: loop exit
PB: predicated region body
PF: predicated region fallthrough
CT: control target
= control target key end

     0   :  { %s7667_s30 = smov 0   ;;  %s11709_s0 = inlined_call_operand.vmem [shape: f32[2,36,16], index: 0, kind: input, shape index: {}]   ;;  %s11710_s1 = inlined_call_operand.vmem [shape: f32[2,144,16], index: 1, kind: input, shape index: {}]   ;;  %s11711_s2 = inlined_call_operand.vmem [shape: f32[144,480], index: 2, kind: input, shape index: {}]   ;;  %s11712_s3 = inlined_call_operand.vmem [shape: f32[1,480], index: 3, kind: input, shape index: {}]   ;;  %s11713_s4 = inlined_call_operand.vmem [shape: f32[144,32], index: 4, kind: input, shape index: {}]   ;;  %s11714_s5 = inlined_call_operand.vmem [shape: f32[1,32], index: 5, kind: input, shape index: {}]   ;;  %s11715_s6 = inlined_call_operand.vmem [shape: f32[32,480], index: 6, kind: input, shape index: {}]   ;;  %s11716_s7 = inlined_call_operand.vmem [shape: f32[480,30], index: 7, kind: input, shape index: {}]   ;;  %s11717_s8 = inlined_call_operand.vmem [shape: f32[1,30], index: 8, kind: input, shape index: {}]   ;;  %s11718_s9 = inlined_call_operand.vmem [shape: f32[2,49,30], index: 9, kind: output, shape index: {}]  }
   0x1 LB: > { %s6382_s10 = sadd.s32 4294967295, %s7610_s30   ;;  %p6386_p0 = scmp.ge.s32.totalorder %s7610_s30, 1  ;;  %s7610_s30 = sphi %s7667_s30, %s19_s30  }
   0x2   : > { %p297_p1 = scmp.lt.s32.totalorder %s7610_s30, 3 }
   0x4   : > { %p298_p2 = pnand %p6386_p0, %p297_p1 }
   0x6   : > { %301 = sbr.rel (%p298_p2) target bundleno = 1164 (0x48c), region = 56 }
   0xb   : > { %v383_v0 = vld [vmem:[%s11711_s2 + $0x38] sm:$0xff]  ;;  %v382_v1 = vld [vmem:[%s11711_s2 + $0x30] sm:$0xff]  ;;  %p338_p3 = scmp.lt.s32.totalorder %s6382_s10, 1  ;;  %v389_v3 = vld [vmem:[%s11711_s2 + $0x68] sm:$0xff]  ;;  %v11725_v5 = vmov 0.0   ;;  %vm476_vm0 = vcmask 130048  }
   0xc   : > { %v379_v2 = vld [vmem:[%s11711_s2 + $0x18] sm:$0xff]  ;;  %766 = vmatprep.subr.mxu1 %v383_v0  ;;  %v378_v4 = vld [vmem:[%s11711_s2 + $0x10] sm:$0xff]  ;;  %802 = vmatprep.mubr.f32.mxu1 %v11725_v5  ;;  %v388_v6 = vld [vmem:[%s11711_s2 + $0x60] sm:$0xff]  ;;  %vm470_vm1 = vcmask 1046528   ;;  %vm821_vm2 = vcmask 1045504   ;;  %vm1012_vm3 = vcmask 1041408  }
   0xd   : > { %767 = vmatpush1.msra.mxu1 %v382_v1  ;;  %511 = vmatprep.subr.mxu0 %v389_v3  ;;  %s12110_s10 = smov (!%p338_p3, %s6382_s10), 1  ;;  %v385_v7 = vld [vmem:[%s11711_s2 + $0x48] sm:$0xff]  ;;  %v384_v8 = vld [vmem:[%s11711_s2 + $0x40] sm:$0xff]  ;;  %v399_v9 = vld [vmem:[%s11711_s2 + $0xb8] sm:$0xff]  ;;  %vm1204_vm4 = vcmask 1040384   ;;  %vm1577_vm5 = vcmask 1043456  }
   0xe   : > { %768 = vmatprep.subr.mxu1 %v379_v2  ;;  %512 = vmatpush1.msra.mxu0 %v388_v6  ;;  %v391_v10 = vld [vmem:[%s11711_s2 + $0x78] sm:$0xff]  ;;  %s7365_s12 = smul.u32 40, %s12110_s10  ;;  %v398_v11 = vld [vmem:[%s11711_s2 + $0xb0] sm:$0xff]  ;;  %v381_v28 = vld [vmem:[%s11711_s2 + $0x28] sm:$0xff]  ;;  %vm1769_vm6 = vcmask 1042432   ;;  %vm7613_vm7 = vmmov 0  }
   0xf   : > { %769 = vmatpush1.msra.mxu1 %v378_v4  ;;  %513 = vmatprep.subr.mxu0 %v385_v7  ;;  %v395_v12 = vld [vmem:[%s11711_s2 + $0x98] sm:$0xff]  ;;  %v394_v19 = vld [vmem:[%s11711_s2 + $0x90] sm:$0xff]  ;;  %v380_v35 = vld [vmem:[%s11711_s2 + $0x20] sm:$0xff]  ;;  %s7366_s20 = smul.u32 144, %s12110_s10  ;;  %vm4534_vm8 = vcmask 785408   ;;  %vm5608_vm9 = vcmask 1044480  }
  0x10   : > { %514 = vmatpush1.msra.mxu0 %v384_v8  ;;  %547 = vmatprep.mubr.f32.mxu0 %v11725_v5  ;;  %s7713_s15 = scalar_lea.vmem %s11709_s0, %s7365_s12  ;;  %v390_v21 = vld [vmem:[%s11711_s2 + $0x70] sm:$0xff]  ;;  %v387_v22 = vld [vmem:[%s11711_s2 + $0x58] sm:$0xff]  ;;  %v377_v36 = vld [vmem:[%s11711_s2 + $0x8] sm:$0xff]  ;;  %s7614_s25 = smov 96   ;;  %vm5950_vm10 = vcmask 261120   ;;  %vm5961_vm11 = vcmask 523264  }
  0x11   : > { %944 = vmatprep.subr.mxu1 %v399_v9  ;;  %594 = vmatprep.subr.mxu0 %v391_v10  ;;  %v7722_v13 = vld [vmem:[%s7713_s15] sm:$0xff]  ;;  %v7725_v14 = vld [vmem:[%s7713_s15 + $0x8] sm:$0xff]  ;;  %v7728_v15 = vld [vmem:[%s7713_s15 + $0x10] sm:$0xff]  ;;  %s8124_s27 = scalar_lea.vmem %s11710_s1, %s7366_s20  ;;  %s7615_s26 = smov 32   ;;  %vm6306_vm12 = vcmask 244736   ;;  %vm6313_vm13 = vcmask 237568  }
  0x12   : > { %6399 = vmatmul.mubr.msk.f32.vlgmr.msra.gmra.mxu1 %vm476_vm0, %v7722_v13  ;;  %v471_v16 = vrot.slane %v7722_v13, 1  ;;  %v472_v17 = vrot.slane %v7725_v14, 1  ;;  %v7735_v18 = vrot.slane %v7728_v15, 1  ;;  %v407_v23 = vld [vmem:[%s11711_s2 + $0xf8] sm:$0xff]  ;;  %v822_v25 = vrot.slane %v7722_v13, 2  ;;  %v386_v27 = vld [vmem:[%s11711_s2 + $0x50] sm:$0xff] }
  0x13   : > { %808 = vmatprep.mubr.f32.mxu1 %v11725_v5  ;;  %945 = vmatpush1.msra.mxu1 %v398_v11  ;;  %v823_v26 = vrot.slane %v7725_v14, 2  ;;  %v7775_v30 = vrot.slane %v7728_v15, 2  ;;  %v406_v31 = vld [vmem:[%s11711_s2 + $0xf0] sm:$0xff]  ;;  %v403_v32 = vld [vmem:[%s11711_s2 + $0xd8] sm:$0xff]  ;;  %v1013_v38 = vrot.slane %v7722_v13, 6  ;;  %v1014_v39 = vrot.slane %v7725_v14, 6 }
  0x14   : > { %v473_v20 = vsel %vm470_vm1, %v471_v16, %v472_v17  ;;  %946 = vmatprep.subr.mxu1 %v395_v12  ;;  %v475_v24 = vsel %vm470_vm1, %v472_v17, %v7735_v18  ;;  %v402_v33 = vld [vmem:[%s11711_s2 + $0xd0] sm:$0xff]  ;;  %v415_v37 = vld [vmem:[%s11711_s2 + $0x138] sm:$0xff]  ;;  %v376_v40 = vld [vmem:[%s11711_s2] sm:$0xff]  ;;  %v1016_v43 = vrot.slane %v7728_v15, 6  ;;  %v1205_v54 = vrot.slane %v7722_v13, 7  ;;  %s7616_s29 = smov 64  }
  0x15   : > { %6390 = vmatmul.mubr.msk.f32.vlgmr.msra.gmra.mxu0 %vm476_vm0, %v473_v20  ;;  %947 = vmatpush1.msra.mxu1 %v394_v19  ;;  %v7772_v29 = vsel %vm821_vm2, %v822_v25, %v823_v26  ;;  %v7794_v34 = vsel %vm821_vm2, %v823_v26, %v7775_v30  ;;  %v397_v41 = vld [vmem:[%s11711_s2 + $0xa8] sm:$0xff]  ;;  %v7824_v42 = vsel %vm1012_vm3, %v1013_v38, %v1014_v39  ;;  %v7828_v44 = vld [vmem:[%s7713_s15 + $0x18] sm:$0xff]  ;;  %v414_v45 = vld [vmem:[%s11711_s2 + $0x130] sm:$0xff]  ;;  %v1206_v55 = vrot.slane %v7725_v14, 7  ;;  %s7367_s18 = smul.u32 56, %s12110_s10 }
  0x16   : > { %6400 = vmatmul.mubr.msk.f32.gmra.mxu1 %vm476_vm0, %v7725_v14  ;;  %553 = vmatprep.mubr.f32.mxu0 %v11725_v5  ;;  %v411_v46 = vld [vmem:[%s11711_s2 + $0x118] sm:$0xff]  ;;  %v410_v47 = vld [vmem:[%s11711_s2 + $0x110] sm:$0xff]  ;;  %v7846_v48 = vsel %vm1012_vm3, %v1014_v39, %v1016_v43  ;;  %v1018_v49 = vrot.slane %v7828_v44, 6  ;;  %v396_v50 = vld [vmem:[%s11711_s2 + $0xa0] sm:$0xff]  ;;  %v1208_v59 = vrot.slane %v7728_v15, 7  ;;  %v1210_v0 = vrot.slane %v7828_v44, 7 }
  0x17   : > { %814 = vmatprep.mubr.f32.mxu1 %v11725_v5  ;;  %595 = vmatpush1.msra.mxu0 %v390_v21  ;;  %v393_v51 = vld [vmem:[%s11711_s2 + $0x88] sm:$0xff]  ;;  %v423_v52 = vld [vmem:[%s11711_s2 + $0x178] sm:$0xff]  ;;  %v392_v56 = vld [vmem:[%s11711_s2 + $0x80] sm:$0xff]  ;;  %v7884_v58 = vsel %vm1204_vm4, %v1205_v54, %v1206_v55  ;;  %v1578_v16 = vrot.slane %v7725_v14, 4  ;;  %v1579_v17 = vrot.slane %v7728_v15, 4  ;;  %v1581_v21 = vrot.slane %v7828_v44, 4  ;;  %s11669_s21 = scalar_lea.vmem %s11718_s9, %s7367_s18 }
  0x18   : > { %596 = vmatprep.subr.mxu0 %v387_v22  ;;  %1137 = vmatprep.subr.mxu1 %v407_v23  ;;  %v7867_v53 = vsel %vm1012_vm3, %v1016_v43, %v1018_v49  ;;  %v405_v57 = vld [vmem:[%s11711_s2 + $0xe8] sm:$0xff]  ;;  %v422_v60 = vld [vmem:[%s11711_s2 + $0x170] sm:$0xff]  ;;  %v419_v61 = vld [vmem:[%s11711_s2 + $0x158] sm:$0xff]  ;;  %v7903_v63 = vsel %vm1204_vm4, %v1206_v55, %v1208_v59  ;;  %v7922_v4 = vsel %vm1204_vm4, %v1208_v59, %v1210_v0 }
  0x19   : > { %6391 = vmatmul.mubr.msk.f32.gmra.mxu0 %vm476_vm0, %v475_v24  ;;  %v418_v62 = vld [vmem:[%s11711_s2 + $0x150] sm:$0xff]  ;;  %v404_v1 = vld [vmem:[%s11711_s2 + $0xe0] sm:$0xff]  ;;  %v401_v2 = vld [vmem:[%s11711_s2 + $0xc8] sm:$0xff]  ;;  %v8003_v26 = vsel %vm1577_vm5, %v1579_v17, %v1581_v21 }
  0x1a   : > { %6401 = vmatmul.mubr.msk.f32.gmra.mxu1 %vm476_vm0, %v7728_v15  ;;  %559 = vmatprep.mubr.f32.mxu0 %v11725_v5  ;;  %v431_v3 = vld [vmem:[%s11711_s2 + $0x1b8] sm:$0xff]  ;;  %v400_v6 = vld [vmem:[%s11711_s2 + $0xc0] sm:$0xff]  ;;  %v413_v7 = vld [vmem:[%s11711_s2 + $0x128] sm:$0xff] }
  0x1b   : > { %980 = vmatprep.mubr.f32.mxu1 %v11725_v5  ;;  %597 = vmatpush1.msra.mxu0 %v386_v27  ;;  %v430_v8 = vld [vmem:[%s11711_s2 + $0x1b0] sm:$0xff]  ;;  %v427_v9 = vld [vmem:[%s11711_s2 + $0x198] sm:$0xff]  ;;  %v412_v11 = vld [vmem:[%s11711_s2 + $0x120] sm:$0xff] }
  0x1c   : > { %683 = vmatprep.subr.mxu0 %v381_v28  ;;  %v426_v10 = vld [vmem:[%s11711_s2 + $0x190] sm:$0xff]  ;;  %v409_v12 = vld [vmem:[%s11711_s2 + $0x108] sm:$0xff]  ;;  %v7985_v22 = vld [vmem:[%s7713_s15 + $0x20] sm:$0xf] }
  0x1d   : > { %6392 = vmatmul.mubr.msk.f32.gmra.mxu0 %vm476_vm0, %v7735_v18  ;;  %v421_v19 = vld [vmem:[%s11711_s2 + $0x168] sm:$0xff]  ;;  %v438_v23 = vld [vmem:[%s11711_s2 + $0x1f0] sm:$0xff]  ;;  %v1583_v27 = vrot.slane %v7985_v22, 4  ;;  %v420_v28 = vld [vmem:[%s11711_s2 + $0x160] sm:$0xff] }
  0x1e   : > { %6405 = vmatmul.mubr.msk.f32.vlgmr.msra.gmra.mxu1 %vm476_vm0, %v7772_v29  ;;  %630 = vmatprep.mubr.f32.mxu0 %v11725_v5  ;;  %v434_v25 = vld [vmem:[%s11711_s2 + $0x1d0] sm:$0xff]  ;;  %v443_v39 = vld [vmem:[%s11711_s2 + $0x218] sm:$0xff]  ;;  %v428_v43 = vld [vmem:[%s11711_s2 + $0x1a0] sm:$0xff] }
  0x1f   : > { %986 = vmatprep.mubr.f32.mxu1 %v11725_v5  ;;  %1138 = vmatpush1.msra.mxu1 %v406_v31  ;;  %v8022_v31 = vsel %vm1577_vm5, %v1581_v21, %v1583_v27  ;;  %v446_v38 = vld [vmem:[%s11711_s2 + $0x230] sm:$0xff]  ;;  %v433_v54 = vld [vmem:[%s11711_s2 + $0x1c8] sm:$0xff]  ;;  %v8188_v0 = vld [vmem:[%s8124_s27 + $0x18] sm:$0xff] }
  0x20   : > { %1139 = vmatprep.subr.mxu1 %v403_v32  ;;  %v1770_v32 = vrot.slane %v7725_v14, 5  ;;  %v8157_v59 = vld [vmem:[%s8124_s27 + $0x8] sm:$0xff] }
  0x21   : > { %6393 = vmatmul.mubr.msk.f32.vlgmr.msra.gmra.mxu0 %vm476_vm0, %v473_v20  ;;  %1140 = vmatpush1.msra.mxu1 %v402_v33  ;;  %v7981_v20 = vsel %vm1577_vm5, %v1578_v16, %v1579_v17  ;;  %v1771_v33 = vrot.slane %v7728_v15, 5  ;;  %v452_v16 = vld [vmem:[%s11713_s4 + $0x20] sm:$0xff] }
  0x22   : > { %6406 = vmatmul.mubr.msk.f32.gmra.mxu1 %vm476_vm0, %v7794_v34  ;;  %636 = vmatprep.mubr.f32.mxu0 %v11725_v5 }
  0x23   : > { %992 = vmatprep.mubr.f32.mxu1 %v11725_v5  ;;  %684 = vmatpush1.msra.mxu0 %v380_v35  ;;  %v429_v35 = vld [vmem:[%s11711_s2 + $0x1a8] sm:$0xff] }
  0x24   : > { %685 = vmatprep.subr.mxu0 %v377_v36  ;;  %1329 = vmatprep.subr.mxu1 %v415_v37  ;;  %v8039_v36 = vsel %vm1769_vm6, %v1770_v32, %v1771_v33  ;;  %v1773_v37 = vrot.slane %v7828_v44, 5 }
  0x25   : > { %6394 = vmatmul.mubr.msk.f32.gmra.mxu0 %vm476_vm0, %v475_v24  ;;  %v435_v24 = vld [vmem:[%s11711_s2 + $0x1d8] sm:$0xff] }
  0x26   : > { %6407 = vmatmul.mubr.msk.f32.gmra.mxu1 %vm476_vm0, %v7775_v30  ;;  %642 = vmatprep.mubr.f32.mxu0 %v11725_v5 }
  0x27   : > { %1173 = vmatprep.mubr.f32.mxu1 %v11725_v5  ;;  %686 = vmatpush1.msra.mxu0 %v376_v40  ;;  %v442_v40 = vld [vmem:[%s11711_s2 + $0x210] sm:$0xff] }
  0x28   : > { %861 = vmatprep.subr.mxu0 %v397_v41  ;;  %v8058_v41 = vsel %vm1769_vm6, %v1771_v33, %v1773_v37 }
  0x29   : > { %6395 = vmatmul.mubr.msk.f32.gmra.mxu0 %vm476_vm0, %v7735_v18  ;;  %v408_v18 = vld [vmem:[%s11711_s2 + $0x100] sm:$0xff] }
  0x2a   : > { %6411 = vmatmul.mubr.msk.f32.vlgmr.msra.gmra.mxu1 %vm476_vm0, %v7824_v42  ;;  %719 = vmatprep.mubr.f32.mxu0 %v11725_v5 }
  0x2b   : > { %1179 = vmatprep.mubr.f32.mxu1 %v11725_v5  ;;  %1330 = vmatpush1.msra.mxu1 %v414_v45  ;;  %v425_v45 = vld [vmem:[%s11711_s2 + $0x188] sm:$0xff] }
  0x2c   : > { %1331 = vmatprep.subr.mxu1 %v411_v46 }
  0x2d   : > { %6396 = vmatmul.mubr.msk.f32.vlgmr.msra.gmra.mxu0 %vm476_vm0, %v7722_v13  ;;  %1332 = vmatpush1.msra.mxu1 %v410_v47  ;;  %v439_v13 = vld [vmem:[%s11711_s2 + $0x1f8] sm:$0xff]  ;;  %v437_v47 = vld [vmem:[%s11711_s2 + $0x1e8] sm:$0xff] }
  0x2e   : > { %6412 = vmatmul.mubr.msk.f32.gmra.mxu1 %vm476_vm0, %v7846_v48  ;;  %725 = vmatprep.mubr.f32.mxu0 %v11725_v5 }
  0x2f   : > { %1185 = vmatprep.mubr.f32.mxu1 %v11725_v5  ;;  %862 = vmatpush1.msra.mxu0 %v396_v50  ;;  %v449_v50 = vld [vmem:[%s11713_s4 + $0x8] sm:$0xff] }
  0x30   : > { %863 = vmatprep.subr.mxu0 %v393_v51  ;;  %1509 = vmatprep.subr.mxu1 %v423_v52  ;;  %v1961_v51 = vrot.slane %v7985_v22, 6  ;;  %v436_v52 = vld [vmem:[%s11711_s2 + $0x1e0] sm:$0xff] }
  0x31   : > { %6397 = vmatmul.mubr.msk.f32.gmra.mxu0 %vm476_vm0, %v7725_v14 }
  0x32   : > { %6413 = vmatmul.mubr.msk.f32.gmra.mxu1 %vm476_vm0, %v7867_v53  ;;  %731 = vmatprep.mubr.f32.mxu0 %v11725_v5  ;;  %v8119_v55 = vsel %vm1012_vm3, %v1018_v49, %v1961_v51  ;;  %v8141_v49 = vld [vmem:[%s8124_s27] sm:$0xff] }
  0x33   : > { %1365 = vmatprep.mubr.f32.mxu1 %v11725_v5  ;;  %864 = vmatpush1.msra.mxu0 %v392_v56  ;;  %v432_v56 = vld [vmem:[%s11711_s2 + $0x1c0] sm:$0xff] }
  0x34   : > { %1054 = vmatprep.subr.mxu0 %v405_v57  ;;  %v455_v57 = vld [vmem:[%s11713_s4 + $0x38] sm:$0xff] }
  0x35   : > { %6398 = vmatmul.mubr.msk.f32.gmra.mxu0 %vm476_vm0, %v7728_v15 }
  0x36   : > { %6417 = vmatmul.mubr.msk.f32.vlgmr.msra.gmra.mxu1 %vm476_vm0, %v7884_v58  ;;  %897 = vmatprep.mubr.f32.mxu0 %v11725_v5 }
  0x37   : > { %1371 = vmatprep.mubr.f32.mxu1 %v11725_v5  ;;  %1510 = vmatpush1.msra.mxu1 %v422_v60  ;;  %v444_v60 = vld [vmem:[%s11711_s2 + $0x220] sm:$0xff] }
  0x38   : > { %1511 = vmatprep.subr.mxu1 %v419_v61  ;;  %v441_v61 = vld [vmem:[%s11711_s2 + $0x208] sm:$0xff] }
  0x39   : > { %6402 = vmatmul.mubr.msk.f32.vlgmr.msra.gmra.mxu0 %vm476_vm0, %v7772_v29  ;;  %1512 = vmatpush1.msra.mxu1 %v418_v62  ;;  %v417_v29 = vld [vmem:[%s11711_s2 + $0x148] sm:$0xff]  ;;  %v8174_v62 = vld [vmem:[%s8124_s27 + $0x10] sm:$0xff] }
  0x3a   : > { %6418 = vmatmul.mubr.msk.f32.gmra.mxu1 %vm476_vm0, %v7903_v63  ;;  %903 = vmatprep.mubr.f32.mxu0 %v11725_v5 }
  0x3b   : > { %1377 = vmatprep.mubr.f32.mxu1 %v11725_v5  ;;  %1055 = vmatpush1.msra.mxu0 %v404_v1  ;;  %v8199_v1 = vld [vmem:[%s8124_s27 + $0x20] sm:$0xff] }
  0x3c   : > { %1056 = vmatprep.subr.mxu0 %v401_v2  ;;  %1702 = vmatprep.subr.mxu1 %v431_v3  ;;  %v451_v2 = vld [vmem:[%s11713_s4 + $0x18] sm:$0xff]  ;;  %v8212_v3 = vld [vmem:[%s8124_s27 + $0x28] sm:$0xff] }
  0x3d   : > { %6403 = vmatmul.mubr.msk.f32.gmra.mxu0 %vm476_vm0, %v7794_v34  ;;  %v416_v34 = vld [vmem:[%s11711_s2 + $0x140] sm:$0xff]  ;;  %v2201_v21 = vrot.slane %v8212_v3, 1  ;;  %v2784_v51 = vrot.slane %v8212_v3, 4 }
  0x3e   : > { %6419 = vmatmul.mubr.msk.f32.gmra.mxu1 %vm476_vm0, %v7922_v4  ;;  %909 = vmatprep.mubr.f32.mxu0 %v11725_v5 }
  0x3f   : > { %1545 = vmatprep.mubr.f32.mxu1 %v11725_v5  ;;  %1057 = vmatpush1.msra.mxu0 %v400_v6  ;;  %v2193_v6 = vrot.slane %v8157_v59, 1 }
  0x40   : > { %1246 = vmatprep.subr.mxu0 %v413_v7  ;;  %v8228_v7 = vld [vmem:[%s8124_s27 + $0x30] sm:$0xff] }
  0x41   : > { %6404 = vmatmul.mubr.msk.f32.gmra.mxu0 %vm476_vm0, %v7775_v30  ;;  %v447_v30 = vld [vmem:[%s11711_s2 + $0x238] sm:$0xff] }
  0x42   : > { %6423 = vmatmul.mubr.msk.f32.vlgmr.msra.gmra.mxu1 %vm476_vm0, %v7725_v14  ;;  %1090 = vmatprep.mubr.f32.mxu0 %v11725_v5 }
  0x43   : > { %1551 = vmatprep.mubr.f32.mxu1 %v11725_v5  ;;  %1703 = vmatpush1.msra.mxu1 %v430_v8  ;;  %v2195_v8 = vrot.slane %v8174_v62, 1 }
  0x44   : > { %1704 = vmatprep.subr.mxu1 %v427_v9  ;;  %v8242_v9 = vld [vmem:[%s8124_s27 + $0x38] sm:$0xff] }
  0x45   : > { %6408 = vmatmul.mubr.msk.f32.vlgmr.msra.gmra.mxu0 %vm476_vm0, %v7824_v42  ;;  %1705 = vmatpush1.msra.mxu1 %v426_v10  ;;  %v1775_v42 = vrot.slane %v7985_v22, 5  ;;  %v453_v10 = vld [vmem:[%s11713_s4 + $0x28] sm:$0xff]  ;;  %v8288_v22 = vld [vmem:[%s8124_s27 + $0x50] sm:$0xff]  ;;  %v2205_v27 = vrot.slane %v8242_v9, 1 }
  0x46   : > { %6424 = vmatmul.mubr.msk.f32.gmra.mxu1 %vm476_vm0, %v7728_v15  ;;  %1096 = vmatprep.mubr.f32.mxu0 %v11725_v5 }
  0x47   : > { %1557 = vmatprep.mubr.f32.mxu1 %v11725_v5  ;;  %1247 = vmatpush1.msra.mxu0 %v412_v11  ;;  %v8074_v46 = vsel %vm1769_vm6, %v1773_v37, %v1775_v42  ;;  %v2196_v11 = vsel %vm470_vm1, %v2193_v6, %v2195_v8 }
  0x48   : > { %1248 = vmatprep.subr.mxu0 %v409_v12  ;;  %1894 = vmatprep.subr.mxu1 %v439_v13  ;;  %v2197_v12 = vrot.slane %v8188_v0, 1  ;;  %v8257_v13 = vld [vmem:[%s8124_s27 + $0x40] sm:$0xff] }
  0x49   : > { %6409 = vmatmul.mubr.msk.f32.gmra.mxu0 %vm476_vm0, %v7846_v48 }
  0x4a   : > { %6425 = vmatmul.mubr.msk.f32.gmra.mxu1 %vm476_vm0, %v7828_v44  ;;  %1102 = vmatprep.mubr.f32.mxu0 %v11725_v5  ;;  %v2198_v17 = vsel %vm470_vm1, %v2195_v8, %v2197_v12  ;;  %v2564_v8 = vrot.slane %v8174_v62, 2 }
  0x4b   : > { %1738 = vmatprep.mubr.f32.mxu1 %v11725_v5  ;;  %1249 = vmatpush1.msra.mxu0 %v408_v18  ;;  %v2199_v18 = vrot.slane %v8199_v1, 1 }
  0x4c   : > { %1426 = vmatprep.subr.mxu0 %v421_v19  ;;  %v8273_v19 = vld [vmem:[%s8124_s27 + $0x48] sm:$0xff] }
  0x4d   : > { %6410 = vmatmul.mubr.msk.f32.gmra.mxu0 %vm476_vm0, %v7867_v53  ;;  %v2209_v33 = vrot.slane %v8273_v19, 1 }
  0x4e   : > { %6429 = vmatmul.mubr.msk.f32.vlgmr.msra.gmra.mxu1 %vm476_vm0, %v7981_v20  ;;  %1282 = vmatprep.mubr.f32.mxu0 %v11725_v5 }
  0x4f   : > { %1744 = vmatprep.mubr.f32.mxu1 %v11725_v5  ;;  %1895 = vmatpush1.msra.mxu1 %v438_v23  ;;  %v8297_v23 = vsel %vm470_vm1, %v2199_v18, %v2201_v21 }
  0x50   : > { %1896 = vmatprep.subr.mxu1 %v435_v24  ;;  %v2203_v24 = vrot.slane %v8228_v7, 1 }
  0x51   : > { %6414 = vmatmul.mubr.msk.f32.vlgmr.msra.gmra.mxu0 %vm476_vm0, %v7884_v58  ;;  %1897 = vmatpush1.msra.mxu1 %v434_v25  ;;  %v454_v58 = vld [vmem:[%s11713_s4 + $0x30] sm:$0xff]  ;;  %v8303_v25 = vld [vmem:[%s8124_s27 + $0x58] sm:$0xff] }
  0x52   : > { %6430 = vmatmul.mubr.msk.f32.gmra.mxu1 %vm476_vm0, %v8003_v26  ;;  %1288 = vmatprep.mubr.f32.mxu0 %v11725_v5 }
  0x53   : > { %1750 = vmatprep.mubr.f32.mxu1 %v11725_v5  ;;  %1427 = vmatpush1.msra.mxu0 %v420_v28  ;;  %v8318_v28 = vld [vmem:[%s8124_s27 + $0x60] sm:$0xff] }
  0x54   : > { %1428 = vmatprep.subr.mxu0 %v417_v29  ;;  %2076 = vmatprep.subr.mxu1 %v447_v30  ;;  %v8327_v29 = vsel %vm470_vm1, %v2203_v24, %v2205_v27  ;;  %v2207_v30 = vrot.slane %v8257_v13, 1 }
  0x55   : > { %6415 = vmatmul.mubr.msk.f32.gmra.mxu0 %vm476_vm0, %v7903_v63  ;;  %v440_v63 = vld [vmem:[%s11711_s2 + $0x200] sm:$0xff] }
  0x56   : > { %6431 = vmatmul.mubr.msk.f32.gmra.mxu1 %vm476_vm0, %v8022_v31  ;;  %1294 = vmatprep.mubr.f32.mxu0 %v11725_v5  ;;  %v8342_v32 = vsel %vm470_vm1, %v2205_v27, %v2207_v30  ;;  %v8359_v37 = vsel %vm470_vm1, %v2207_v30, %v2209_v33  ;;  %v2568_v30 = vrot.slane %v8199_v1, 2 }
  0x57   : > { %1930 = vmatprep.mubr.f32.mxu1 %v11725_v5  ;;  %1429 = vmatpush1.msra.mxu0 %v416_v34  ;;  %v8348_v34 = vld [vmem:[%s8124_s27 + $0x70] sm:$0xff] }
  0x58   : > { %1619 = vmatprep.subr.mxu0 %v429_v35  ;;  %v2777_v35 = vrot.slane %v8157_v59, 4 }
  0x59   : > { %6416 = vmatmul.mubr.msk.f32.gmra.mxu0 %vm476_vm0, %v7922_v4  ;;  %v450_v4 = vld [vmem:[%s11713_s4 + $0x10] sm:$0xff] }
  0x5a   : > { %6435 = vmatmul.mubr.msk.f32.vlgmr.msra.gmra.mxu1 %vm476_vm0, %v8039_v36  ;;  %1462 = vmatprep.mubr.f32.mxu0 %v11725_v5 }
  0x5b   : > { %1936 = vmatprep.mubr.f32.mxu1 %v11725_v5  ;;  %2077 = vmatpush1.msra.mxu1 %v446_v38  ;;  %v2211_v38 = vrot.slane %v8288_v22, 1 }
  0x5c   : > { %2078 = vmatprep.subr.mxu1 %v443_v39 }
  0x5d   : > { %6420 = vmatmul.mubr.msk.f32.vlgmr.msra.gmra.mxu0 %vm476_vm0, %v7725_v14  ;;  %2079 = vmatpush1.msra.mxu1 %v442_v40  ;;  %v424_v14 = vld [vmem:[%s11711_s2 + $0x180] sm:$0xff]  ;;  %v2780_v40 = vrot.slane %v8188_v0, 4  ;;  %v8375_v42 = vsel %vm470_vm1, %v2209_v33, %v2211_v38 }
  0x5e   : > { %6436 = vmatmul.mubr.msk.f32.gmra.mxu1 %vm476_vm0, %v8058_v41  ;;  %1468 = vmatprep.mubr.f32.mxu0 %v11725_v5 }
  0x5f   : > { %1942 = vmatprep.mubr.f32.mxu1 %v11725_v5  ;;  %1620 = vmatpush1.msra.mxu0 %v428_v43  ;;  %v2213_v43 = vrot.slane %v8303_v25, 1 }
  0x60   : > { %1621 = vmatprep.subr.mxu0 %v425_v45  ;;  %6973 = vmatprep.subr.mxu1 %v11725_v5  ;;  %v458_v45 = vld [vmem:[%s11713_s4 + $0x50] sm:$0xff] }
  0x61   : > { %6421 = vmatmul.mubr.msk.f32.gmra.mxu0 %vm476_vm0, %v7728_v15  ;;  %v448_v15 = vld [vmem:[%s11713_s4] sm:$0xff] }
  0x62   : > { %6437 = vmatmul.mubr.msk.f32.gmra.mxu1 %vm476_vm0, %v8074_v46  ;;  %1474 = vmatprep.mubr.f32.mxu0 %v11725_v5 }
  0x63   : > { %2112 = vmatprep.mubr.f32.mxu1 %v11725_v5  ;;  %1622 = vmatpush1.msra.mxu0 %v424_v14  ;;  %v2782_v14 = vrot.slane %v8199_v1, 4 }
  0x64   : > { %1811 = vmatprep.subr.mxu0 %v437_v47  ;;  %v8392_v47 = vsel %vm470_vm1, %v2211_v38, %v2213_v43 }
  0x65   : > { %6422 = vmatmul.mubr.msk.f32.gmra.mxu0 %vm476_vm0, %v7828_v44  ;;  %v445_v44 = vld [vmem:[%s11711_s2 + $0x228] sm:$0xff] }
  0x66   : > { %6441 = vmatmul.mubr.msk.f32.vlgmr.msra.gmra.mxu1 %vm476_vm0, %v7846_v48  ;;  %1655 = vmatprep.mubr.f32.mxu0 %v11725_v5 }
  0x67   : > { %2118 = vmatprep.mubr.f32.mxu1 %v11725_v5  ;;  %6974 = vmatpush3.msra.mxu1 %v449_v50  ;;  %v2215_v50 = vrot.slane %v8318_v28, 1 }
  0x68   : > { %6975 = vmatprep.subr.mxu1 %v11725_v5 }
  0x69   : > { %6426 = vmatmul.mubr.msk.f32.vlgmr.msra.gmra.mxu0 %vm476_vm0, %v7981_v20  ;;  %6976 = vmatpush3.msra.mxu1 %v448_v15  ;;  %v8282_v20 = vsel %vm470_vm1, %v2197_v12, %v2199_v18  ;;  %v2783_v15 = vsel %vm1577_vm5, %v2780_v40, %v2782_v14  ;;  %v457_v12 = vld [vmem:[%s11713_s4 + $0x48] sm:$0xff] }
  0x6a   : > { %6442 = vmatmul.mubr.msk.f32.gmra.mxu1 %vm476_vm0, %v7867_v53  ;;  %1661 = vmatprep.mubr.f32.mxu0 %v11725_v5 }
  0x6b   : > { %2124 = vmatprep.mubr.f32.mxu1 %v11725_v5  ;;  %1812 = vmatpush1.msra.mxu0 %v436_v52  ;;  %v8406_v52 = vsel %vm470_vm1, %v2213_v43, %v2215_v50 }
  0x6c   : > { %1813 = vmatprep.subr.mxu0 %v433_v54  ;;  %7071 = vmatprep.subr.mxu1 %v11725_v5 }
  0x6d   : > { %6427 = vmatmul.mubr.msk.f32.gmra.mxu0 %vm476_vm0, %v8003_v26  ;;  %v8312_v26 = vsel %vm470_vm1, %v2201_v21, %v2203_v24  ;;  %v2796_v21 = vrot.slane %v8303_v25, 4  ;;  %v456_v24 = vld [vmem:[%s11713_s4 + $0x40] sm:$0xff] }
  0x6e   : > { %6443 = vmatmul.mubr.msk.f32.gmra.mxu1 %vm476_vm0, %v8119_v55  ;;  %1667 = vmatprep.mubr.f32.mxu0 %v11725_v5 }
  0x6f   : > { %6977 = vmatprep.mubr.msk.f32.mxu1 %vm7613_vm7, %v11725_v5  ;;  %1814 = vmatpush1.msra.mxu0 %v432_v56  ;;  %v2786_v56 = vrot.slane %v8228_v7, 4 }
  0x70   : > { %1993 = vmatprep.subr.mxu0 %v445_v44 }
  0x71   : > { %6428 = vmatmul.mubr.msk.f32.gmra.mxu0 %vm476_vm0, %v8022_v31  ;;  %v8333_v31 = vld [vmem:[%s8124_s27 + $0x68] sm:$0xff] }
  0x72   : > { %6978 = vmatmul.mubr.msk.f32.vlgmr.msra.gmra.mxu1 %vm476_vm0, %v8141_v49  ;;  %1847 = vmatprep.mubr.f32.mxu0 %v11725_v5  ;;  %v2217_v54 = vrot.slane %v8333_v31, 1 }
  0x73   : > { %6980 = vmatprep.mubr.msk.f32.mxu1 %vm7613_vm7, %v11725_v5  ;;  %7072 = vmatpush3.msra.mxu1 %v455_v57  ;;  %v8422_v57 = vrot.slane %v8348_v34, 1 }
  0x74   : > { %7073 = vmatprep.subr.mxu1 %v11725_v5  ;;  %v8419_v44 = vsel %vm470_vm1, %v2215_v50, %v2217_v54  ;;  %v2572_v50 = vrot.slane %v8228_v7, 2 }
  0x75   : > { %6432 = vmatmul.mubr.msk.f32.vlgmr.msra.gmra.mxu0 %vm476_vm0, %v8039_v36  ;;  %7074 = vmatpush3.msra.mxu1 %v454_v58  ;;  %v2778_v36 = vrot.slane %v8174_v62, 4  ;;  %v2787_v58 = vsel %vm1577_vm5, %v2784_v51, %v2786_v56 }
  0x76   : > { %6981 = vmatmul.mubr.msk.f32.gmra.mxu1 %vm476_vm0, %v8157_v59  ;;  %1853 = vmatprep.mubr.f32.mxu0 %v11725_v5 }
  0x77   : > { %6983 = vmatprep.mubr.msk.f32.mxu1 %vm7613_vm7, %v11725_v5  ;;  %1994 = vmatpush1.msra.mxu0 %v444_v60  ;;  %v2779_v39 = vsel %vm1577_vm5, %v2777_v35, %v2778_v36  ;;  %v2788_v60 = vrot.slane %v8242_v9, 4  ;;  %v2798_v35 = vrot.slane %v8318_v28, 4 }
  0x78   : > { %1995 = vmatprep.subr.mxu0 %v441_v61  ;;  %7169 = vmatprep.subr.mxu1 %v11725_v5  ;;  %v8435_v61 = vsel %vm470_vm1, %v2217_v54, %v8422_v57  ;;  %v2802_v54 = vrot.slane %v8348_v34, 4 }
  0x79   : > { %6433 = vmatmul.mubr.msk.f32.gmra.mxu0 %vm476_vm0, %v8058_v41  ;;  %v459_v41 = vld [vmem:[%s11713_s4 + $0x58] sm:$0xff] }
  0x7a   : > { %6984 = vmatmul.mubr.msk.f32.gmra.mxu1 %vm476_vm0, %v8174_v62  ;;  %1859 = vmatprep.mubr.f32.mxu0 %v11725_v5 }
  0x7b   : > { %6986 = vmatprep.mubr.msk.f32.mxu1 %vm7613_vm7, %v11725_v5  ;;  %1996 = vmatpush1.msra.mxu0 %v440_v63  ;;  %v2789_v63 = vsel %vm1577_vm5, %v2786_v56, %v2788_v60  ;;  %v8521_v56 = vld [vmem:[%s8124_s27 + $0x78] sm:$0xff] }
  0x7c   : > { %6924 = vmatprep.subr.mxu0 %v11725_v5 }
  0x7d   : > { %6434 = vmatmul.mubr.msk.f32.gmra.mxu0 %vm476_vm0, %v8074_v46  ;;  %v2781_v46 = vsel %vm1577_vm5, %v2778_v36, %v2780_v40  ;;  %v2799_v40 = vsel %vm1577_vm5, %v2796_v21, %v2798_v35 }
  0x7e   : > { %6987 = vmatmul.mubr.msk.f32.gmra.mxu1 %vm476_vm0, %v8188_v0  ;;  %2029 = vmatprep.mubr.f32.mxu0 %v11725_v5 }
  0x7f   : > { %6989 = vmatprep.mubr.msk.f32.mxu1 %vm7613_vm7, %v11725_v5 }
  0x81   : > { %6438 = vmatmul.mubr.msk.f32.vlgmr.msra.gmra.mxu0 %vm476_vm0, %v7846_v48  ;;  %v2192_v48 = vrot.slane %v8141_v49, 1 }
  0x82   : > { %6990 = vmatmul.mubr.msk.f32.gmra.mxu1 %vm476_vm0, %v8199_v1  ;;  %2035 = vmatprep.mubr.f32.mxu0 %v11725_v5 }
  0x83   : > { %6992 = vmatprep.mubr.msk.f32.mxu1 %vm7613_vm7, %v11725_v5  ;;  %6925 = vmatpush3.msra.mxu0 %v451_v2  ;;  %v2790_v2 = vrot.slane %v8257_v13, 4 }
  0x84   : > { %6926 = vmatprep.subr.mxu0 %v11725_v5 }
  0x85   : > { %6439 = vmatmul.mubr.msk.f32.gmra.mxu0 %vm476_vm0, %v7867_v53  ;;  %v2194_v53 = vsel %vm470_vm1, %v2192_v48, %v2193_v6  ;;  %v2562_v48 = vrot.slane %v8157_v59, 2  ;;  %v2791_v6 = vsel %vm1577_vm5, %v2788_v60, %v2790_v2 }
  0x86   : > { %6993 = vmatmul.mubr.msk.f32.gmra.mxu1 %vm476_vm0, %v8212_v3  ;;  %2041 = vmatprep.mubr.f32.mxu0 %v11725_v5 }
  0x87   : > { %6995 = vmatprep.mubr.msk.f32.mxu1 %vm7613_vm7, %v11725_v5  ;;  %6927 = vmatpush3.msra.mxu0 %v450_v4  ;;  %v2561_v4 = vrot.slane %v8141_v49, 2 }
  0x88   : > { %7022 = vmatprep.subr.mxu0 %v11725_v5 }
  0x89   : > { %6440 = vmatmul.mubr.msk.f32.gmra.mxu0 %vm476_vm0, %v8119_v55  ;;  %v2785_v55 = vsel %vm1577_vm5, %v2782_v14, %v2784_v51  ;;  %v2563_v49 = vsel %vm821_vm2, %v2561_v4, %v2562_v48 }
  0x8a   : > { %6996 = vmatmul.mubr.msk.f32.gmra.mxu1 %vm476_vm0, %v8228_v7  ;;  %6928 = vmatprep.mubr.msk.f32.mxu0 %vm7613_vm7, %v11725_v5 }
  0x8b   : > { %6998 = vmatprep.mubr.msk.f32.mxu1 %vm7613_vm7, %v11725_v5 }
  0x8d   : > { %6929 = vmatmul.mubr.msk.f32.vlgmr.msra.gmra.mxu0 %vm476_vm0, %v2194_v53  ;;  %v2792_v53 = vrot.slane %v8273_v19, 4 }
  0x8e   : > { %6999 = vmatmul.mubr.msk.f32.gmra.mxu1 %vm476_vm0, %v8242_v9  ;;  %6931 = vmatprep.mubr.msk.f32.mxu0 %vm7613_vm7, %v11725_v5 }
  0x8f   : > { %7001 = vmatprep.mubr.msk.f32.mxu1 %vm7613_vm7, %v11725_v5  ;;  %7023 = vmatpush3.msra.mxu0 %v453_v10  ;;  %v2793_v10 = vsel %vm1577_vm5, %v2790_v2, %v2792_v53  ;;  %v2574_v2 = vrot.slane %v8242_v9, 2 }
  0x90   : > { %7024 = vmatprep.subr.mxu0 %v11725_v5 }
  0x91   : > { %6932 = vmatmul.mubr.msk.f32.gmra.mxu0 %vm476_vm0, %v2196_v11  ;;  %v2794_v11 = vrot.slane %v8288_v22, 4 }
  0x92   : > { %7002 = vmatmul.mubr.msk.f32.gmra.mxu1 %vm476_vm0, %v8257_v13  ;;  %6934 = vmatprep.mubr.msk.f32.mxu0 %vm7613_vm7, %v11725_v5 }
  0x93   : > { %7004 = vmatprep.mubr.msk.f32.mxu1 %vm7613_vm7, %v11725_v5  ;;  %7025 = vmatpush3.msra.mxu0 %v452_v16  ;;  %v2565_v16 = vsel %vm821_vm2, %v2562_v48, %v2564_v8  ;;  %v2795_v18 = vsel %vm1577_vm5, %v2792_v53, %v2794_v11  ;;  %v2797_v33 = vsel %vm1577_vm5, %v2794_v11, %v2796_v21 }
  0x94   : > { %7120 = vmatprep.subr.mxu0 %v11725_v5  ;;  %v8553_v11 = vsel %vm821_vm2, %v2572_v50, %v2574_v2 }
  0x95   : > { %6935 = vmatmul.mubr.msk.f32.gmra.mxu0 %vm476_vm0, %v2198_v17  ;;  %v2566_v17 = vrot.slane %v8188_v0, 2 }
  0x96   : > { %7005 = vmatmul.mubr.msk.f32.gmra.mxu1 %vm476_vm0, %v8273_v19  ;;  %6937 = vmatprep.mubr.msk.f32.mxu0 %vm7613_vm7, %v11725_v5 }
  0x97   : > { %7007 = vmatprep.mubr.msk.f32.mxu1 %vm7613_vm7, %v11725_v5  ;;  %v2567_v27 = vsel %vm821_vm2, %v2564_v8, %v2566_v17  ;;  %v8496_v38 = vsel %vm821_vm2, %v2566_v17, %v2568_v30 }
  0x99   : > { %6938 = vmatmul.mubr.msk.f32.gmra.mxu0 %vm476_vm0, %v8282_v20 }
  0x9a   : > { %7008 = vmatmul.mubr.msk.f32.gmra.mxu1 %vm476_vm0, %v8288_v22  ;;  %6940 = vmatprep.mubr.msk.f32.mxu0 %vm7613_vm7, %v11725_v5 }
  0x9b   : > { %7010 = vmatprep.mubr.msk.f32.mxu1 %vm7613_vm7, %v11725_v5 }
  0x9d   : > { %6941 = vmatmul.mubr.msk.f32.gmra.mxu0 %vm476_vm0, %v8297_v23 }
  0x9e   : > { %7011 = vmatmul.mubr.msk.f32.gmra.mxu1 %vm476_vm0, %v8303_v25  ;;  %6943 = vmatprep.mubr.msk.f32.mxu0 %vm7613_vm7, %v11725_v5 }
  0x9f   : > { %7013 = vmatprep.mubr.msk.f32.mxu1 %vm7613_vm7, %v11725_v5 }
  0xa1   : > { %6944 = vmatmul.mubr.msk.f32.gmra.mxu0 %vm476_vm0, %v8312_v26 }
  0xa2   : > { %7014 = vmatmul.mubr.msk.f32.gmra.mxu1 %vm476_vm0, %v8318_v28  ;;  %6946 = vmatprep.mubr.msk.f32.mxu0 %vm7613_vm7, %v11725_v5 }
  0xa3   : > { %7016 = vmatprep.mubr.msk.f32.mxu1 %vm7613_vm7, %v11725_v5 }
  0xa5   : > { %6947 = vmatmul.mubr.msk.f32.gmra.mxu0 %vm476_vm0, %v8327_v29 }
  0xa6   : > { %7017 = vmatmul.mubr.msk.f32.gmra.mxu1 %vm476_vm0, %v8333_v31  ;;  %6949 = vmatprep.mubr.msk.f32.mxu0 %vm7613_vm7, %v11725_v5 }
  0xa7   : > { %7019 = vmatprep.mubr.msk.f32.mxu1 %vm7613_vm7, %v11725_v5 }
  0xa9   : > { %6950 = vmatmul.mubr.msk.f32.gmra.mxu0 %vm476_vm0, %v8342_v32 }
  0xaa   : > { %7020 = vmatmul.mubr.msk.f32.gmra.mxu1 %vm476_vm0, %v8348_v34  ;;  %6952 = vmatprep.mubr.msk.f32.mxu0 %vm7613_vm7, %v11725_v5 }
  0xab   : > { %7075 = vmatprep.mubr.msk.f32.mxu1 %vm7613_vm7, %v11725_v5 }
  0xad   : > { %6953 = vmatmul.mubr.msk.f32.gmra.mxu0 %vm476_vm0, %v8359_v37 }
  0xae   : > { %7076 = vmatmul.mubr.msk.f32.vlgmr.msra.gmra.mxu1 %vm476_vm0, %v2779_v39  ;;  %6955 = vmatprep.mubr.msk.f32.mxu0 %vm7613_vm7, %v11725_v5  ;;  %v2570_v39 = vrot.slane %v8212_v3, 2 }
  0xaf   : > { %7078 = vmatprep.mubr.msk.f32.mxu1 %vm7613_vm7, %v11725_v5  ;;  %7170 = vmatpush3.msra.mxu1 %v459_v41  ;;  %v2800_v41 = vrot.slane %v8333_v31, 4 }
  0xb0   : > { %7171 = vmatprep.subr.mxu1 %v11725_v5  ;;  %v8511_v14 = vsel %vm821_vm2, %v2568_v30, %v2570_v39 }
  0xb1   : > { %6956 = vmatmul.mubr.msk.f32.gmra.mxu0 %vm476_vm0, %v8375_v42  ;;  %7172 = vmatpush3.msra.mxu1 %v458_v45  ;;  %v2801_v51 = vsel %vm1577_vm5, %v2798_v35, %v2800_v41  ;;  %v2803_v48 = vsel %vm1577_vm5, %v2800_v41, %v2802_v54  ;;  %v2578_v35 = vrot.slane %v8273_v19, 2  ;;  %v3209_v41 = vrot.slane %v8157_v59, 6 }
  0xb2   : > { %7079 = vmatmul.mubr.msk.f32.gmra.mxu1 %vm476_vm0, %v2781_v46  ;;  %6958 = vmatprep.mubr.msk.f32.mxu0 %vm7613_vm7, %v11725_v5 }
  0xb3   : > { %7081 = vmatprep.mubr.msk.f32.mxu1 %vm7613_vm7, %v11725_v5  ;;  %7267 = vmatprep.subr.mxu1 %v11725_v5 }
  0xb5   : > { %6959 = vmatmul.mubr.msk.f32.gmra.mxu0 %vm476_vm0, %v8392_v47 }
  0xb6   : > { %7082 = vmatmul.mubr.msk.f32.gmra.mxu1 %vm476_vm0, %v2783_v15  ;;  %6961 = vmatprep.mubr.msk.f32.mxu0 %vm7613_vm7, %v11725_v5 }
  0xb7   : > { %7084 = vmatprep.mubr.msk.f32.mxu1 %vm7613_vm7, %v11725_v5 }
  0xb9   : > { %6962 = vmatmul.mubr.msk.f32.gmra.mxu0 %vm476_vm0, %v8406_v52 }
  0xba   : > { %7085 = vmatmul.mubr.msk.f32.gmra.mxu1 %vm476_vm0, %v2785_v55  ;;  %6964 = vmatprep.mubr.msk.f32.mxu0 %vm7613_vm7, %v11725_v5 }
  0xbb   : > { %7087 = vmatprep.mubr.msk.f32.mxu1 %vm7613_vm7, %v11725_v5 }
  0xbd   : > { %6965 = vmatmul.mubr.msk.f32.gmra.mxu0 %vm476_vm0, %v8419_v44 }
  0xbe   : > { %7088 = vmatmul.mubr.msk.f32.gmra.mxu1 %vm476_vm0, %v2787_v58  ;;  %6967 = vmatprep.mubr.msk.f32.mxu0 %vm7613_vm7, %v11725_v5 }
  0xbf   : > { %7090 = vmatprep.mubr.msk.f32.mxu1 %vm7613_vm7, %v11725_v5 }
  0xc1   : > { %6968 = vmatmul.mubr.msk.f32.gmra.mxu0 %vm476_vm0, %v8435_v61 }
  0xc2   : > { %7091 = vmatmul.mubr.msk.f32.gmra.mxu1 %vm476_vm0, %v2789_v63  ;;  %6970 = vmatprep.mubr.msk.f32.mxu0 %vm7613_vm7, %v11725_v5  ;;  %v8531_v63 = vsel %vm821_vm2, %v2570_v39, %v2572_v50 }
  0xc3   : > { %7093 = vmatprep.mubr.msk.f32.mxu1 %vm7613_vm7, %v11725_v5 }
  0xc5   : > { %6971 = vmatmul.mubr.msk.f32.gmra.mxu0 %vm476_vm0, %v8422_v57 }
  0xc6   : > { %7094 = vmatmul.mubr.msk.f32.gmra.mxu1 %vm476_vm0, %v2791_v6  ;;  %7026 = vmatprep.mubr.msk.f32.mxu0 %vm7613_vm7, %v11725_v5  ;;  %v2804_v6 = vrot.slane %v8521_v56, 4 }
  0xc7   : > { %7096 = vmatprep.mubr.msk.f32.mxu1 %vm7613_vm7, %v11725_v5 }
  0xc8   : > { %v2805_v17 = vsel %vm1577_vm5, %v2802_v54, %v2804_v6 }
  0xc9   : > { %7027 = vmatmul.mubr.msk.f32.vlgmr.msra.gmra.mxu0 %vm476_vm0, %v2563_v49  ;;  %v8543_v49 = vld [vmem:[%s8124_s27 + $0x80] sm:$0xff] }
  0xca   : > { %7097 = vmatmul.mubr.msk.f32.gmra.mxu1 %vm476_vm0, %v2793_v10  ;;  %7029 = vmatprep.mubr.msk.f32.mxu0 %vm7613_vm7, %v11725_v5 }
  0xcb   : > { %7099 = vmatprep.mubr.msk.f32.mxu1 %vm7613_vm7, %v11725_v5  ;;  %7121 = vmatpush3.msra.mxu0 %v457_v12  ;;  %v2576_v12 = vrot.slane %v8257_v13, 2 }
  0xcc   : > { %7122 = vmatprep.subr.mxu0 %v11725_v5 }
  0xcd   : > { %7030 = vmatmul.mubr.msk.f32.gmra.mxu0 %vm476_vm0, %v2565_v16 }
  0xce   : > { %7100 = vmatmul.mubr.msk.f32.gmra.mxu1 %vm476_vm0, %v2795_v18  ;;  %7032 = vmatprep.mubr.msk.f32.mxu0 %vm7613_vm7, %v11725_v5  ;;  %v2806_v18 = vrot.slane %v8543_v49, 4 }
  0xcf   : > { %7102 = vmatprep.mubr.msk.f32.mxu1 %vm7613_vm7, %v11725_v5  ;;  %7123 = vmatpush3.msra.mxu0 %v456_v24 }
  0xd0   : > { %7218 = vmatprep.subr.mxu0 %v11725_v5 }
  0xd1   : > { %7033 = vmatmul.mubr.msk.f32.gmra.mxu0 %vm476_vm0, %v2567_v27 }
  0xd2   : > { %v804_v36 = vpop.f32.mrf.mxu1  ;;  %7103 = vmatmul.mubr.msk.f32.gmra.mxu1 %vm476_vm0, %v2797_v33  ;;  %7035 = vmatprep.mubr.msk.f32.mxu0 %vm7613_vm7, %v11725_v5  ;;  %v8568_v33 = vsel %vm821_vm2, %v2574_v2, %v2576_v12 }
  0xd3   : > { %7105 = vmatprep.mubr.msk.f32.mxu1 %vm7613_vm7, %v11725_v5  ;;  %11828 = vst [vmem:[#allocation2_spill] sm:$0xff] %v8568_v33 }
  0xd4   : > { %v806_v43 = vpop.f32.mrf.mxu1 }
  0xd5   : > { %v8503_v45 = vpop.f32.mrf.mxu0  ;;  %7036 = vmatmul.mubr.msk.f32.gmra.mxu0 %vm476_vm0, %v8496_v38 }
  0xd6   : > { %v810_v46 = vpop.f32.mrf.mxu1  ;;  %7106 = vmatmul.mubr.msk.f32.gmra.mxu1 %vm476_vm0, %v2799_v40  ;;  %7038 = vmatprep.mubr.msk.f32.mxu0 %vm7613_vm7, %v11725_v5  ;;  %v2807_v40 = vsel %vm1577_vm5, %v2804_v6, %v2806_v18  ;;  %v8582_v6 = vsel %vm821_vm2, %v2576_v12, %v2578_v35 }
  0xd7   : > { %v8514_v15 = vpop.f32.mrf.mxu0  ;;  %7108 = vmatprep.mubr.msk.f32.mxu1 %vm7613_vm7, %v11725_v5  ;;  %11829 = vst [vmem:[#allocation3_spill] sm:$0xff] %v8582_v6 }
  0xd8   : > { %v812_v55 = vpop.f32.mrf.mxu1 }
  0xd9   : > { %v8523_v58 = vpop.f32.mrf.mxu0  ;;  %7039 = vmatmul.mubr.msk.f32.gmra.mxu0 %vm476_vm0, %v8511_v14 }
  0xda   : > { %v816_v60 = vpop.f32.mrf.mxu1  ;;  %7109 = vmatmul.mubr.msk.f32.gmra.mxu1 %vm476_vm0, %v2801_v51  ;;  %7041 = vmatprep.mubr.msk.f32.mxu0 %vm7613_vm7, %v11725_v5 }
  0xdb   : > { %v8534_v4 = vpop.f32.mrf.mxu0  ;;  %7111 = vmatprep.mubr.msk.f32.mxu1 %vm7613_vm7, %v11725_v5 }
  0xdc   : > { %v8540_v53 = vpop.f32.mrf.mxu1 }
  0xdd   : > { %v8545_v8 = vpop.f32.mrf.mxu0  ;;  %7042 = vmatmul.mubr.msk.f32.gmra.mxu0 %vm476_vm0, %v8531_v63 }
  0xde   : > { %v982_v10 = vpop.f32.mrf.mxu1  ;;  %7112 = vmatmul.mubr.msk.f32.gmra.mxu1 %vm476_vm0, %v2803_v48  ;;  %7044 = vmatprep.mubr.msk.f32.mxu0 %vm7613_vm7, %v11725_v5 }
  0xdf   : > { %v8556_v16 = vpop.f32.mrf.mxu0  ;;  %7114 = vmatprep.mubr.msk.f32.mxu1 %vm7613_vm7, %v11725_v5 }
  0xe0   : > { %v984_v21 = vpop.f32.mrf.mxu1 }
  0xe1   : > { %v632_v24 = vpop.f32.mrf.mxu0  ;;  %7045 = vmatmul.mubr.msk.f32.gmra.mxu0 %vm476_vm0, %v8553_v11 }
  0xe2   : > { %v805_v27 = vadd.f32 %v804_v36, %v632_v24  ;;  %v988_v30 = vpop.f32.mrf.mxu1  ;;  %7115 = vmatmul.mubr.msk.f32.gmra.mxu1 %vm476_vm0, %v2805_v17  ;;  %7047 = vmatprep.mubr.msk.f32.mxu0 %vm7613_vm7, %v11725_v5  ;;  %v3210_v36 = vrot.slane %v8174_v62, 6  ;;  %v2580_v24 = vrot.slane %v8288_v22, 2 }
  0xe3   : > { %v634_v39 = vpop.f32.mrf.mxu0  ;;  %7117 = vmatprep.mubr.msk.f32.mxu1 %vm7613_vm7, %v11725_v5 }
  0xe4   : > { %v807_v50 = vadd.f32 %v806_v43, %v634_v39  ;;  %v990_v51 = vpop.f32.mrf.mxu1  ;;  %v1001_v54 = vadd.f32 %v982_v10, %v805_v27  ;;  %v3211_v10 = vsel %vm1012_vm3, %v3209_v41, %v3210_v36  ;;  %v8598_v41 = vsel %vm821_vm2, %v2578_v35, %v2580_v24 }
  0xe5   : > { %v638_v48 = vpop.f32.mrf.mxu0  ;;  %7048 = vmatmul.mubr.msk.f32.gmra.mxu0 %vm476_vm0, %v8568_v33 }
  0xe6   : > { %v811_v2 = vadd.f32 %v810_v46, %v638_v48  ;;  %v994_v17 = vpop.f32.mrf.mxu1  ;;  %7118 = vmatmul.mubr.msk.f32.gmra.mxu1 %vm476_vm0, %v2807_v40  ;;  %7050 = vmatprep.mubr.msk.f32.mxu0 %vm7613_vm7, %v11725_v5  ;;  %v1002_v18 = vadd.f32 %v984_v21, %v807_v50  ;;  %v3212_v46 = vrot.slane %v8188_v0, 6  ;;  %v463_v48 = vld [vmem:[%s11713_s4 + $0x78] sm:$0xff] }
  0xe7   : > { %v640_v43 = vpop.f32.mrf.mxu0  ;;  %7173 = vmatprep.mubr.msk.f32.mxu1 %vm7613_vm7, %v11725_v5 }
  0xe8   : > { %v813_v27 = vadd.f32 %v812_v55, %v640_v43  ;;  %v996_v39 = vpop.f32.mrf.mxu1  ;;  %v1005_v40 = vadd.f32 %v988_v30, %v811_v2  ;;  %v2582_v30 = vrot.slane %v8303_v25, 2  ;;  %v462_v2 = vld [vmem:[%s11713_s4 + $0x70] sm:$0xff] }
  0xe9   : > { %v644_v12 = vpop.f32.mrf.mxu0  ;;  %7051 = vmatmul.mubr.msk.f32.gmra.mxu0 %vm476_vm0, %v8582_v6 }
  0xea   : > { %v817_v21 = vadd.f32 %v816_v60, %v644_v12  ;;  %v1175_v50 = vpop.f32.mrf.mxu1  ;;  %7174 = vmatmul.mubr.msk.f32.vlgmr.msra.gmra.mxu1 %vm476_vm0, %v3211_v10  ;;  %7053 = vmatprep.mubr.msk.f32.mxu0 %vm7613_vm7, %v11725_v5  ;;  %v1006_v55 = vadd.f32 %v990_v51, %v813_v27  ;;  %v3213_v60 = vsel %vm1012_vm3, %v3210_v36, %v3212_v46  ;;  %v3214_v10 = vrot.slane %v8199_v1, 6 }
  0xeb   : > { %v1194_v43 = vadd.f32 %v1175_v50, %v1001_v54  ;;  %v646_v33 = vpop.f32.mrf.mxu0  ;;  %7176 = vmatprep.mubr.msk.f32.mxu1 %vm7613_vm7, %v11725_v5  ;;  %7268 = vmatpush3.msra.mxu1 %v463_v48  ;;  %v2584_v36 = vrot.slane %v8318_v28, 2 }
  0xec   : > { %v819_v35 = vadd.f32 %v8540_v53, %v646_v33  ;;  %v1177_v12 = vpop.f32.mrf.mxu1  ;;  %v1009_v51 = vadd.f32 %v994_v17, %v817_v21  ;;  %7269 = vmatprep.subr.mxu1 %v11725_v5  ;;  %v8617_v53 = vsel %vm821_vm2, %v2580_v24, %v2582_v30  ;;  %v3215_v48 = vsel %vm1012_vm3, %v3212_v46, %v3214_v10 }
  0xed   : > { %v1195_v27 = vadd.f32 %v1177_v12, %v1002_v18  ;;  %v721_v6 = vpop.f32.mrf.mxu0  ;;  %7054 = vmatmul.mubr.msk.f32.gmra.mxu0 %vm476_vm0, %v8598_v41  ;;  %7270 = vmatpush3.msra.mxu1 %v462_v2  ;;  %v8633_v46 = vsel %vm821_vm2, %v2582_v30, %v2584_v36 }
  0xee   : > { %v722_v54 = vadd.f32 %v721_v6, %v8503_v45  ;;  %v1181_v50 = vpop.f32.mrf.mxu1  ;;  %7177 = vmatmul.mubr.msk.f32.gmra.mxu1 %vm476_vm0, %v3213_v60  ;;  %7056 = vmatprep.mubr.msk.f32.mxu0 %vm7613_vm7, %v11725_v5  ;;  %v1010_v33 = vadd.f32 %v996_v39, %v819_v35  ;;  %v3216_v45 = vrot.slane %v8212_v3, 6  ;;  %v2586_v60 = vrot.slane %v8333_v31, 2 }
  0xef   : > { %v1198_v17 = vadd.f32 %v1181_v50, %v1005_v40  ;;  %v723_v18 = vpop.f32.mrf.mxu0  ;;  %7179 = vmatprep.mubr.msk.f32.mxu1 %vm7613_vm7, %v11725_v5  ;;  %4727 = vmatprep.subr.mxu1 %v11725_v5 }
  0xf0   : > { %v724_v6 = vadd.f32 %v723_v18, %v8514_v15  ;;  %v1183_v21 = vpop.f32.mrf.mxu1 }
  0xf1   : > { %v1199_v2 = vadd.f32 %v1183_v21, %v1006_v55  ;;  %v727_v24 = vpop.f32.mrf.mxu0  ;;  %7057 = vmatmul.mubr.msk.f32.gmra.mxu0 %vm476_vm0, %v8617_v53  ;;  %v3217_v55 = vsel %vm1012_vm3, %v3214_v10, %v3216_v45  ;;  %v8648_v10 = vsel %vm821_vm2, %v2584_v36, %v2586_v60 }
  0xf2   : > { %v728_v39 = vadd.f32 %v727_v24, %v8523_v58  ;;  %v1187_v40 = vpop.f32.mrf.mxu1  ;;  %7180 = vmatmul.mubr.msk.f32.gmra.mxu1 %vm476_vm0, %v3215_v48  ;;  %7059 = vmatprep.mubr.msk.f32.mxu0 %vm7613_vm7, %v11725_v5  ;;  %v3218_v58 = vrot.slane %v8228_v7, 6  ;;  %11830 = vst [vmem:[#allocation4_spill] sm:$0xff] %v8648_v10 }
  0xf3   : > { %v1202_v15 = vadd.f32 %v1187_v40, %v1009_v51  ;;  %v729_v35 = vpop.f32.mrf.mxu0  ;;  %7182 = vmatprep.mubr.msk.f32.mxu1 %vm7613_vm7, %v11725_v5  ;;  %v8651_v51 = vrot.slane %v8348_v34, 2 }
  0xf4   : > { %v730_v12 = vadd.f32 %v729_v35, %v8534_v4  ;;  %v1189_v50 = vpop.f32.mrf.mxu1  ;;  %v3219_v24 = vsel %vm1012_vm3, %v3216_v45, %v3218_v58 }
  0xf5   : > { %v1203_v18 = vadd.f32 %v1189_v50, %v1010_v33  ;;  %v733_v48 = vpop.f32.mrf.mxu0  ;;  %7060 = vmatmul.mubr.msk.f32.gmra.mxu0 %vm476_vm0, %v8633_v46 }
  0xf6   : > { %v734_v30 = vadd.f32 %v733_v48, %v8545_v8  ;;  %v1367_v21 = vpop.f32.mrf.mxu1  ;;  %7183 = vmatmul.mubr.msk.f32.gmra.mxu1 %vm476_vm0, %v3217_v55  ;;  %7062 = vmatprep.mubr.msk.f32.mxu0 %vm7613_vm7, %v11725_v5  ;;  %v3220_v8 = vrot.slane %v8242_v9, 6 }
  0xf7   : > { %v1386_v4 = vadd.f32 %v1367_v21, %v1194_v43  ;;  %v735_v33 = vpop.f32.mrf.mxu0  ;;  %7185 = vmatprep.mubr.msk.f32.mxu1 %vm7613_vm7, %v11725_v5  ;;  %v8665_v43 = vsel %vm821_vm2, %v2586_v60, %v8651_v51  ;;  %v2994_v60 = vrot.slane %v8174_v62, 5 }
  0xf8   : > { %v736_v40 = vadd.f32 %v735_v33, %v8556_v16  ;;  %v1369_v35 = vpop.f32.mrf.mxu1  ;;  %v3221_v16 = vsel %vm1012_vm3, %v3218_v58, %v3220_v8 }
  0xf9   : > { %v1387_v55 = vadd.f32 %v1369_v35, %v1195_v27  ;;  %v899_v50 = vpop.f32.mrf.mxu0  ;;  %7063 = vmatmul.mubr.msk.f32.gmra.mxu0 %vm476_vm0, %v8648_v10  ;;  %v3222_v27 = vrot.slane %v8257_v13, 6 }
  0xfa   : > { %v999_v36 = vadd.f32 %v899_v50, %v722_v54  ;;  %v1373_v48 = vpop.f32.mrf.mxu1  ;;  %7186 = vmatmul.mubr.msk.f32.gmra.mxu1 %vm476_vm0, %v3219_v24  ;;  %7065 = vmatprep.mubr.msk.f32.mxu0 %vm7613_vm7, %v11725_v5 }
  0xfb   : > { %v1390_v45 = vadd.f32 %v1373_v48, %v1198_v17  ;;  %v901_v21 = vpop.f32.mrf.mxu0  ;;  %7188 = vmatprep.mubr.msk.f32.mxu1 %vm7613_vm7, %v11725_v5  ;;  %v2993_v17 = vrot.slane %v8157_v59, 5 }
  0xfc   : > { %v1000_v54 = vadd.f32 %v901_v21, %v724_v6  ;;  %v1375_v33 = vpop.f32.mrf.mxu1  ;;  %v3223_v6 = vsel %vm1012_vm3, %v3220_v8, %v3222_v27 }
  0xfd   : > { %v1391_v35 = vadd.f32 %v1375_v33, %v1199_v2  ;;  %v905_v24 = vpop.f32.mrf.mxu0  ;;  %7066 = vmatmul.mubr.msk.f32.gmra.mxu0 %vm476_vm0, %v8665_v43  ;;  %v3224_v2 = vrot.slane %v8273_v19, 6  ;;  %v2995_v62 = vsel %vm1769_vm6, %v2993_v17, %v2994_v60 }
  0xfe   : > { %v1003_v50 = vadd.f32 %v905_v24, %v728_v39  ;;  %v1379_v10 = vpop.f32.mrf.mxu1  ;;  %7189 = vmatmul.mubr.msk.f32.gmra.mxu1 %vm476_vm0, %v3221_v16  ;;  %7068 = vmatprep.mubr.msk.f32.mxu0 %vm7613_vm7, %v11725_v5 }
  0xff   : > { %v1394_v58 = vadd.f32 %v1379_v10, %v1202_v15  ;;  %v907_v48 = vpop.f32.mrf.mxu0  ;;  %7191 = vmatprep.mubr.msk.f32.mxu1 %vm7613_vm7, %v11725_v5  ;;  %v2996_v15 = vrot.slane %v8188_v0, 5 }
 0x100   : > { %v1004_v39 = vadd.f32 %v907_v48, %v730_v12  ;;  %v1381_v21 = vpop.f32.mrf.mxu1  ;;  %v3225_v12 = vsel %vm1012_vm3, %v3222_v27, %v3224_v2 }
 0x101   : > { %v1395_v33 = vadd.f32 %v1381_v21, %v1203_v18  ;;  %v911_v16 = vpop.f32.mrf.mxu0  ;;  %7069 = vmatmul.mubr.msk.f32.gmra.mxu0 %vm476_vm0, %v8651_v51  ;;  %v3226_v18 = vrot.slane %v8288_v22, 6  ;;  %v2997_v27 = vsel %vm1769_vm6, %v2994_v60, %v2996_v15  ;;  %v460_v60 = vld [vmem:[%s11713_s4 + $0x60] sm:$0xff] }
 0x102   : > { %v1007_v24 = vadd.f32 %v911_v16, %v734_v30  ;;  %v1547_v59 = vpop.f32.mrf.mxu1  ;;  %7192 = vmatmul.mubr.msk.f32.gmra.mxu1 %vm476_vm0, %v3223_v6  ;;  %7124 = vmatprep.mubr.msk.f32.mxu0 %vm7613_vm7, %v11725_v5  ;;  %v461_v6 = vld [vmem:[%s11713_s4 + $0x68] sm:$0xff] }
 0x103   : > { %v1566_v10 = vadd.f32 %v1547_v59, %v1386_v4  ;;  %v913_v8 = vpop.f32.mrf.mxu0  ;;  %7194 = vmatprep.mubr.msk.f32.mxu1 %vm7613_vm7, %v11725_v5 }
 0x104   : > { %v1008_v30 = vadd.f32 %v913_v8, %v736_v40  ;;  %v1549_v48 = vpop.f32.mrf.mxu1  ;;  %v2998_v40 = vrot.slane %v8199_v1, 5 }
 0x105   : > { %v1567_v21 = vadd.f32 %v1549_v48, %v1387_v55  ;;  %v1092_v16 = vpop.f32.mrf.mxu0  ;;  %7125 = vmatmul.mubr.msk.f32.vlgmr.msra.gmra.mxu0 %vm476_vm0, %v2995_v62  ;;  %v3227_v55 = vsel %vm1012_vm3, %v3224_v2, %v3226_v18  ;;  %v3228_v62 = vrot.slane %v8303_v25, 6  ;;  %v3000_v2 = vrot.slane %v8212_v3, 5 }
 0x106   : > { %v1192_v0 = vadd.f32 %v1092_v16, %v999_v36  ;;  %v1553_v4 = vpop.f32.mrf.mxu1  ;;  %7195 = vmatmul.mubr.msk.f32.gmra.mxu1 %vm476_vm0, %v3225_v12  ;;  %7127 = vmatprep.mubr.msk.f32.mxu0 %vm7613_vm7, %v11725_v5 }
 0x107   : > { %v1570_v17 = vadd.f32 %v1553_v4, %v1390_v45  ;;  %v1094_v59 = vpop.f32.mrf.mxu0  ;;  %7197 = vmatprep.mubr.msk.f32.mxu1 %vm7613_vm7, %v11725_v5  ;;  %7219 = vmatpush3.msra.mxu0 %v461_v6  ;;  %v3230_v4 = vrot.slane %v8318_v28, 6 }
 0x108   : > { %v8706_v36 = vadd.f32 %v1094_v59, %v1000_v54  ;;  %v1555_v8 = vpop.f32.mrf.mxu1  ;;  %7220 = vmatprep.subr.mxu0 %v11725_v5  ;;  %v2999_v54 = vsel %vm1769_vm6, %v2996_v15, %v2998_v40 }
 0x109   : > { %v1571_v1 = vadd.f32 %v1555_v8, %v1391_v35  ;;  %v1098_v45 = vpop.f32.mrf.mxu0  ;;  %7128 = vmatmul.mubr.msk.f32.gmra.mxu0 %vm476_vm0, %v2997_v27  ;;  %v3229_v35 = vsel %vm1012_vm3, %v3226_v18, %v3228_v62  ;;  %v3002_v18 = vrot.slane %v8228_v7, 5 }
 0x10a   : > { %v1196_v12 = vadd.f32 %v1098_v45, %v1003_v50  ;;  %v1559_v48 = vpop.f32.mrf.mxu1  ;;  %7198 = vmatmul.mubr.msk.f32.gmra.mxu1 %vm476_vm0, %v3227_v55  ;;  %7130 = vmatprep.mubr.msk.f32.mxu0 %vm7613_vm7, %v11725_v5 }
 0x10b   : > { %v1574_v6 = vadd.f32 %v1559_v48, %v1394_v58  ;;  %v1100_v16 = vpop.f32.mrf.mxu0  ;;  %7200 = vmatprep.mubr.msk.f32.mxu1 %vm7613_vm7, %v11725_v5  ;;  %7221 = vmatpush3.msra.mxu0 %v460_v60  ;;  %v3001_v58 = vsel %vm1769_vm6, %v2998_v40, %v3000_v2  ;;  %v3232_v60 = vrot.slane %v8333_v31, 6  ;;  %v3003_v7 = vsel %vm1769_vm6, %v3000_v2, %v3002_v18 }
 0x10c   : > { %v1197_v50 = vadd.f32 %v1100_v16, %v1004_v39  ;;  %v1561_v27 = vpop.f32.mrf.mxu1  ;;  %7316 = vmatprep.subr.mxu0 %v11725_v5 }
 0x10d   : > { %v1575_v59 = vadd.f32 %v1561_v27, %v1395_v33  ;;  %v1104_v55 = vpop.f32.mrf.mxu0  ;;  %7131 = vmatmul.mubr.msk.f32.gmra.mxu0 %vm476_vm0, %v2999_v54  ;;  %v3231_v33 = vsel %vm1012_vm3, %v3228_v62, %v3230_v4 }
 0x10e   : > { %v1200_v15 = vadd.f32 %v1104_v55, %v1007_v24  ;;  %v1740_v3 = vpop.f32.mrf.mxu1  ;;  %7201 = vmatmul.mubr.msk.f32.gmra.mxu1 %vm476_vm0, %v3229_v35  ;;  %7133 = vmatprep.mubr.msk.f32.mxu0 %vm7613_vm7, %v11725_v5 }
 0x10f   : > { %v1759_v8 = vadd.f32 %v1740_v3, %v1566_v10  ;;  %v1106_v39 = vpop.f32.mrf.mxu0  ;;  %7203 = vmatprep.mubr.msk.f32.mxu1 %vm7613_vm7, %v11725_v5  ;;  %v3004_v10 = vrot.slane %v8242_v9, 5 }
 0x110   : > { %v1201_v24 = vadd.f32 %v1106_v39, %v1008_v30  ;;  %v1742_v45 = vpop.f32.mrf.mxu1  ;;  %v3233_v30 = vsel %vm1012_vm3, %v3230_v4, %v3232_v60  ;;  %v3236_v39 = vrot.slane %v8521_v56, 6 }
 0x111   : > { %v1760_v48 = vadd.f32 %v1742_v45, %v1567_v21  ;;  %v1284_v54 = vpop.f32.mrf.mxu0  ;;  %7134 = vmatmul.mubr.msk.f32.gmra.mxu0 %vm476_vm0, %v3001_v58  ;;  %v3234_v21 = vrot.slane %v8348_v34, 6  ;;  %v3005_v9 = vsel %vm1769_vm6, %v3002_v18, %v3004_v10 }
 0x112   : > { %v8734_v16 = vadd.f32 %v1284_v54, %v1192_v0  ;;  %v1746_v40 = vpop.f32.mrf.mxu1  ;;  %7204 = vmatmul.mubr.msk.f32.gmra.mxu1 %vm476_vm0, %v3231_v33  ;;  %7136 = vmatprep.mubr.msk.f32.mxu0 %vm7613_vm7, %v11725_v5 }
 0x113   : > { %v1763_v62 = vadd.f32 %v1746_v40, %v1570_v17  ;;  %v8741_v35 = vpop.f32.mrf.mxu0  ;;  %7206 = vmatprep.mubr.msk.f32.mxu1 %vm7613_vm7, %v11725_v5  ;;  %v3006_v17 = vrot.slane %v8257_v13, 5  ;;  %v2144_v40 = vlaneseq }
 0x114   : > { %v1748_v0 = vpop.f32.mrf.mxu1 }
 0x115   : > { %v1764_v27 = vadd.f32 %v1748_v0, %v1571_v1  ;;  %v1290_v55 = vpop.f32.mrf.mxu0  ;;  %7137 = vmatmul.mubr.msk.f32.gmra.mxu0 %vm476_vm0, %v3003_v7  ;;  %v3235_v1 = vsel %vm1012_vm3, %v3232_v60, %v3234_v21  ;;  %v3007_v13 = vsel %vm1769_vm6, %v3004_v10, %v3006_v17 }
 0x116   : > { %v1388_v3 = vadd.f32 %v1290_v55, %v1196_v12  ;;  %v1752_v58 = vpop.f32.mrf.mxu1  ;;  %7207 = vmatmul.mubr.msk.f32.gmra.mxu1 %vm476_vm0, %v3233_v30  ;;  %7139 = vmatprep.mubr.msk.f32.mxu0 %vm7613_vm7, %v11725_v5 }
 0x117   : > { %v1767_v2 = vadd.f32 %v1752_v58, %v1574_v6  ;;  %v1292_v4 = vpop.f32.mrf.mxu0  ;;  %7209 = vmatprep.mubr.msk.f32.mxu1 %vm7613_vm7, %v11725_v5  ;;  %v3008_v6 = vrot.slane %v8273_v19, 5 }
 0x118   : > { %v1389_v12 = vadd.f32 %v1292_v4, %v1197_v50  ;;  %v1754_v33 = vpop.f32.mrf.mxu1  ;;  %v3237_v50 = vsel %vm1012_vm3, %v3234_v21, %v3236_v39 }
 0x119   : > { %v1768_v45 = vadd.f32 %v1754_v33, %v1575_v59  ;;  %v1296_v54 = vpop.f32.mrf.mxu0  ;;  %7140 = vmatmul.mubr.msk.f32.gmra.mxu0 %vm476_vm0, %v3005_v9  ;;  %v3238_v59 = vrot.slane %v8543_v49, 6  ;;  %v8770_v9 = vshrl.u32 %v2144_v40, 7  ;;  %v3009_v19 = vsel %vm1769_vm6, %v3006_v17, %v3008_v6 }
 0x11a   : > { %v1392_v7 = vadd.f32 %v1296_v54, %v1200_v15  ;;  %v1932_v18 = vpop.f32.mrf.mxu1  ;;  %7210 = vmatmul.mubr.msk.f32.gmra.mxu1 %vm476_vm0, %v3235_v1  ;;  %7142 = vmatprep.mubr.msk.f32.mxu0 %vm7613_vm7, %v11725_v5 }
 0x11b   : > { %v1951_v60 = vadd.f32 %v1932_v18, %v1759_v8  ;;  %v1298_v30 = vpop.f32.mrf.mxu0  ;;  %7212 = vmatprep.mubr.msk.f32.mxu1 %vm7613_vm7, %v11725_v5  ;;  %v3010_v8 = vrot.slane %v8288_v22, 5  ;;  %v8784_v54 = vsub.s32 2, %v8770_v9 }
 0x11c   : > { %v1393_v15 = vadd.f32 %v1298_v30, %v1201_v24  ;;  %v1934_v0 = vpop.f32.mrf.mxu1 }
 0x11d   : > { %v1952_v55 = vadd.f32 %v1934_v0, %v1760_v48  ;;  %v8767_v58 = vpop.f32.mrf.mxu0  ;;  %7143 = vmatmul.mubr.msk.f32.gmra.mxu0 %vm476_vm0, %v3007_v13  ;;  %v3239_v48 = vsel %vm1012_vm3, %v3236_v39, %v3238_v59  ;;  %v3011_v22 = vsel %vm1769_vm6, %v3008_v6, %v3010_v8  ;;  %v3977_v6 = vld [vmem:[%s11716_s7 + $0x78] sm:$0xff] }
 0x11e   : > { %v1938_v10 = vpop.f32.mrf.mxu1  ;;  %7213 = vmatmul.mubr.msk.f32.gmra.mxu1 %vm476_vm0, %v3237_v50  ;;  %7145 = vmatprep.mubr.msk.f32.mxu0 %vm7613_vm7, %v11725_v5 }
 0x11f   : > { %v1955_v21 = vadd.f32 %v1938_v10, %v1763_v62  ;;  %v8777_v24 = vpop.f32.mrf.mxu0  ;;  %7215 = vmatprep.mubr.msk.f32.mxu1 %vm7613_vm7, %v11725_v5  ;;  %v8793_v62 = vld [vmem:[%s11712_s3] sm:$0xf]  ;;  %v3014_v10 = vrot.slane %v8318_v28, 5 }
 0x120   : > { %v1940_v4 = vpop.f32.mrf.mxu1 }
 0x121   : > { %v1956_v1 = vadd.f32 %v1940_v4, %v1764_v27  ;;  %v1470_v33 = vpop.f32.mrf.mxu0  ;;  %7146 = vmatmul.mubr.msk.f32.gmra.mxu0 %vm476_vm0, %v3009_v19  ;;  %v3012_v27 = vrot.slane %v8303_v25, 5  ;;  %v2155_v25 = vrot.slane %v8793_v62, %v8784_v54 }
 0x122   : > { %v1568_v40 = vadd.f32 %v1470_v33, %v1388_v3  ;;  %v1944_v17 = vpop.f32.mrf.mxu1  ;;  %7216 = vmatmul.mubr.msk.f32.gmra.mxu1 %vm476_vm0, %v3239_v48  ;;  %7148 = vmatprep.mubr.msk.f32.mxu0 %vm7613_vm7, %v11725_v5  ;;  %v8799_v3 = vsub.s32 3, %v8770_v9  ;;  %v3975_v33 = vld [vmem:[%s11716_s7 + $0x68] sm:$0xff] }
 0x123   : > { %v1959_v39 = vadd.f32 %v1944_v17, %v1767_v2  ;;  %v1472_v18 = vpop.f32.mrf.mxu0  ;;  %7271 = vmatprep.mubr.msk.f32.mxu1 %vm7613_vm7, %v11725_v5 }
 0x124   : > { %v1569_v13 = vadd.f32 %v1472_v18, %v1389_v12  ;;  %v1946_v30 = vpop.f32.mrf.mxu1  ;;  %v3976_v12 = vld [vmem:[%s11716_s7 + $0x70] sm:$0xff]  ;;  %v3016_v18 = vrot.slane %v8333_v31, 5 }
 0x125   : > { %v8804_v50 = vadd.f32 %v1946_v30, %v1768_v45  ;;  %v1476_v59 = vpop.f32.mrf.mxu0  ;;  %7149 = vmatmul.mubr.msk.f32.gmra.mxu0 %vm476_vm0, %v3011_v22  ;;  %v3013_v45 = vsel %vm1769_vm6, %v3010_v8, %v3012_v27  ;;  %v3015_v22 = vsel %vm1769_vm6, %v3012_v27, %v3014_v10  ;;  %v3973_v27 = vld [vmem:[%s11716_s7 + $0x58] sm:$0xff] }
 0x126   : > { %v8809_v2 = vadd.f32 %v1476_v59, %v1392_v7  ;;  %v2114_v0 = vpop.f32.mrf.mxu1  ;;  %7272 = vmatmul.mubr.msk.f32.vlgmr.msra.gmra.mxu1 %vm476_vm0, %v8282_v20  ;;  %7151 = vmatprep.mubr.msk.f32.mxu0 %vm7613_vm7, %v11725_v5  ;;  %v2159_v7 = vrot.slane %v8793_v62, %v8799_v3 }
 0x127   : > { %v2133_v19 = vadd.f32 %v2114_v0, %v1951_v60  ;;  %4728 = vmatpush1.msra.mxu1 %v3977_v6  ;;  %v1478_v48 = vpop.f32.mrf.mxu0  ;;  %7274 = vmatprep.mubr.msk.f32.mxu1 %vm7613_vm7, %v11725_v5 }
 0x128   : > { %v1573_v20 = vadd.f32 %v1478_v48, %v1393_v15  ;;  %4729 = vmatprep.subr.mxu1 %v11725_v5  ;;  %v2116_v4 = vpop.f32.mrf.mxu1  ;;  %v3974_v15 = vld [vmem:[%s11716_s7 + $0x60] sm:$0xff]  ;;  %v3018_v48 = vrot.slane %v8348_v34, 5 }
 0x129   : > { %v8828_v8 = vadd.f32 %v2155_v25, %v2133_v19  ;;  %v2134_v28 = vadd.f32 %v2116_v4, %v1952_v55  ;;  %4730 = vmatpush1.msra.mxu1 %v3976_v12  ;;  %v8830_v60 = vpop.f32.mrf.mxu0  ;;  %7152 = vmatmul.mubr.msk.f32.gmra.mxu0 %vm476_vm0, %v3013_v45  ;;  %v3972_v45 = vld [vmem:[%s11716_s7 + $0x50] sm:$0xff]  ;;  %v3017_v19 = vsel %vm1769_vm6, %v3014_v10, %v3016_v18  ;;  %v3971_v10 = vld [vmem:[%s11716_s7 + $0x48] sm:$0xff] }
 0x12a   : > { %4731 = vmatprep.subr.mxu1 %v11725_v5  ;;  %v2120_v17 = vpop.f32.mrf.mxu1  ;;  %7275 = vmatmul.mubr.msk.f32.gmra.mxu1 %vm476_vm0, %v8297_v23 }
 0x12b   : > { %11831 = vst [vmem:[#allocation5_spill] sm:$0xff] %v8828_v8  ;;  %v8841_v55 = vadd.f32 %v2159_v7, %v2134_v28  ;;  %v2137_v30 = vadd.f32 %v2120_v17, %v1955_v21  ;;  %4732 = vmatpush1.msra.mxu1 %v3975_v33  ;;  %v8843_v6 = vpop.f32.mrf.mxu0  ;;  %7154 = vmatprep.mubr.msk.f32.mxu0 %vm7613_vm7, %v11725_v5  ;;  %v3970_v17 = vld [vmem:[%s11716_s7 + $0x40] sm:$0xff] }
 0x12c   : > { %4733 = vmatprep.subr.mxu1 %v11725_v5  ;;  %v2122_v23 = vpop.f32.mrf.mxu1  ;;  %7277 = vmatprep.mubr.msk.f32.mxu1 %vm7613_vm7, %v11725_v5 }
 0x12d   : > { %11832 = vst [vmem:[#allocation6_spill] sm:$0xff] %v8841_v55  ;;  %v8853_v31 = vadd.f32 %v2155_v25, %v2137_v30  ;;  %v2138_v59 = vadd.f32 %v2122_v23, %v1956_v1  ;;  %4734 = vmatpush1.msra.mxu1 %v3974_v15  ;;  %v1663_v21 = vpop.f32.mrf.mxu0  ;;  %7155 = vmatmul.mubr.msk.f32.gmra.mxu0 %vm476_vm0, %v3015_v22  ;;  %v7587_v55 = vld [vmem:[%s8124_s27 + $0x70] sm:$0xff] }
 0x12e   : > { %v1761_v0 = vadd.f32 %v1663_v21, %v1568_v40  ;;  %4735 = vmatprep.subr.mxu1 %v11725_v5  ;;  %v2126_v12 = vpop.f32.mrf.mxu1  ;;  %7278 = vmatmul.mubr.msk.f32.gmra.mxu1 %vm476_vm0, %v8312_v26  ;;  %v3968_v21 = vld [vmem:[%s11716_s7 + $0x30] sm:$0xff] }
 0x12f   : > { %11833 = vst [vmem:[#allocation7_spill] sm:$0xff] %v8853_v31  ;;  %v8864_v1 = vadd.f32 %v2159_v7, %v2138_v59  ;;  %v2141_v4 = vadd.f32 %v2126_v12, %v1959_v39  ;;  %4736 = vmatpush1.msra.mxu1 %v3973_v27  ;;  %v1665_v33 = vpop.f32.mrf.mxu0  ;;  %7157 = vmatprep.mubr.msk.f32.mxu0 %vm7613_vm7, %v11725_v5  ;;  %v3022_v27 = vrot.slane %v8543_v49, 5 }
 0x130   : > { %v1762_v40 = vadd.f32 %v1665_v33, %v1569_v13  ;;  %4737 = vmatprep.subr.mxu1 %v11725_v5  ;;  %v2128_v26 = vpop.f32.mrf.mxu1  ;;  %7280 = vmatprep.mubr.msk.f32.mxu1 %vm7613_vm7, %v11725_v5 }
 0x131   : > { %v8874_v34 = vadd.f32 %v2155_v25, %v2141_v4  ;;  %v2142_v39 = vadd.f32 %v2128_v26, %v8804_v50  ;;  %4738 = vmatpush1.msra.mxu1 %v3972_v45  ;;  %v1669_v28 = vpop.f32.mrf.mxu0  ;;  %7158 = vmatmul.mubr.msk.f32.gmra.mxu0 %vm476_vm0, %v3017_v19  ;;  %v3019_v25 = vsel %vm1769_vm6, %v3016_v18, %v3018_v48  ;;  %v3020_v50 = vrot.slane %v8521_v56, 5  ;;  %v3969_v18 = vld [vmem:[%s11716_s7 + $0x38] sm:$0xff]  ;;  %v3966_v26 = vld [vmem:[%s11716_s7 + $0x20] sm:$0xff] }
 0x132   : > { %v1765_v13 = vadd.f32 %v1669_v28, %v8809_v2  ;;  %4739 = vmatprep.subr.mxu1 %v11725_v5  ;;  %7281 = vmatmul.mubr.msk.f32.gmra.mxu1 %vm476_vm0, %v8327_v29  ;;  %v8885_v15 = vpop.f32.mrf.mxu1 }
 0x133   : > { %11834 = vst [vmem:[#allocation8_spill] sm:$0xff] %v8874_v34  ;;  %4740 = vmatpush1.msra.mxu1 %v3971_v10  ;;  %v1671_v22 = vpop.f32.mrf.mxu0  ;;  %v8889_v30 = vadd.f32 %v2159_v7, %v2142_v39  ;;  %7160 = vmatprep.mubr.msk.f32.mxu0 %vm7613_vm7, %v11725_v5  ;;  %v3023_v4 = vsel %vm1769_vm6, %v3020_v50, %v3022_v27  ;;  %v8972_v27 = vsub.s32 0, %v8770_v9 }
 0x134   : > { %v1766_v2 = vadd.f32 %v1671_v22, %v1573_v20  ;;  %4741 = vmatprep.subr.mxu1 %v11725_v5  ;;  %v6979_v29 = vpop.f32.mrf.mxu1  ;;  %7283 = vmatprep.mubr.msk.f32.mxu1 %vm7613_vm7, %v11725_v5  ;;  %v3021_v20 = vsel %vm1769_vm6, %v3018_v48, %v3020_v50 }
 0x135   : > { %11835 = vst [vmem:[#allocation9_spill] sm:$0xff] %v8889_v30  ;;  %4742 = vmatpush1.msra.mxu1 %v3970_v17  ;;  %v8894_v23 = vpop.f32.mrf.mxu0  ;;  %7161 = vmatmul.mubr.msk.f32.gmra.mxu0 %vm476_vm0, %v3019_v25  ;;  %v3964_v25 = vld [vmem:[%s11716_s7 + $0x10] sm:$0xff]  ;;  %v7576_v29 = vld [vmem:[%s8124_s27 + $0x18] sm:$0xff]  ;;  %11836 = vst [vmem:[#allocation10_spill] sm:$0xff] %v8972_v27 }
 0x136   : > { %v8902_v7 = vpop.f32.mrf.mxu1  ;;  %4743 = vmatprep.subr.mxu1 %v11725_v5  ;;  %7284 = vmatmul.mubr.msk.f32.gmra.mxu1 %vm476_vm0, %v8342_v32  ;;  %v3967_v32 = vld [vmem:[%s11716_s7 + $0x28] sm:$0xff]  ;;  %v3978_v30 = vld [vmem:[%s11716_s7 + $0x80] sm:$0xff] }
 0x137   : > { %v8909_v59 = vpop.f32.mrf.mxu0  ;;  %4744 = vmatpush1.msra.mxu1 %v3969_v18  ;;  %7163 = vmatprep.mubr.msk.f32.mxu0 %vm7613_vm7, %v11725_v5 }
 0x138   : > { %v6982_v12 = vpop.f32.mrf.mxu1  ;;  %4745 = vmatprep.subr.mxu1 %v11725_v5  ;;  %7286 = vmatprep.mubr.msk.f32.mxu1 %vm7613_vm7, %v11725_v5 }
 0x139   : > { %v1855_v45 = vpop.f32.mrf.mxu0  ;;  %7164 = vmatmul.mubr.msk.f32.gmra.mxu0 %vm476_vm0, %v3021_v20  ;;  %4746 = vmatpush1.msra.mxu1 %v3968_v21  ;;  %v3962_v20 = vld [vmem:[%s11716_s7] sm:$0xff] }
 0x13a   : > { %v1953_v19 = vadd.f32 %v1855_v45, %v1761_v0  ;;  %v8923_v48 = vpop.f32.mrf.mxu1  ;;  %4747 = vmatprep.subr.mxu1 %v11725_v5  ;;  %7287 = vmatmul.mubr.msk.f32.gmra.mxu1 %vm476_vm0, %v8359_v37  ;;  %v3965_v37 = vld [vmem:[%s11716_s7 + $0x18] sm:$0xff]  ;;  %v7577_v45 = vld [vmem:[%s8124_s27 + $0x20] sm:$0xff] }
 0x13b   : > { %v1857_v33 = vpop.f32.mrf.mxu0  ;;  %4748 = vmatpush1.msra.mxu1 %v3967_v32  ;;  %7166 = vmatprep.mubr.msk.f32.mxu0 %vm7613_vm7, %v11725_v5  ;;  %v8984_v32 = vrot.slane %v8793_v62, %v8972_v27 }
 0x13c   : > { %v1954_v10 = vadd.f32 %v1857_v33, %v1762_v40  ;;  %v6985_v0 = vpop.f32.mrf.mxu1  ;;  %4749 = vmatprep.subr.mxu1 %v11725_v5  ;;  %7289 = vmatprep.mubr.msk.f32.mxu1 %vm7613_vm7, %v11725_v5 }
 0x13d   : > { %v1861_v39 = vpop.f32.mrf.mxu0  ;;  %7167 = vmatmul.mubr.msk.f32.gmra.mxu0 %vm476_vm0, %v3023_v4  ;;  %4750 = vmatpush1.msra.mxu1 %v3966_v26  ;;  %v8987_v4 = vsub.s32 1, %v8770_v9 }
 0x13e   : > { %v1957_v28 = vadd.f32 %v1861_v39, %v1765_v13  ;;  %v8941_v40 = vpop.f32.mrf.mxu1  ;;  %4751 = vmatprep.subr.mxu1 %v11725_v5  ;;  %7290 = vmatmul.mubr.msk.f32.gmra.mxu1 %vm476_vm0, %v8375_v42  ;;  %v3963_v42 = vld [vmem:[%s11716_s7 + $0x8] sm:$0xff]  ;;  %v3992_v39 = vld [vmem:[%s11716_s7 + $0xf0] sm:$0xff] }
 0x13f   : > { %v1863_v17 = vpop.f32.mrf.mxu0  ;;  %4752 = vmatpush1.msra.mxu1 %v3965_v37  ;;  %7222 = vmatprep.mubr.msk.f32.mxu0 %vm7613_vm7, %v11725_v5  ;;  %11837 = vst [vmem:[#allocation11_spill] sm:$0xff] %v8987_v4  ;;  %v9001_v37 = vrot.slane %v8793_v62, %v8987_v4  ;;  %v3991_v62 = vld [vmem:[%s11716_s7 + $0xe8] sm:$0xff] }
 0x140   : > { %v1958_v50 = vadd.f32 %v1863_v17, %v1766_v2  ;;  %v6988_v13 = vpop.f32.mrf.mxu1  ;;  %4753 = vmatprep.subr.mxu1 %v11725_v5  ;;  %7292 = vmatprep.mubr.msk.f32.mxu1 %vm7613_vm7, %v11725_v5 }
 0x141   : > { %v8952_v22 = vpop.f32.mrf.mxu0  ;;  %7223 = vmatmul.mubr.msk.f32.vlgmr.msra.gmra.mxu0 %vm476_vm0, %v7576_v29  ;;  %4754 = vmatpush1.msra.mxu1 %v3964_v25  ;;  %v7578_v29 = vld [vmem:[%s8124_s27 + $0x28] sm:$0xff] }
 0x142   : > { %v8961_v2 = vpop.f32.mrf.mxu1  ;;  %4755 = vmatprep.subr.mxu1 %v11725_v5  ;;  %7293 = vmatmul.mubr.msk.f32.gmra.mxu1 %vm476_vm0, %v8392_v47  ;;  %v3993_v47 = vld [vmem:[%s11716_s7 + $0xf8] sm:$0xff] }
 0x143   : > { %v8966_v18 = vpop.f32.mrf.mxu0  ;;  %4756 = vmatpush1.msra.mxu1 %v3963_v42  ;;  %7225 = vmatprep.mubr.msk.f32.mxu0 %vm7613_vm7, %v11725_v5 }
 0x144   : > { %v6991_v21 = vpop.f32.mrf.mxu1  ;;  %4757 = vmatprep.subr.mxu1 %v11725_v5  ;;  %7295 = vmatprep.mubr.msk.f32.mxu1 %vm7613_vm7, %v11725_v5 }
 0x145   : > { %v2037_v12 = vpop.f32.mrf.mxu0  ;;  %7226 = vmatmul.mubr.msk.f32.gmra.mxu0 %vm476_vm0, %v7577_v45  ;;  %4758 = vmatpush1.msra.mxu1 %v3962_v20  ;;  %v3990_v21 = vld [vmem:[%s11716_s7 + $0xe0] sm:$0xff] }
 0x146   : > { %v2135_v33 = vadd.f32 %v2037_v12, %v1953_v19  ;;  %v8991_v26 = vpop.f32.mrf.mxu1  ;;  %4759 = vmatprep.subr.mxu1 %v11725_v5  ;;  %7296 = vmatmul.mubr.msk.f32.gmra.mxu1 %vm476_vm0, %v8406_v52  ;;  %v1385_v52 = vadd.f32 %v8741_v35, %v8706_v36 }
 0x147   : > { %v2039_v0 = vpop.f32.mrf.mxu0  ;;  %4760 = vmatpush2.msra.mxu1 %v3993_v47  ;;  %7228 = vmatprep.mubr.msk.f32.mxu0 %vm7613_vm7, %v11725_v5 }
 0x148   : > { %v9004_v19 = vadd.f32 %v8984_v32, %v2135_v33  ;;  %v2136_v17 = vadd.f32 %v2039_v0, %v1954_v10  ;;  %v6994_v25 = vpop.f32.mrf.mxu1  ;;  %4761 = vmatprep.subr.mxu1 %v11725_v5  ;;  %7298 = vmatprep.mubr.msk.f32.mxu1 %vm7613_vm7, %v11725_v5  ;;  %v1565_v35 = vadd.f32 %v8777_v24, %v1385_v52  ;;  %v7579_v33 = vld [vmem:[%s8124_s27 + $0x30] sm:$0xff]  ;;  %v3587_v0 = vrot.slane %v8521_v56, 1 }
 0x149   : > { %v2043_v13 = vpop.f32.mrf.mxu0  ;;  %7229 = vmatmul.mubr.msk.f32.gmra.mxu0 %vm476_vm0, %v7578_v29  ;;  %4762 = vmatpush2.msra.mxu1 %v3992_v39 }
 0x14a   : > { %11838 = vst [vmem:[#allocation12_spill] sm:$0xff] %v9004_v19  ;;  %v9017_v42 = vadd.f32 %v9001_v37, %v2136_v17  ;;  %v2139_v10 = vadd.f32 %v2043_v13, %v1957_v28  ;;  %v9021_v36 = vpop.f32.mrf.mxu1  ;;  %4763 = vmatprep.subr.mxu1 %v11725_v5  ;;  %7299 = vmatmul.mubr.msk.f32.gmra.mxu1 %vm476_vm0, %v8419_v44 }
 0x14b   : > { %v2045_v20 = vpop.f32.mrf.mxu0  ;;  %v1564_v28 = vadd.f32 %v8767_v58, %v8734_v16  ;;  %4764 = vmatpush2.msra.mxu1 %v3991_v62  ;;  %7231 = vmatprep.mubr.msk.f32.mxu0 %vm7613_vm7, %v11725_v5  ;;  %v1758_v47 = vadd.f32 %v8843_v6, %v1565_v35  ;;  %v3989_v58 = vld [vmem:[%s11716_s7 + $0xd8] sm:$0xff]  ;;  %v3588_v13 = vsel %vm470_vm1, %v8422_v57, %v3587_v0  ;;  %v9083_v35 = vld [vmem:[%s8124_s27 + $0x88] sm:$0xff] }
 0x14c   : > { %v9033_v12 = vadd.f32 %v8984_v32, %v2139_v10  ;;  %v2140_v45 = vadd.f32 %v2045_v20, %v1958_v50  ;;  %v6997_v24 = vpop.f32.mrf.mxu1  ;;  %4765 = vmatprep.subr.mxu1 %v11725_v5  ;;  %7301 = vmatprep.mubr.msk.f32.mxu1 %vm7613_vm7, %v11725_v5  ;;  %v7580_v62 = vld [vmem:[%s8124_s27 + $0x38] sm:$0xff] }
 0x14d   : > { %v2317_v44 = vpop.f32.mrf.mxu0  ;;  %7232 = vmatmul.mubr.msk.f32.gmra.mxu0 %vm476_vm0, %v7579_v33  ;;  %v1757_v16 = vadd.f32 %v8830_v60, %v1564_v28  ;;  %4766 = vmatpush2.msra.mxu1 %v3990_v21  ;;  %v1950_v39 = vadd.f32 %v8909_v59, %v1758_v47  ;;  %v3591_v28 = vrot.slane %v9083_v35, 1  ;;  %v7581_v47 = vld [vmem:[%s8124_s27 + $0x40] sm:$0xff]  ;;  %v9116_v33 = vsub.s32 6, %v8770_v9 }
 0x14e   : > { %11839 = vst [vmem:[#allocation13_spill] sm:$0xff] %v9033_v12  ;;  %v9046_v50 = vpop.f32.mrf.mxu1  ;;  %v9050_v6 = vadd.f32 %v9001_v37, %v2140_v45  ;;  %v9053_v17 = vadd.f32 %v8885_v15, %v2317_v44  ;;  %4767 = vmatprep.subr.mxu1 %v11725_v5  ;;  %7302 = vmatmul.mubr.msk.f32.gmra.mxu1 %vm476_vm0, %v8435_v61  ;;  %v3988_v15 = vld [vmem:[%s11716_s7 + $0xd0] sm:$0xff]  ;;  %v9267_v12 = vsub.s32 4, %v8770_v9 }
 0x14f   : > { %v6930_v56 = vpop.f32.mrf.mxu0  ;;  %v1949_v60 = vadd.f32 %v8894_v23, %v1757_v16  ;;  %7234 = vmatprep.mubr.msk.f32.mxu0 %vm7613_vm7, %v11725_v5  ;;  %v2132_v25 = vadd.f32 %v8966_v18, %v1950_v39  ;;  %4768 = vmatpush2.msra.mxu1 %v3989_v58  ;;  %v3589_v23 = vrot.slane %v8543_v49, 1  ;;  %v3987_v18 = vld [vmem:[%s11716_s7 + $0xc8] sm:$0xff]  ;;  %v3986_v49 = vld [vmem:[%s11716_s7 + $0xc0] sm:$0xff]  ;;  %v9134_v39 = vsub.s32 7, %v8770_v9 }
 0x150   : > { %v7000_v59 = vpop.f32.mrf.mxu1  ;;  %4769 = vmatprep.subr.mxu1 %v11725_v5  ;;  %7304 = vmatprep.mubr.msk.f32.mxu1 %vm7613_vm7, %v11725_v5  ;;  %v9126_v16 = vld [vmem:[%s11715_s6 + $0x8] sm:$0xff]  ;;  %11850 = vst [vmem:[#allocation24_spill] sm:$0xff] %v9267_v12 }
 0x151   : > { %v2322_v52 = vpop.f32.mrf.mxu0  ;;  %v2131_v61 = vadd.f32 %v8952_v22, %v1949_v60  ;;  %7235 = vmatmul.mubr.msk.f32.gmra.mxu0 %vm476_vm0, %v7580_v62  ;;  %4770 = vmatpush2.msra.mxu1 %v3988_v15  ;;  %v9093_v22 = vadd.f32 %v9001_v37, %v2132_v25  ;;  %v3590_v21 = vsel %vm470_vm1, %v3587_v0, %v3589_v23  ;;  %v3985_v37 = vld [vmem:[%s11716_s7 + $0xb8] sm:$0xff]  ;;  %v9131_v58 = vld [vmem:[%s11715_s6 + $0x28] sm:$0xff] }
 0x152   : > { %v9073_v29 = vadd.f32 %v8902_v7, %v2322_v52  ;;  %v9080_v10 = vpop.f32.mrf.mxu1  ;;  %4771 = vmatprep.subr.mxu1 %v11725_v5  ;;  %7305 = vmatmul.mubr.msk.f32.gmra.mxu1 %vm476_vm0, %v3588_v13  ;;  %v3592_v60 = vsel %vm470_vm1, %v3589_v23, %v3591_v28  ;;  %v7582_v25 = vld [vmem:[%s8124_s27 + $0x48] sm:$0xff] }
 0x153   : > { %v6933_v57 = vpop.f32.mrf.mxu0  ;;  %4772 = vmatpush2.msra.mxu1 %v3987_v18  ;;  %7237 = vmatprep.mubr.msk.f32.mxu0 %vm7613_vm7, %v11725_v5  ;;  %v9100_v45 = vadd.f32 %v8984_v32, %v2131_v61  ;;  %v9141_v15 = vrot.slane %v9093_v22, %v9116_v33  ;;  %v3983_v52 = vld [vmem:[%s11716_s7 + $0xa8] sm:$0xff]  ;;  %v9156_v23 = vrot.slane %v9093_v22, %v9134_v39 }
 0x154   : > { %v7003_v7 = vpop.f32.mrf.mxu1  ;;  %4773 = vmatprep.subr.mxu1 %v11725_v5  ;;  %7307 = vmatprep.mubr.msk.f32.mxu1 %vm7613_vm7, %v11725_v5  ;;  %v9166_v62 = vrot.slane %v9093_v22, %v8972_v27 }
 0x155   : > { %v2327_v20 = vpop.f32.mrf.mxu0  ;;  %7238 = vmatmul.mubr.msk.f32.gmra.mxu0 %vm476_vm0, %v7581_v47  ;;  %4774 = vmatpush2.msra.mxu1 %v3986_v49  ;;  %11840 = vst [vmem:[#allocation14_spill] sm:$0xff] %v9156_v23  ;;  %v9160_v61 = vrot.slane %v9100_v45, %v9134_v39  ;;  %v9170_v18 = vmul.f32 %v9141_v15, %v9126_v16  ;;  %v3982_v49 = vld [vmem:[%s11716_s7 + $0xa0] sm:$0xff] }
 0x156   : > { %v9104_v24 = vadd.f32 %v8923_v48, %v2327_v20  ;;  %v9111_v44 = vpop.f32.mrf.mxu1  ;;  %4775 = vmatprep.subr.mxu1 %v11725_v5  ;;  %7308 = vmatmul.mubr.msk.f32.gmra.mxu1 %vm476_vm0, %v3590_v21  ;;  %v3984_v48 = vld [vmem:[%s11716_s7 + $0xb0] sm:$0xff]  ;;  %v9174_v57 = vmul.f32 %v9141_v15, %v9131_v58  ;;  %v9185_v21 = vmul.f32 %v9156_v23, %v9126_v16 }
 0x157   : > { %v6936_v32 = vpop.f32.mrf.mxu0  ;;  %4776 = vmatpush2.msra.mxu1 %v3985_v37  ;;  %7240 = vmatprep.mubr.msk.f32.mxu0 %vm7613_vm7, %v11725_v5  ;;  %11841 = vst [vmem:[#allocation15_spill] sm:$0xff] %v9160_v61  ;;  %v7583_v37 = vld [vmem:[%s8124_s27 + $0x50] sm:$0xff] }
 0x158   : > { %v7006_v0 = vpop.f32.mrf.mxu1  ;;  %4777 = vmatprep.subr.mxu1 %v11725_v5  ;;  %7310 = vmatprep.mubr.msk.f32.mxu1 %vm7613_vm7, %v11725_v5  ;;  %11842 = vst [vmem:[#allocation16_spill] sm:$0xff] %v9185_v21  ;;  %v3981_v32 = vld [vmem:[%s11716_s7 + $0x98] sm:$0xff] }
 0x159   : > { %v2332_v56 = vpop.f32.mrf.mxu0  ;;  %7241 = vmatmul.mubr.msk.f32.gmra.mxu0 %vm476_vm0, %v7582_v25  ;;  %4778 = vmatpush2.msra.mxu1 %v3984_v48  ;;  %v9200_v0 = vmul.f32 %v9156_v23, %v9131_v58 }
 0x15a   : > { %v9145_v59 = vadd.f32 %v8941_v40, %v2332_v56  ;;  %v9152_v13 = vpop.f32.mrf.mxu1  ;;  %4779 = vmatprep.subr.mxu1 %v11725_v5  ;;  %7311 = vmatmul.mubr.msk.f32.gmra.mxu1 %vm476_vm0, %v3592_v60  ;;  %v3980_v60 = vld [vmem:[%s11716_s7 + $0x90] sm:$0xff] }
 0x15b   : > { %v6939_v40 = vpop.f32.mrf.mxu0  ;;  %4780 = vmatpush2.msra.mxu1 %v3983_v52  ;;  %7243 = vmatprep.mubr.msk.f32.mxu0 %vm7613_vm7, %v11725_v5  ;;  %11843 = vst [vmem:[#allocation17_spill] sm:$0xff] %v9200_v0  ;;  %v9213_v52 = vrot.slane %v9017_v42, %v8972_v27 }
 0x15c   : > { %v7009_v7 = vpop.f32.mrf.mxu1  ;;  %4781 = vmatprep.subr.mxu1 %v11725_v5  ;;  %7313 = vmatprep.mubr.msk.f32.mxu1 %vm7613_vm7, %v11725_v5  ;;  %v9217_v40 = vrot.slane %v9100_v45, %v8972_v27  ;;  %v4057_v27 = vrot.slane %v9100_v45, %v8987_v4 }
 0x15d   : > { %v2337_v20 = vpop.f32.mrf.mxu0  ;;  %7244 = vmatmul.mubr.msk.f32.gmra.mxu0 %vm476_vm0, %v7583_v37  ;;  %4782 = vmatpush2.msra.mxu1 %v3982_v49  ;;  %11844 = vst [vmem:[#allocation18_spill] sm:$0xff] %v9213_v52 }
 0x15e   : > { %v9189_v47 = vadd.f32 %v8961_v2, %v2337_v20  ;;  %v9196_v48 = vpop.f32.mrf.mxu1  ;;  %v4039_v2 = vmul.f32 %v9166_v62, %v9126_v16  ;;  %4783 = vmatprep.subr.mxu1 %v11725_v5  ;;  %7314 = vmatmul.mubr.msk.f32.gmra.mxu1 %vm476_vm0, %v3591_v28  ;;  %v9221_v28 = vrot.slane %v9017_v42, %v8987_v4  ;;  %v3979_v20 = vld [vmem:[%s11716_s7 + $0x88] sm:$0xff] }
 0x15f   : > { %v6942_v56 = vpop.f32.mrf.mxu0  ;;  %4784 = vmatpush2.msra.mxu1 %v3981_v32  ;;  %7246 = vmatprep.mubr.msk.f32.mxu0 %vm7613_vm7, %v11725_v5  ;;  %v465_v32 = vld [vmem:[%s11713_s4 + $0x88] sm:$0xff] }
 0x160   : > { %v7012_v25 = vpop.f32.mrf.mxu1  ;;  %4791 = vmatprep.mubr.f32.mxu1 %v4039_v2  ;;  %11845 = vst [vmem:[#allocation19_spill] sm:$0xff] %v9221_v28  ;;  %4785 = vmatprep.subr.mxu1 %v11725_v5  ;;  %v9239_v56 = vmul.f32 %v9213_v52, %v9126_v16  ;;  %v9243_v2 = vmul.f32 %v9213_v52, %v9131_v58  ;;  %v11852_v52 = vmov 0.0  }
 0x161   : > { %v2342_v49 = vpop.f32.mrf.mxu0  ;;  %4786 = vmatpush2.msra.mxu1 %v3980_v60  ;;  %7317 = vmatpush3.msra.mxu0 %v465_v32 }
 0x162   : > { %v9227_v7 = vadd.f32 %v8991_v26, %v2342_v49  ;;  %v9232_v37 = vpop.f32.mrf.mxu1  ;;  %11846 = vst [vmem:[#allocation20_spill] sm:$0xff] %v9239_v56  ;;  %11847 = vst [vmem:[#allocation21_spill] sm:$0xff] %v9243_v2  ;;  %v7584_v26 = vld [vmem:[%s8124_s27 + $0x58] sm:$0xff]  ;;  %v9250_v49 = vld [vmem:[%s11715_s6] sm:$0xff]  ;;  %4787 = vmatprep.subr.mxu1 %v11725_v5  ;;  %7318 = vmatprep.subr.mxu0 %v11852_v52 }
 0x163   : > { %7247 = vmatmul.mubr.msk.f32.gmra.mxu0 %vm476_vm0, %v7584_v26  ;;  %v6945_v25 = vpop.f32.mrf.mxu0  ;;  %4788 = vmatpush2.msra.mxu1 %v3979_v20  ;;  %v9260_v26 = vmul.f32 %v9221_v28, %v9126_v16  ;;  %v4038_v20 = vmul.f32 %v9217_v40, %v9250_v49 }
 0x164   : > { %7249 = vmatprep.mubr.msk.f32.mxu0 %vm7613_vm7, %v11725_v5  ;;  %v7015_v34 = vpop.f32.mrf.mxu1  ;;  %v9264_v25 = vmul.f32 %v9221_v28, %v9131_v58  ;;  %v9270_v5 = vsub.s32 5, %v8770_v9  ;;  %4789 = vmatprep.subr.mxu1 %v11852_v52  ;;  %v9283_v28 = vld [vmem:[%s11715_s6 + $0x20] sm:$0xff] }
 0x165   : > { %v2347_v60 = vpop.f32.mrf.mxu0  ;;  %11848 = vst [vmem:[#allocation22_spill] sm:$0xff] %v9260_v26  ;;  %v464_v9 = vld [vmem:[%s11713_s4 + $0x80] sm:$0xff]  ;;  %4790 = vmatpush2.msra.mxu1 %v3978_v30  ;;  %v9298_v26 = vld [vmem:[%s11715_s6 + $0x48] sm:$0xff]  ;;  %v9302_v30 = vrot.slane %v9017_v42, %v9267_v12 }
 0x166   : > { %11849 = vst [vmem:[#allocation23_spill] sm:$0xff] %v9264_v25  ;;  %11851 = vst [vmem:[#allocation25_spill] sm:$0xff] %v9270_v5  ;;  %v9274_v34 = vadd.f32 %v9021_v36, %v2347_v60  ;;  %v9278_v32 = vpop.f32.mrf.mxu1  ;;  %v7585_v25 = vld [vmem:[%s8124_s27 + $0x60] sm:$0xff]  ;;  %v4043_v36 = vmul.f32 %v9166_v62, %v9131_v58  ;;  %4792 = vmatmul.mubr.f32.vlgmr.msra.gmra.mxu1 %v4038_v20  ;;  %7319 = vmatpush3.msra.mxu0 %v464_v9  ;;  %v7586_v9 = vld [vmem:[%s8124_s27 + $0x68] sm:$0xff] }
 0x167   : > { %7250 = vmatmul.mubr.msk.f32.gmra.mxu0 %vm476_vm0, %v7585_v25  ;;  %v6948_v60 = vpop.f32.mrf.mxu0  ;;  %11853 = vst [vmem:[#allocation26_spill] sm:$0xff] %v9302_v30  ;;  %v9306_v25 = vrot.slane %v9017_v42, %v9270_v5  ;;  %5112 = vmatprep.subr.mxu0 %v11852_v52  ;;  %v9322_v0 = vmul.f32 %v9302_v30, %v9131_v58 }
 0x168   : > { %7252 = vmatprep.mubr.msk.f32.mxu0 %vm7613_vm7, %v11852_v52  ;;  %v7018_v2 = vpop.f32.mrf.mxu1  ;;  %4796 = vmatprep.mubr.f32.mxu1 %v4043_v36  ;;  %v4042_v60 = vmul.f32 %v9217_v40, %v9283_v28  ;;  %v9326_v36 = vrot.slane %v9017_v42, %v9116_v33 }
 0x169   : > { %11854 = vst [vmem:[#allocation27_spill] sm:$0xff] %v9306_v25  ;;  %v2352_v20 = vpop.f32.mrf.mxu0  ;;  %v9318_v2 = vmul.f32 %v9302_v30, %v9126_v16  ;;  %11856 = vst [vmem:[#allocation29_spill] sm:$0xff] %v9322_v0  ;;  %v9342_v30 = vld [vmem:[%s11715_s6 + $0x68] sm:$0xff]  ;;  %v9346_v0 = vmul.f32 %v9306_v25, %v9126_v16  ;;  %v9350_v61 = vmul.f32 %v9306_v25, %v9131_v58 }
 0x16a   : > { %v9311_v56 = vadd.f32 %v9046_v50, %v2352_v20  ;;  %v9313_v23 = vpop.f32.mrf.mxu1  ;;  %11857 = vst [vmem:[#allocation30_spill] sm:$0xff] %v9326_v36  ;;  %v4047_v50 = vmul.f32 %v9166_v62, %v9298_v26  ;;  %4797 = vmatmul.mubr.f32.gmra.mxu1 %v4042_v60 }
 0x16b   : > { %11855 = vst [vmem:[#allocation28_spill] sm:$0xff] %v9318_v2  ;;  %7253 = vmatmul.mubr.msk.f32.gmra.mxu0 %vm476_vm0, %v7586_v9  ;;  %v6951_v20 = vpop.f32.mrf.mxu0  ;;  %v9335_v2 = vld [vmem:[%s11715_s6 + $0x40] sm:$0xff]  ;;  %11858 = vst [vmem:[#allocation31_spill] sm:$0xff] %v9346_v0 }
 0x16c   : > { %7255 = vmatprep.mubr.msk.f32.mxu0 %vm7613_vm7, %v11852_v52  ;;  %v7021_v9 = vpop.f32.mrf.mxu1  ;;  %4801 = vmatprep.mubr.f32.mxu1 %v4047_v50  ;;  %11859 = vst [vmem:[#allocation32_spill] sm:$0xff] %v9350_v61  ;;  %v4046_v8 = vmul.f32 %v9217_v40, %v9335_v2  ;;  %v4051_v50 = vmul.f32 %v9166_v62, %v9342_v30 }
 0x16d   : > { %v2357_v20 = vpop.f32.mrf.mxu0  ;;  %v9361_v9 = vmul.f32 %v9326_v36, %v9126_v16  ;;  %v9376_v61 = vmul.f32 %v9326_v36, %v9131_v58  ;;  %v9390_v36 = vld [vmem:[%s8124_s27 + $0x78] sm:$0xff] }
 0x16e   : > { %v9353_v60 = vadd.f32 %v9080_v10, %v2357_v20  ;;  %v9357_v21 = vpop.f32.mrf.mxu1  ;;  %v9370_v10 = vld [vmem:[%s11715_s6 + $0x60] sm:$0xff]  ;;  %v4061_v20 = vrot.slane %v9093_v22, %v8987_v4  ;;  %4802 = vmatmul.mubr.f32.gmra.mxu1 %v4046_v8 }
 0x16f   : > { %11860 = vst [vmem:[#allocation33_spill] sm:$0xff] %v9361_v9  ;;  %7256 = vmatmul.mubr.msk.f32.gmra.mxu0 %vm476_vm0, %v7587_v55  ;;  %v6954_v25 = vpop.f32.mrf.mxu0  ;;  %11861 = vst [vmem:[#allocation34_spill] sm:$0xff] %v9376_v61  ;;  %4806 = vmatprep.mubr.f32.mxu1 %v4051_v50  ;;  %v4050_v9 = vmul.f32 %v9217_v40, %v9370_v10  ;;  %v9424_v4 = vld [vmem:[%s8124_s27 + $0x80] sm:$0xff] }
 0x170   : > { %7258 = vmatprep.mubr.msk.f32.mxu0 %vm7613_vm7, %v11852_v52  ;;  %v7077_v55 = vpop.f32.mrf.mxu1  ;;  %v4071_v8 = vmul.f32 %v4061_v20, %v9126_v16 }
 0x171   : > { %v2362_v62 = vpop.f32.mrf.mxu0  ;;  %v9403_v55 = vrot.slane %v9004_v19, %v9134_v39 }
 0x172   : > { %v9381_v25 = vadd.f32 %v9111_v44, %v2362_v62  ;;  %v9385_v0 = vpop.f32.mrf.mxu1  ;;  %v9397_v44 = vrot.slane %v9017_v42, %v9134_v39  ;;  %4807 = vmatmul.mubr.f32.gmra.mxu1 %v4050_v9  ;;  %v9407_v62 = vrot.slane %v9050_v6, %v8784_v54 }
 0x173   : > { %7259 = vmatmul.mubr.msk.f32.gmra.mxu0 %vm476_vm0, %v9390_v36  ;;  %v6957_v50 = vpop.f32.mrf.mxu0  ;;  %11863 = vst [vmem:[#allocation36_spill] sm:$0xff] %v9403_v55  ;;  %4811 = vmatprep.mubr.f32.mxu1 %v4071_v8  ;;  %v4075_v8 = vmul.f32 %v4061_v20, %v9131_v58 }
 0x174   : > { %11862 = vst [vmem:[#allocation35_spill] sm:$0xff] %v9397_v44  ;;  %7261 = vmatprep.mubr.msk.f32.mxu0 %vm7613_vm7, %v11852_v52  ;;  %v7080_v40 = vpop.f32.mrf.mxu1  ;;  %11864 = vst [vmem:[#allocation37_spill] sm:$0xff] %v9407_v62  ;;  %v9411_v50 = vmul.f32 %v9397_v44, %v9126_v16  ;;  %v9415_v42 = vmul.f32 %v9397_v44, %v9131_v58 }
 0x175   : > { %v2367_v61 = vpop.f32.mrf.mxu0  ;;  %v4070_v40 = vmul.f32 %v4057_v27, %v9250_v49 }
 0x176   : > { %11865 = vst [vmem:[#allocation38_spill] sm:$0xff] %v9411_v50  ;;  %11866 = vst [vmem:[#allocation39_spill] sm:$0xff] %v9415_v42  ;;  %v9418_v9 = vadd.f32 %v9152_v13, %v2367_v61  ;;  %v9421_v55 = vpop.f32.mrf.mxu1  ;;  %v9433_v61 = vmul.f32 %v9407_v62, %v9126_v16  ;;  %v9437_v42 = vrot.slane %v9050_v6, %v8799_v3 }
 0x177   : > { %7262 = vmatmul.mubr.msk.f32.gmra.mxu0 %vm476_vm0, %v9424_v4  ;;  %v6960_v19 = vpop.f32.mrf.mxu0  ;;  %4812 = vmatmul.mubr.f32.gmra.mxu1 %v4070_v40 }
 0x178   : > { %11867 = vst [vmem:[#allocation40_spill] sm:$0xff] %v9418_v9  ;;  %7264 = vmatprep.mubr.msk.f32.mxu0 %vm7613_vm7, %v11852_v52  ;;  %v7083_v44 = vpop.f32.mrf.mxu1  ;;  %4816 = vmatprep.mubr.f32.mxu1 %v4075_v8  ;;  %11868 = vst [vmem:[#allocation41_spill] sm:$0xff] %v9433_v61  ;;  %v4074_v19 = vmul.f32 %v4057_v27, %v9283_v28  ;;  %v4079_v8 = vmul.f32 %v4061_v20, %v9298_v26 }
 0x179   : > { %v2372_v13 = vpop.f32.mrf.mxu0  ;;  %11869 = vst [vmem:[#allocation42_spill] sm:$0xff] %v9437_v42  ;;  %v9447_v44 = vmul.f32 %v9407_v62, %v9131_v58  ;;  %v4078_v9 = vmul.f32 %v4057_v27, %v9335_v2 }
 0x17a   : > { %v9440_v50 = vadd.f32 %v9196_v48, %v2372_v13  ;;  %v9443_v40 = vpop.f32.mrf.mxu1 }
 0x17b   : > { %11871 = vst [vmem:[#allocation44_spill] sm:$0xff] %v9447_v44  ;;  %7265 = vmatmul.mubr.msk.f32.gmra.mxu0 %vm476_vm0, %v9083_v35  ;;  %v6963_v61 = vpop.f32.mrf.mxu0  ;;  %4817 = vmatmul.mubr.f32.gmra.mxu1 %v4074_v19  ;;  %v4009_v44 = vld [vmem:[%s11716_s7 + $0x178] sm:$0xff]  ;;  %v9469_v19 = vrot.slane %v9050_v6, %v9267_v12 }
 0x17c   : > { %11870 = vst [vmem:[#allocation43_spill] sm:$0xff] %v9440_v50  ;;  %7320 = vmatprep.mubr.msk.f32.mxu0 %vm7613_vm7, %v11852_v52  ;;  %v7086_v48 = vpop.f32.mrf.mxu1  ;;  %4821 = vmatprep.mubr.f32.mxu1 %v4079_v8  ;;  %v9465_v61 = vmul.f32 %v9437_v42, %v9126_v16 }
 0x17d   : > { %v2377_v13 = vpop.f32.mrf.mxu0  ;;  %11873 = vst [vmem:[#allocation46_spill] sm:$0xff] %v9469_v19  ;;  %v9476_v48 = vrot.slane %v9093_v22, %v8784_v54 }
 0x17e   : > { %v9455_v50 = vadd.f32 %v9232_v37, %v2377_v13  ;;  %v9458_v62 = vpop.f32.mrf.mxu1  ;;  %11872 = vst [vmem:[#allocation45_spill] sm:$0xff] %v9465_v61  ;;  %v4083_v37 = vmul.f32 %v4061_v20, %v9342_v30  ;;  %v9480_v13 = vmul.f32 %v9437_v42, %v9131_v58  ;;  %v4082_v20 = vmul.f32 %v4057_v27, %v9370_v10 }
 0x17f   : > { %7321 = vmatmul.mubr.msk.f32.vlgmr.msra.gmra.mxu0 %vm476_vm0, %v8496_v38  ;;  %v6966_v8 = vpop.f32.mrf.mxu0  ;;  %4822 = vmatmul.mubr.f32.gmra.mxu1 %v4078_v9  ;;  %v9496_v9 = vrot.slane %v9100_v45, %v8784_v54  ;;  %v9504_v27 = vmul.f32 %v9469_v19, %v9126_v16 }
 0x180   : > { %11874 = vst [vmem:[#allocation47_spill] sm:$0xff] %v9480_v13  ;;  %7323 = vmatprep.mubr.msk.f32.mxu0 %vm7613_vm7, %v11852_v52  ;;  %v7089_v61 = vpop.f32.mrf.mxu1  ;;  %4826 = vmatprep.mubr.f32.mxu1 %v4083_v37  ;;  %v4008_v8 = vld [vmem:[%s11716_s7 + $0x170] sm:$0xff]  ;;  %v4007_v37 = vld [vmem:[%s11716_s7 + $0x168] sm:$0xff] }
 0x181   : > { %v2382_v12 = vpop.f32.mrf.mxu0  ;;  %5113 = vmatpush1.msra.mxu0 %v4009_v44  ;;  %11875 = vst [vmem:[#allocation48_spill] sm:$0xff] %v9504_v27  ;;  %v9510_v61 = vrot.slane %v9050_v6, %v9270_v5 }
 0x182   : > { %v9485_v38 = vadd.f32 %v9278_v32, %v2382_v12  ;;  %5114 = vmatprep.subr.mxu0 %v11852_v52  ;;  %v9492_v42 = vpop.f32.mrf.mxu1  ;;  %v4103_v12 = vmul.f32 %v9476_v48, %v9126_v16 }
 0x183   : > { %7324 = vmatmul.mubr.msk.f32.gmra.mxu0 %vm476_vm0, %v8511_v14  ;;  %v6969_v32 = vpop.f32.mrf.mxu0  ;;  %4827 = vmatmul.mubr.f32.gmra.mxu1 %v4082_v20  ;;  %11876 = vst [vmem:[#allocation49_spill] sm:$0xff] %v9510_v61 }
 0x184   : > { %7326 = vmatprep.mubr.msk.f32.mxu0 %vm7613_vm7, %v11852_v52  ;;  %v7092_v44 = vpop.f32.mrf.mxu1  ;;  %4831 = vmatprep.mubr.f32.mxu1 %v4103_v12  ;;  %v9517_v32 = vmul.f32 %v9469_v19, %v9131_v58  ;;  %v4005_v19 = vld [vmem:[%s11716_s7 + $0x158] sm:$0xff] }
 0x185   : > { %5115 = vmatpush1.msra.mxu0 %v4008_v8  ;;  %v2387_v14 = vpop.f32.mrf.mxu0  ;;  %v4102_v44 = vmul.f32 %v9496_v9, %v9250_v49  ;;  %v4107_v8 = vmul.f32 %v9476_v48, %v9131_v58 }
 0x186   : > { %11877 = vst [vmem:[#allocation50_spill] sm:$0xff] %v9517_v32  ;;  %v9520_v20 = vadd.f32 %v9313_v23, %v2387_v14  ;;  %5116 = vmatprep.subr.mxu0 %v11852_v52  ;;  %v9525_v6 = vpop.f32.mrf.mxu1  ;;  %v4006_v32 = vld [vmem:[%s11716_s7 + $0x160] sm:$0xff] }
 0x187   : > { %7327 = vmatmul.mubr.msk.f32.gmra.mxu0 %vm476_vm0, %v8531_v63  ;;  %v6972_v12 = vpop.f32.mrf.mxu0  ;;  %4832 = vmatmul.mubr.f32.gmra.mxu1 %v4102_v44  ;;  %v9540_v63 = vmul.f32 %v9510_v61, %v9126_v16 }
 0x188   : > { %5117 = vmatpush1.msra.mxu0 %v4007_v37  ;;  %v7095_v23 = vpop.f32.mrf.mxu1  ;;  %4836 = vmatprep.mubr.f32.mxu1 %v4107_v8  ;;  %v4106_v37 = vmul.f32 %v9496_v9, %v9283_v28  ;;  %v4111_v12 = vmul.f32 %v9476_v48, %v9298_v26 }
 0x189   : > { %5118 = vmatprep.subr.mxu0 %v11852_v52  ;;  %v2686_v14 = vpop.f32.mrf.mxu0  ;;  %11878 = vst [vmem:[#allocation51_spill] sm:$0xff] %v9540_v63  ;;  %7329 = vmatprep.mubr.msk.f32.mxu0 %vm7613_vm7, %v11852_v52 }
 0x18a   : > { %5119 = vmatpush1.msra.mxu0 %v4006_v32  ;;  %v2760_v44 = vadd.f32 %v2686_v14, %v9053_v17  ;;  %v9547_v8 = vpop.f32.mrf.mxu1  ;;  %v4004_v32 = vld [vmem:[%s11716_s7 + $0x150] sm:$0xff]  ;;  %v9559_v17 = vmul.f32 %v9510_v61, %v9131_v58 }
 0x18b   : > { %7330 = vmatmul.mubr.msk.f32.gmra.mxu0 %vm476_vm0, %v8553_v11  ;;  %5120 = vmatprep.subr.mxu0 %v11852_v52  ;;  %v7028_v23 = vpop.f32.mrf.mxu0 }
 0x18c   : > { %11879 = vst [vmem:[#allocation52_spill] sm:$0xff] %v9559_v17  ;;  %4837 = vmatmul.mubr.f32.gmra.mxu1 %v4106_v37  ;;  %5121 = vmatpush1.msra.mxu0 %v4005_v19  ;;  %v7098_v14 = vpop.f32.mrf.mxu1  ;;  %v9562_v63 = vadd.f32 %v9357_v21, %v2760_v44  ;;  %v4003_v23 = vld [vmem:[%s11716_s7 + $0x148] sm:$0xff]  ;;  %v4110_v19 = vmul.f32 %v9496_v9, %v9335_v2  ;;  %v11880_v21 = vld [vmem:[#allocation2_spill] sm:$0xff] }
 0x18d   : > { %4841 = vmatprep.mubr.f32.mxu1 %v4111_v12  ;;  %5122 = vmatprep.subr.mxu0 %v11852_v52  ;;  %v2691_v11 = vpop.f32.mrf.mxu0  ;;  %v4115_v44 = vmul.f32 %v9476_v48, %v9342_v30  ;;  %v4001_v48 = vld [vmem:[%s11716_s7 + $0x138] sm:$0xff] }
 0x18e   : > { %7332 = vmatprep.mubr.msk.f32.mxu0 %vm7613_vm7, %v11852_v52  ;;  %5123 = vmatpush1.msra.mxu0 %v4004_v32  ;;  %v2761_v61 = vadd.f32 %v2691_v11, %v9073_v29  ;;  %v9573_v37 = vpop.f32.mrf.mxu1  ;;  %v4002_v32 = vld [vmem:[%s11716_s7 + $0x140] sm:$0xff]  ;;  %v9585_v29 = vrot.slane %v9093_v22, %v8799_v3  ;;  %v9600_v22 = vrot.slane %v8853_v31, %v9134_v39 }
 0x18f   : > { %7333 = vmatmul.mubr.msk.f32.gmra.mxu0 %vm476_vm0, %v11880_v21  ;;  %5124 = vmatprep.subr.mxu0 %v11852_v52  ;;  %v7031_v12 = vpop.f32.mrf.mxu0 }
 0x190   : > { %4842 = vmatmul.mubr.f32.gmra.mxu1 %v4110_v19  ;;  %5125 = vmatpush1.msra.mxu0 %v4003_v23  ;;  %v7101_v14 = vpop.f32.mrf.mxu1  ;;  %v9588_v11 = vadd.f32 %v9385_v0, %v2761_v61  ;;  %v9596_v12 = vrot.slane %v8864_v1, %v9134_v39  ;;  %11882 = vst [vmem:[#allocation53_spill] sm:$0xff] %v9600_v22  ;;  %v3999_v22 = vld [vmem:[%s11716_s7 + $0x128] sm:$0xff] }
 0x191   : > { %4846 = vmatprep.mubr.f32.mxu1 %v4115_v44  ;;  %5126 = vmatprep.subr.mxu0 %v11852_v52  ;;  %v2696_v21 = vpop.f32.mrf.mxu0  ;;  %v4114_v61 = vmul.f32 %v9496_v9, %v9370_v10  ;;  %v9611_v19 = vrot.slane %v9100_v45, %v8799_v3  ;;  %v11883_v44 = vld [vmem:[#allocation3_spill] sm:$0xff]  ;;  %v4135_v14 = vmul.f32 %v9585_v29, %v9126_v16 }
 0x192   : > { %11881 = vst [vmem:[#allocation2_spill] sm:$0xff] %v9596_v12  ;;  %7335 = vmatprep.mubr.msk.f32.mxu0 %vm7613_vm7, %v11852_v52  ;;  %5127 = vmatpush1.msra.mxu0 %v4002_v32  ;;  %v2762_v0 = vadd.f32 %v2696_v21, %v9104_v24  ;;  %v9607_v23 = vpop.f32.mrf.mxu1  ;;  %v4000_v24 = vld [vmem:[%s11716_s7 + $0x130] sm:$0xff] }
 0x193   : > { %7336 = vmatmul.mubr.msk.f32.gmra.mxu0 %vm476_vm0, %v11883_v44  ;;  %5128 = vmatprep.subr.mxu0 %v11852_v52  ;;  %v7034_v32 = vpop.f32.mrf.mxu0 }
 0x194   : > { %4847 = vmatmul.mubr.f32.gmra.mxu1 %v4114_v61  ;;  %5129 = vmatpush1.msra.mxu0 %v4001_v48  ;;  %v7104_v9 = vpop.f32.mrf.mxu1  ;;  %v9622_v21 = vadd.f32 %v9421_v55, %v2762_v0  ;;  %v4134_v48 = vmul.f32 %v9611_v19, %v9250_v49  ;;  %v4139_v55 = vmul.f32 %v9585_v29, %v9131_v58 }
 0x195   : > { %4851 = vmatprep.mubr.f32.mxu1 %v4135_v14  ;;  %5130 = vmatprep.subr.mxu0 %v11852_v52  ;;  %v2701_v44 = vpop.f32.mrf.mxu0  ;;  %v3998_v14 = vld [vmem:[%s11716_s7 + $0x120] sm:$0xff] }
 0x196   : > { %7338 = vmatprep.mubr.msk.f32.mxu0 %vm7613_vm7, %v11852_v52  ;;  %5131 = vmatpush1.msra.mxu0 %v4000_v24  ;;  %v2763_v16 = vadd.f32 %v2701_v44, %v9145_v59  ;;  %v9633_v61 = vpop.f32.mrf.mxu1  ;;  %v3997_v24 = vld [vmem:[%s11716_s7 + $0x118] sm:$0xff] }
 0x197   : > { %7339 = vmatmul.mubr.msk.f32.gmra.mxu0 %vm476_vm0, %v8598_v41  ;;  %5132 = vmatprep.subr.mxu0 %v11852_v52  ;;  %v7037_v0 = vpop.f32.mrf.mxu0 }
 0x198   : > { %4852 = vmatmul.mubr.f32.gmra.mxu1 %v4134_v48  ;;  %5133 = vmatpush1.msra.mxu0 %v3999_v22  ;;  %v7107_v59 = vpop.f32.mrf.mxu1  ;;  %v9644_v32 = vadd.f32 %v9443_v40, %v2763_v16  ;;  %v4138_v22 = vmul.f32 %v9611_v19, %v9283_v28  ;;  %v4143_v40 = vmul.f32 %v9585_v29, %v9298_v26  ;;  %v3996_v16 = vld [vmem:[%s11716_s7 + $0x110] sm:$0xff] }
 0x199   : > { %4856 = vmatprep.mubr.f32.mxu1 %v4139_v55  ;;  %5134 = vmatprep.subr.mxu0 %v11852_v52  ;;  %v2706_v41 = vpop.f32.mrf.mxu0  ;;  %v3995_v55 = vld [vmem:[%s11716_s7 + $0x108] sm:$0xff] }
 0x19a   : > { %7341 = vmatprep.mubr.msk.f32.mxu0 %vm7613_vm7, %v11852_v52  ;;  %5135 = vmatpush1.msra.mxu0 %v3998_v14  ;;  %v2764_v58 = vadd.f32 %v2706_v41, %v9189_v47  ;;  %v9655_v9 = vpop.f32.mrf.mxu1  ;;  %v4142_v14 = vmul.f32 %v9611_v19, %v9335_v2 }
 0x19b   : > { %7342 = vmatmul.mubr.msk.f32.gmra.mxu0 %vm476_vm0, %v8617_v53  ;;  %5136 = vmatprep.subr.mxu0 %v11852_v52  ;;  %v7040_v44 = vpop.f32.mrf.mxu0 }
 0x19c   : > { %4857 = vmatmul.mubr.f32.gmra.mxu1 %v4138_v22  ;;  %5137 = vmatpush1.msra.mxu0 %v3997_v24  ;;  %v7110_v47 = vpop.f32.mrf.mxu1  ;;  %v9666_v48 = vadd.f32 %v9458_v62, %v2764_v58  ;;  %v4147_v62 = vmul.f32 %v9585_v29, %v9342_v30  ;;  %v3994_v24 = vld [vmem:[%s11716_s7 + $0x100] sm:$0xff]  ;;  %v4021_v22 = vld [vmem:[%s11716_s7 + $0x1d8] sm:$0xff] }
 0x19d   : > { %4861 = vmatprep.mubr.f32.mxu1 %v4143_v40  ;;  %5138 = vmatprep.subr.mxu0 %v11852_v52  ;;  %v2711_v53 = vpop.f32.mrf.mxu0  ;;  %v4146_v40 = vmul.f32 %v9611_v19, %v9370_v10  ;;  %v3756_v19 = vrot.slane %v9390_v36, 2 }
 0x19e   : > { %7344 = vmatprep.mubr.msk.f32.mxu0 %vm7613_vm7, %v11852_v52  ;;  %5139 = vmatpush1.msra.mxu0 %v3996_v16  ;;  %v2765_v0 = vadd.f32 %v2711_v53, %v9227_v7  ;;  %v9677_v59 = vpop.f32.mrf.mxu1  ;;  %v11884_v16 = vld [vmem:[#allocation4_spill] sm:$0xff] }
 0x19f   : > { %7345 = vmatmul.mubr.msk.f32.gmra.mxu0 %vm476_vm0, %v8633_v46  ;;  %5140 = vmatprep.subr.mxu0 %v11852_v52  ;;  %v7043_v41 = vpop.f32.mrf.mxu0  ;;  %v4020_v53 = vld [vmem:[%s11716_s7 + $0x1d0] sm:$0xff] }
 0x1a0   : > { %4862 = vmatmul.mubr.f32.gmra.mxu1 %v4142_v14  ;;  %5141 = vmatpush1.msra.mxu0 %v3995_v55  ;;  %v7113_v7 = vpop.f32.mrf.mxu1  ;;  %v9688_v58 = vadd.f32 %v9492_v42, %v2765_v0  ;;  %v9703_v42 = vrot.slane %v9100_v45, %v9116_v33  ;;  %v4019_v0 = vld [vmem:[%s11716_s7 + $0x1c8] sm:$0xff] }
 0x1a1   : > { %4866 = vmatprep.mubr.f32.mxu1 %v4147_v62  ;;  %5142 = vmatprep.subr.mxu0 %v11852_v52  ;;  %v2716_v46 = vpop.f32.mrf.mxu0  ;;  %v4018_v62 = vld [vmem:[%s11716_s7 + $0x1c0] sm:$0xff] }
 0x1a2   : > { %7347 = vmatprep.mubr.msk.f32.mxu0 %vm7613_vm7, %v11852_v52  ;;  %5143 = vmatpush1.msra.mxu0 %v3994_v24  ;;  %v2766_v29 = vadd.f32 %v2716_v46, %v9274_v34  ;;  %v9699_v44 = vpop.f32.mrf.mxu1  ;;  %v4166_v36 = vmul.f32 %v9703_v42, %v9250_v49  ;;  %v3758_v24 = vrot.slane %v9424_v4, 2  ;;  %v4017_v46 = vld [vmem:[%s11716_s7 + $0x1b8] sm:$0xff]  ;;  %v4170_v4 = vmul.f32 %v9703_v42, %v9283_v28 }
 0x1a3   : > { %7348 = vmatmul.mubr.msk.f32.gmra.mxu0 %vm476_vm0, %v11884_v16  ;;  %5152 = vmatprep.subr.mxu0 %v11852_v52  ;;  %v7046_v47 = vpop.f32.mrf.mxu0  ;;  %v3760_v16 = vrot.slane %v9083_v35, 2  ;;  %v4174_v35 = vmul.f32 %v9703_v42, %v9335_v2 }
 0x1a4   : > { %4867 = vmatmul.mubr.f32.gmra.mxu1 %v4146_v40  ;;  %5153 = vmatpush2.msra.mxu0 %v4021_v22  ;;  %v7116_v34 = vpop.f32.mrf.mxu1  ;;  %v9713_v55 = vadd.f32 %v9525_v6, %v2766_v29  ;;  %v4016_v29 = vld [vmem:[%s11716_s7 + $0x1b0] sm:$0xff] }
 0x1a5   : > { %4871 = vmatprep.mubr.f32.mxu1 %v9170_v18  ;;  %5154 = vmatprep.subr.mxu0 %v11852_v52  ;;  %v2721_v45 = vpop.f32.mrf.mxu0  ;;  %v4015_v34 = vld [vmem:[%s11716_s7 + $0x1a8] sm:$0xff] }
 0x1a6   : > { %7350 = vmatprep.mubr.msk.f32.mxu0 %vm7613_vm7, %v11852_v52  ;;  %5155 = vmatpush2.msra.mxu0 %v4020_v53  ;;  %v2767_v14 = vadd.f32 %v2721_v45, %v9311_v56  ;;  %v9725_v6 = vpop.f32.mrf.mxu1  ;;  %v3757_v56 = vsel %vm821_vm2, %v8651_v51, %v3756_v19 }
 0x1a7   : > { %7351 = vmatmul.mubr.msk.f32.gmra.mxu0 %vm476_vm0, %v8665_v43  ;;  %5156 = vmatprep.subr.mxu0 %v11852_v52  ;;  %v7049_v18 = vpop.f32.mrf.mxu0 }
 0x1a8   : > { %4872 = vmatmul.mubr.f32.gmra.mxu1 %v4166_v36  ;;  %5157 = vmatpush2.msra.mxu0 %v4019_v0  ;;  %v7119_v41 = vpop.f32.mrf.mxu1  ;;  %v9737_v7 = vadd.f32 %v9547_v8, %v2767_v14  ;;  %v4014_v14 = vld [vmem:[%s11716_s7 + $0x1a0] sm:$0xff] }
 0x1a9   : > { %4876 = vmatprep.mubr.f32.mxu1 %v9174_v57  ;;  %5158 = vmatprep.subr.mxu0 %v11852_v52  ;;  %v2726_v43 = vpop.f32.mrf.mxu0  ;;  %v4175_v57 = vmul.f32 %v9141_v15, %v9298_v26 }
 0x1aa   : > { %7353 = vmatprep.mubr.msk.f32.mxu0 %vm7613_vm7, %v11852_v52  ;;  %5159 = vmatpush2.msra.mxu0 %v4018_v62  ;;  %v2768_v51 = vadd.f32 %v2726_v43, %v9353_v60  ;;  %v9749_v8 = vpop.f32.mrf.mxu1  ;;  %v3759_v60 = vsel %vm821_vm2, %v3756_v19, %v3758_v24 }
 0x1ab   : > { %7354 = vmatmul.mubr.msk.f32.gmra.mxu0 %vm476_vm0, %v3757_v56  ;;  %5160 = vmatprep.subr.mxu0 %v11852_v52  ;;  %v7052_v22 = vpop.f32.mrf.mxu0  ;;  %v11885_v56 = vld [vmem:[#allocation40_spill] sm:$0xff] }
 0x1ac   : > { %4877 = vmatmul.mubr.f32.gmra.mxu1 %v4170_v4  ;;  %5161 = vmatpush2.msra.mxu0 %v4017_v46  ;;  %v7175_v40 = vpop.f32.mrf.mxu1  ;;  %v9761_v47 = vadd.f32 %v9573_v37, %v2768_v51  ;;  %v4179_v37 = vmul.f32 %v9141_v15, %v9342_v30  ;;  %v4013_v15 = vld [vmem:[%s11716_s7 + $0x198] sm:$0xff]  ;;  %v4012_v46 = vld [vmem:[%s11716_s7 + $0x190] sm:$0xff]  ;;  %v11886_v51 = vld [vmem:[#allocation10_spill] sm:$0xff] }
 0x1ad   : > { %4881 = vmatprep.mubr.f32.mxu1 %v4175_v57  ;;  %5162 = vmatprep.subr.mxu0 %v11852_v52  ;;  %v2731_v53 = vpop.f32.mrf.mxu0  ;;  %v11887_v4 = vld [vmem:[#allocation6_spill] sm:$0xff] }
 0x1ae   : > { %7356 = vmatprep.mubr.msk.f32.mxu0 %vm7613_vm7, %v11852_v52  ;;  %5163 = vmatpush2.msra.mxu0 %v4016_v29  ;;  %v2769_v19 = vadd.f32 %v2731_v53, %v9381_v25  ;;  %v9772_v45 = vpop.f32.mrf.mxu1  ;;  %v3761_v25 = vsel %vm821_vm2, %v3758_v24, %v3760_v16  ;;  %v4178_v24 = vmul.f32 %v9703_v42, %v9370_v10  ;;  %v9808_v42 = vld [vmem:[%s11715_s6 + $0x18] sm:$0xff]  ;;  %v4011_v53 = vld [vmem:[%s11716_s7 + $0x188] sm:$0xff] }
 0x1af   : > { %7357 = vmatmul.mubr.msk.f32.gmra.mxu0 %vm476_vm0, %v3759_v60  ;;  %5164 = vmatprep.subr.mxu0 %v11852_v52  ;;  %v7055_v0 = vpop.f32.mrf.mxu0  ;;  %v9803_v57 = vrot.slane %v11887_v4, %v11886_v51  ;;  %v11888_v60 = vld [vmem:[#allocation16_spill] sm:$0xff] }
 0x1b0   : > { %4882 = vmatmul.mubr.f32.gmra.mxu1 %v4174_v35  ;;  %5165 = vmatpush2.msra.mxu0 %v4015_v34  ;;  %v7178_v36 = vpop.f32.mrf.mxu1  ;;  %v9783_v18 = vadd.f32 %v9607_v23, %v2769_v19  ;;  %v11889_v34 = vld [vmem:[#allocation5_spill] sm:$0xff]  ;;  %v11890_v35 = vld [vmem:[#allocation43_spill] sm:$0xff] }
 0x1b1   : > { %4886 = vmatprep.mubr.f32.mxu1 %v4179_v37  ;;  %5166 = vmatprep.subr.mxu0 %v11852_v52  ;;  %v2736_v62 = vpop.f32.mrf.mxu0  ;;  %v9820_v19 = vrot.slane %v11889_v34, %v11886_v51  ;;  %v11891_v37 = vld [vmem:[#allocation15_spill] sm:$0xff] }
 0x1b2   : > { %7359 = vmatprep.mubr.msk.f32.mxu0 %vm7613_vm7, %v11852_v52  ;;  %5167 = vmatpush2.msra.mxu0 %v4014_v14  ;;  %v2770_v41 = vadd.f32 %v2736_v62, %v11885_v56  ;;  %v9794_v43 = vpop.f32.mrf.mxu1  ;;  %v4198_v0 = vmul.f32 %v11891_v37, %v9250_v49  ;;  %v9836_v62 = vld [vmem:[%s11715_s6 + $0x10] sm:$0xff] }
 0x1b3   : > { %7360 = vmatmul.mubr.msk.f32.gmra.mxu0 %vm476_vm0, %v3761_v25  ;;  %5168 = vmatprep.subr.mxu0 %v11852_v52  ;;  %v7058_v23 = vpop.f32.mrf.mxu0  ;;  %v4041_v25 = vmul.f32 %v9803_v57, %v9808_v42 }
 0x1b4   : > { %4887 = vmatmul.mubr.f32.gmra.mxu1 %v4178_v24  ;;  %5169 = vmatpush2.msra.mxu0 %v4013_v15  ;;  %v7181_v22 = vpop.f32.mrf.mxu1  ;;  %v9811_v29 = vadd.f32 %v9633_v61, %v2770_v41  ;;  %v4010_v15 = vld [vmem:[%s11716_s7 + $0x180] sm:$0xff]  ;;  %v11892_v24 = vld [vmem:[#allocation17_spill] sm:$0xff] }
 0x1b5   : > { %4891 = vmatprep.mubr.f32.mxu1 %v11888_v60  ;;  %5170 = vmatprep.subr.mxu0 %v11852_v52  ;;  %v2741_v40 = vpop.f32.mrf.mxu0  ;;  %v4202_v22 = vmul.f32 %v11891_v37, %v9283_v28  ;;  %v4040_v60 = vmul.f32 %v9820_v19, %v9836_v62 }
 0x1b6   : > { %7362 = vmatprep.mubr.msk.f32.mxu0 %vm7613_vm7, %v11852_v52  ;;  %5171 = vmatpush2.msra.mxu0 %v4012_v46  ;;  %v2771_v61 = vadd.f32 %v2741_v40, %v11890_v35  ;;  %v9827_v14 = vpop.f32.mrf.mxu1 }
 0x1b7   : > { %7363 = vmatmul.mubr.msk.f32.gmra.mxu0 %vm476_vm0, %v3760_v16  ;;  %5172 = vmatprep.subr.mxu0 %v11852_v52  ;;  %v7061_v36 = vpop.f32.mrf.mxu0  ;;  %v9844_v16 = vld [vmem:[%s11715_s6 + $0x38] sm:$0xff] }
 0x1b8   : > { %4892 = vmatmul.mubr.f32.gmra.mxu1 %v4198_v0  ;;  %5173 = vmatpush2.msra.mxu0 %v4011_v53  ;;  %v7184_v56 = vpop.f32.mrf.mxu1  ;;  %v9847_v41 = vadd.f32 %v9655_v9, %v2771_v61  ;;  %v11893_v9 = vld [vmem:[#allocation14_spill] sm:$0xff]  ;;  %v4045_v35 = vmul.f32 %v9803_v57, %v9844_v16 }
 0x1b9   : > { %4896 = vmatprep.mubr.f32.mxu1 %v11892_v24  ;;  %6580 = vmatprep.mubr.msk.f32.mxu0 %vm4534_vm8, %v4041_v25  ;;  %v2746_v23 = vpop.f32.mrf.mxu0  ;;  %v4207_v53 = vmul.f32 %v11893_v9, %v9298_v26  ;;  %v4206_v56 = vmul.f32 %v11891_v37, %v9335_v2 }
 0x1ba   : > { %5174 = vmatprep.subr.mxu0 %v11852_v52  ;;  %v2772_v46 = vadd.f32 %v2746_v23, %v9455_v50  ;;  %v9857_v40 = vpop.f32.mrf.mxu1  ;;  %v9866_v52 = vld [vmem:[%s11715_s6 + $0x30] sm:$0xff]  ;;  %v9871_v50 = vld [vmem:[%s11715_s6 + $0x58] sm:$0xff] }
 0x1bb   : > { %5175 = vmatpush2.msra.mxu0 %v4010_v15  ;;  %v7064_v61 = vpop.f32.mrf.mxu0  ;;  %v4044_v24 = vmul.f32 %v9820_v19, %v9866_v52 }
 0x1bc   : > { %4897 = vmatmul.mubr.f32.gmra.mxu1 %v4202_v22  ;;  %5177 = vmatmul.mubr.f32.vlgmr.msra.gmra.mxu0 %v4040_v60  ;;  %v7187_v0 = vpop.f32.mrf.mxu1  ;;  %v9874_v25 = vadd.f32 %v9677_v59, %v2772_v46  ;;  %v4211_v22 = vmul.f32 %v11893_v9, %v9342_v30  ;;  %v4049_v59 = vmul.f32 %v9803_v57, %v9871_v50  ;;  %v9891_v60 = vld [vmem:[%s11715_s6 + $0x50] sm:$0xff] }
 0x1bd   : > { %4901 = vmatprep.mubr.f32.mxu1 %v4207_v53  ;;  %6581 = vmatprep.mubr.msk.f32.mxu0 %vm4534_vm8, %v4045_v35  ;;  %v2751_v36 = vpop.f32.mrf.mxu0  ;;  %v4210_v0 = vmul.f32 %v11891_v37, %v9370_v10 }
 0x1be   : > { %v2773_v15 = vadd.f32 %v2751_v36, %v9485_v38  ;;  %v9882_v23 = vpop.f32.mrf.mxu1  ;;  %v9896_v38 = vld [vmem:[%s11715_s6 + $0x78] sm:$0xff]  ;;  %v4048_v36 = vmul.f32 %v9820_v19, %v9891_v60 }
 0x1bf   : > { %v7067_v46 = vpop.f32.mrf.mxu0 }
 0x1c0   : > { %4902 = vmatmul.mubr.f32.gmra.mxu1 %v4206_v56  ;;  %5182 = vmatmul.mubr.f32.gmra.mxu0 %v4044_v24  ;;  %v7190_v53 = vpop.f32.mrf.mxu1  ;;  %v9899_v35 = vadd.f32 %v9699_v44, %v2773_v15  ;;  %v11894_v24 = vld [vmem:[#allocation12_spill] sm:$0xff]  ;;  %v4053_v44 = vmul.f32 %v9803_v57, %v9896_v38 }
 0x1c1   : > { %4906 = vmatprep.mubr.f32.mxu1 %v4211_v22  ;;  %6582 = vmatprep.mubr.msk.f32.mxu0 %vm4534_vm8, %v4049_v59  ;;  %v2756_v9 = vpop.f32.mrf.mxu0  ;;  %v4217_v46 = vrot.slane %v11894_v24, %v11886_v51  ;;  %v9916_v22 = vld [vmem:[%s11715_s6 + $0x70] sm:$0xff] }
 0x1c2   : > { %v2774_v61 = vadd.f32 %v2756_v9, %v9520_v20  ;;  %v9907_v56 = vpop.f32.mrf.mxu1  ;;  %v11895_v20 = vld [vmem:[#allocation11_spill] sm:$0xff]  ;;  %v11896_v9 = vld [vmem:[#allocation20_spill] sm:$0xff]  ;;  %v4052_v17 = vmul.f32 %v9820_v19, %v9916_v22 }
 0x1c3   : > { %v7070_v15 = vpop.f32.mrf.mxu0  ;;  %v4069_v37 = vrot.slane %v11887_v4, %v11895_v20  ;;  %v4230_v12 = vmul.f32 %v4217_v46, %v9250_v49 }
 0x1c4   : > { %4907 = vmatmul.mubr.f32.gmra.mxu1 %v4210_v0  ;;  %5187 = vmatmul.mubr.f32.gmra.mxu0 %v4048_v36  ;;  %v7193_v59 = vpop.f32.mrf.mxu1  ;;  %v9921_v53 = vadd.f32 %v9725_v6, %v2774_v61  ;;  %v4065_v0 = vrot.slane %v11889_v34, %v11895_v20 }
 0x1c5   : > { %4911 = vmatprep.mubr.f32.mxu1 %v11896_v9  ;;  %6583 = vmatprep.mubr.msk.f32.mxu0 %vm4534_vm8, %v4053_v44  ;;  %v3120_v57 = vpop.f32.mrf.mxu0  ;;  %v4073_v6 = vmul.f32 %v4069_v37, %v9808_v42  ;;  %v4234_v9 = vmul.f32 %v4217_v46, %v9283_v28 }
 0x1c6   : > { %v3194_v15 = vadd.f32 %v3120_v57, %v9562_v63  ;;  %v9929_v27 = vpop.f32.mrf.mxu1  ;;  %v11897_v63 = vld [vmem:[#allocation21_spill] sm:$0xff]  ;;  %v4072_v57 = vmul.f32 %v4065_v0, %v9836_v62 }
 0x1c7   : > { %v7126_v61 = vpop.f32.mrf.mxu0 }
 0x1c8   : > { %4912 = vmatmul.mubr.f32.gmra.mxu1 %v4230_v12  ;;  %5192 = vmatmul.mubr.f32.gmra.mxu0 %v4052_v17  ;;  %v7196_v36 = vpop.f32.mrf.mxu1  ;;  %v9935_v44 = vadd.f32 %v9749_v8, %v3194_v15  ;;  %v11898_v12 = vld [vmem:[#allocation18_spill] sm:$0xff]  ;;  %v4077_v61 = vmul.f32 %v4069_v37, %v9844_v16 }
 0x1c9   : > { %4916 = vmatprep.mubr.f32.mxu1 %v11897_v63  ;;  %6584 = vmatprep.mubr.msk.f32.mxu0 %vm4534_vm8, %v4073_v6  ;;  %v3125_v59 = vpop.f32.mrf.mxu0  ;;  %v4239_v17 = vmul.f32 %v11898_v12, %v9298_v26  ;;  %v4238_v63 = vmul.f32 %v4217_v46, %v9335_v2 }
 0x1ca   : > { %v3195_v19 = vadd.f32 %v3125_v59, %v9588_v11  ;;  %v9942_v13 = vpop.f32.mrf.mxu1  ;;  %v4076_v59 = vmul.f32 %v4065_v0, %v9866_v52 }
 0x1cb   : > { %v7129_v8 = vpop.f32.mrf.mxu0 }
 0x1cc   : > { %4917 = vmatmul.mubr.f32.gmra.mxu1 %v4234_v9  ;;  %5197 = vmatmul.mubr.f32.gmra.mxu0 %v4072_v57  ;;  %v7199_v15 = vpop.f32.mrf.mxu1  ;;  %v9948_v6 = vadd.f32 %v9772_v45, %v3195_v19  ;;  %v4243_v9 = vmul.f32 %v11898_v12, %v9342_v30  ;;  %v4081_v57 = vmul.f32 %v4069_v37, %v9871_v50 }
 0x1cd   : > { %4921 = vmatprep.mubr.f32.mxu1 %v4239_v17  ;;  %6585 = vmatprep.mubr.msk.f32.mxu0 %vm4534_vm8, %v4077_v61  ;;  %v3130_v11 = vpop.f32.mrf.mxu0  ;;  %v4242_v61 = vmul.f32 %v4217_v46, %v9370_v10  ;;  %v4080_v15 = vmul.f32 %v4065_v0, %v9891_v60  ;;  %v11899_v46 = vld [vmem:[#allocation22_spill] sm:$0xff] }
 0x1ce   : > { %v3196_v36 = vadd.f32 %v3130_v11, %v9622_v21  ;;  %v9954_v31 = vpop.f32.mrf.mxu1  ;;  %v4249_v11 = vrot.slane %v11894_v24, %v11895_v20 }
 0x1cf   : > { %v7132_v8 = vpop.f32.mrf.mxu0 }
 0x1d0   : > { %4922 = vmatmul.mubr.f32.gmra.mxu1 %v4238_v63  ;;  %5202 = vmatmul.mubr.f32.gmra.mxu0 %v4076_v59  ;;  %v7202_v45 = vpop.f32.mrf.mxu1  ;;  %v9960_v19 = vadd.f32 %v9794_v43, %v3196_v36  ;;  %v4085_v63 = vmul.f32 %v4069_v37, %v9896_v38  ;;  %v4101_v43 = vrot.slane %v11887_v4, %v8784_v54 }
 0x1d1   : > { %4926 = vmatprep.mubr.f32.mxu1 %v4243_v9  ;;  %6586 = vmatprep.mubr.msk.f32.mxu0 %vm4534_vm8, %v4081_v57  ;;  %v3135_v21 = vpop.f32.mrf.mxu0  ;;  %v4262_v8 = vmul.f32 %v4249_v11, %v9250_v49  ;;  %v4084_v37 = vmul.f32 %v4065_v0, %v9916_v22  ;;  %v4266_v0 = vmul.f32 %v4249_v11, %v9283_v28 }
 0x1d2   : > { %v3197_v17 = vadd.f32 %v3135_v21, %v9644_v32  ;;  %v9966_v12 = vpop.f32.mrf.mxu1  ;;  %v4097_v21 = vrot.slane %v11889_v34, %v8784_v54 }
 0x1d3   : > { %v7135_v59 = vpop.f32.mrf.mxu0 }
 0x1d4   : > { %4927 = vmatmul.mubr.f32.gmra.mxu1 %v4242_v61  ;;  %5207 = vmatmul.mubr.f32.gmra.mxu0 %v4080_v15  ;;  %v7205_v36 = vpop.f32.mrf.mxu1  ;;  %v9974_v32 = vadd.f32 %v9827_v14, %v3197_v17  ;;  %v4105_v61 = vmul.f32 %v4101_v43, %v9808_v42  ;;  %v4104_v59 = vmul.f32 %v4097_v21, %v9836_v62 }
 0x1d5   : > { %4931 = vmatprep.mubr.f32.mxu1 %v11899_v46  ;;  %6587 = vmatprep.mubr.msk.f32.mxu0 %vm4534_vm8, %v4085_v63  ;;  %v3140_v9 = vpop.f32.mrf.mxu0  ;;  %v11900_v63 = vld [vmem:[#allocation23_spill] sm:$0xff] }
 0x1d6   : > { %v3198_v57 = vadd.f32 %v3140_v9, %v9666_v48  ;;  %v9981_v45 = vpop.f32.mrf.mxu1  ;;  %v11901_v46 = vld [vmem:[#allocation19_spill] sm:$0xff] }
 0x1d7   : > { %v7138_v14 = vpop.f32.mrf.mxu0  ;;  %v4271_v9 = vmul.f32 %v11901_v46, %v9298_v26 }
 0x1d8   : > { %4932 = vmatmul.mubr.f32.gmra.mxu1 %v4262_v8  ;;  %5212 = vmatmul.mubr.f32.gmra.mxu0 %v4084_v37  ;;  %v7208_v17 = vpop.f32.mrf.mxu1  ;;  %v9987_v15 = vadd.f32 %v9857_v40, %v3198_v57  ;;  %v4109_v8 = vmul.f32 %v4101_v43, %v9844_v16  ;;  %v4108_v14 = vmul.f32 %v4097_v21, %v9866_v52 }
 0x1d9   : > { %4936 = vmatprep.mubr.f32.mxu1 %v11900_v63  ;;  %6588 = vmatprep.mubr.msk.f32.mxu0 %vm4534_vm8, %v4105_v61  ;;  %v3145_v49 = vpop.f32.mrf.mxu0  ;;  %v4270_v61 = vmul.f32 %v4249_v11, %v9335_v2  ;;  %v4275_v17 = vmul.f32 %v11901_v46, %v9342_v30  ;;  %v4113_v63 = vmul.f32 %v4101_v43, %v9871_v50  ;;  %v11902_v46 = vld [vmem:[#allocation24_spill] sm:$0xff] }
 0x1da   : > { %v3199_v48 = vadd.f32 %v3145_v49, %v9688_v58  ;;  %v9994_v36 = vpop.f32.mrf.mxu1 }
 0x1db   : > { %v7141_v40 = vpop.f32.mrf.mxu0 }
 0x1dc   : > { %4937 = vmatmul.mubr.f32.gmra.mxu1 %v4266_v0  ;;  %5217 = vmatmul.mubr.f32.gmra.mxu0 %v4104_v59  ;;  %v7211_v57 = vpop.f32.mrf.mxu1  ;;  %v10000_v37 = vadd.f32 %v9882_v23, %v3199_v48  ;;  %v4274_v0 = vmul.f32 %v4249_v11, %v9370_v10  ;;  %v4112_v59 = vmul.f32 %v4097_v21, %v9891_v60  ;;  %v11903_v10 = vld [vmem:[#allocation28_spill] sm:$0xff] }
 0x1dd   : > { %4941 = vmatprep.mubr.f32.mxu1 %v4271_v9  ;;  %6589 = vmatprep.mubr.msk.f32.mxu0 %vm4534_vm8, %v4109_v8  ;;  %v3150_v28 = vpop.f32.mrf.mxu0  ;;  %v4281_v9 = vrot.slane %v11894_v24, %v11902_v46  ;;  %v4117_v8 = vmul.f32 %v4101_v43, %v9896_v38  ;;  %v10034_v43 = vld [vmem:[%s11715_s6] sm:$0xff] }
 0x1de   : > { %v3200_v58 = vadd.f32 %v3150_v28, %v9713_v55  ;;  %v10006_v26 = vpop.f32.mrf.mxu1 }
 0x1df   : > { %v7144_v49 = vpop.f32.mrf.mxu0 }
 0x1e0   : > { %4942 = vmatmul.mubr.f32.gmra.mxu1 %v4270_v61  ;;  %5222 = vmatmul.mubr.f32.gmra.mxu0 %v4108_v14  ;;  %v7214_v23 = vpop.f32.mrf.mxu1  ;;  %v10012_v48 = vadd.f32 %v9907_v56, %v3200_v58  ;;  %v4133_v56 = vrot.slane %v11887_v4, %v8799_v3  ;;  %v4294_v58 = vmul.f32 %v10034_v43, %v4281_v9 }
 0x1e1   : > { %4946 = vmatprep.mubr.f32.mxu1 %v4275_v17  ;;  %6590 = vmatprep.mubr.msk.f32.mxu0 %vm4534_vm8, %v4113_v63  ;;  %v3155_v2 = vpop.f32.mrf.mxu0  ;;  %v4116_v61 = vmul.f32 %v4097_v21, %v9916_v22  ;;  %v11904_v23 = vld [vmem:[#allocation29_spill] sm:$0xff] }
 0x1e2   : > { %v3201_v55 = vadd.f32 %v3155_v2, %v9737_v7  ;;  %v10018_v30 = vpop.f32.mrf.mxu1  ;;  %v4137_v17 = vmul.f32 %v4133_v56, %v9808_v42 }
 0x1e3   : > { %v7147_v40 = vpop.f32.mrf.mxu0 }
 0x1e4   : > { %4947 = vmatmul.mubr.f32.gmra.mxu1 %v4274_v0  ;;  %5227 = vmatmul.mubr.f32.gmra.mxu0 %v4112_v59  ;;  %v7217_v57 = vpop.f32.mrf.mxu1  ;;  %v10026_v7 = vadd.f32 %v9929_v27, %v3201_v55  ;;  %v4129_v27 = vrot.slane %v11889_v34, %v8799_v3  ;;  %v10052_v55 = vld [vmem:[%s11715_s6 + $0x20] sm:$0xff] }
 0x1e5   : > { %4951 = vmatprep.mubr.f32.mxu1 %v11903_v10  ;;  %6591 = vmatprep.mubr.msk.f32.mxu0 %vm4534_vm8, %v4117_v8  ;;  %v3160_v11 = vpop.f32.mrf.mxu0  ;;  %v4298_v0 = vmul.f32 %v10052_v55, %v4281_v9  ;;  %v11905_v40 = vld [vmem:[#allocation26_spill] sm:$0xff] }
 0x1e6   : > { %v3202_v28 = vadd.f32 %v3160_v11, %v9761_v47  ;;  %v10038_v14 = vpop.f32.mrf.mxu1  ;;  %v4136_v59 = vmul.f32 %v4129_v27, %v9836_v62 }
 0x1e7   : > { %v7150_v63 = vpop.f32.mrf.mxu0 }
 0x1e8   : > { %4952 = vmatmul.mubr.f32.gmra.mxu1 %v4294_v58  ;;  %5232 = vmatmul.mubr.f32.gmra.mxu0 %v4116_v61  ;;  %v7273_v47 = vpop.f32.mrf.mxu1  ;;  %v10044_v49 = vadd.f32 %v9942_v13, %v3202_v28  ;;  %v10061_v13 = vld [vmem:[%s11715_s6 + $0x48] sm:$0xff] }
 0x1e9   : > { %4956 = vmatprep.mubr.f32.mxu1 %v11904_v23  ;;  %6592 = vmatprep.mubr.msk.f32.mxu0 %vm4534_vm8, %v4137_v17  ;;  %v3165_v2 = vpop.f32.mrf.mxu0  ;;  %v4303_v57 = vmul.f32 %v10061_v13, %v11905_v40  ;;  %v10074_v17 = vld [vmem:[%s11715_s6 + $0x40] sm:$0xff]  ;;  %v4140_v47 = vmul.f32 %v4129_v27, %v9866_v52 }
 0x1ea   : > { %v3203_v21 = vadd.f32 %v3165_v2, %v9783_v18  ;;  %v10056_v8 = vpop.f32.mrf.mxu1  ;;  %v4141_v18 = vmul.f32 %v4133_v56, %v9844_v16  ;;  %v4302_v63 = vmul.f32 %v10074_v17, %v4281_v9 }
 0x1eb   : > { %v7153_v10 = vpop.f32.mrf.mxu0 }
 0x1ec   : > { %4957 = vmatmul.mubr.f32.gmra.mxu1 %v4298_v0  ;;  %5237 = vmatmul.mubr.f32.gmra.mxu0 %v4136_v59  ;;  %v7276_v11 = vpop.f32.mrf.mxu1  ;;  %v10067_v28 = vadd.f32 %v9954_v31, %v3203_v21  ;;  %v10083_v31 = vld [vmem:[%s11715_s6 + $0x68] sm:$0xff]  ;;  %v10096_v10 = vld [vmem:[%s11715_s6 + $0x60] sm:$0xff] }
 0x1ed   : > { %4961 = vmatprep.mubr.f32.mxu1 %v4303_v57  ;;  %6593 = vmatprep.mubr.msk.f32.mxu0 %vm4534_vm8, %v4141_v18  ;;  %v3170_v58 = vpop.f32.mrf.mxu0  ;;  %v4307_v2 = vmul.f32 %v10083_v31, %v11905_v40  ;;  %v4306_v40 = vmul.f32 %v10096_v10, %v4281_v9  ;;  %v4144_v11 = vmul.f32 %v4129_v27, %v9891_v60  ;;  %v11906_v9 = vld [vmem:[#allocation31_spill] sm:$0xff] }
 0x1ee   : > { %v3204_v61 = vadd.f32 %v3170_v58, %v9811_v29  ;;  %v10078_v23 = vpop.f32.mrf.mxu1  ;;  %v4145_v29 = vmul.f32 %v4133_v56, %v9871_v50 }
 0x1ef   : > { %v7156_v21 = vpop.f32.mrf.mxu0 }
 0x1f0   : > { %4962 = vmatmul.mubr.f32.gmra.mxu1 %v4302_v63  ;;  %5242 = vmatmul.mubr.f32.gmra.mxu0 %v4140_v47  ;;  %v7279_v0 = vpop.f32.mrf.mxu1  ;;  %v10089_v59 = vadd.f32 %v9966_v12, %v3204_v61  ;;  %v4313_v12 = vrot.slane %v11894_v24, %v9270_v5  ;;  %v4149_v61 = vmul.f32 %v4133_v56, %v9896_v38 }
 0x1f1   : > { %4966 = vmatprep.mubr.f32.mxu1 %v4307_v2  ;;  %6594 = vmatprep.mubr.msk.f32.mxu0 %vm4534_vm8, %v4145_v29  ;;  %v3175_v57 = vpop.f32.mrf.mxu0  ;;  %v4148_v56 = vmul.f32 %v4129_v27, %v9916_v22 }
 0x1f2   : > { %v3205_v18 = vadd.f32 %v3175_v57, %v9847_v41  ;;  %v10100_v58 = vpop.f32.mrf.mxu1  ;;  %v4165_v41 = vrot.slane %v11887_v4, %v9116_v33  ;;  %v4326_v0 = vmul.f32 %v10034_v43, %v4313_v12  ;;  %v4161_v57 = vrot.slane %v11889_v34, %v9116_v33 }
 0x1f3   : > { %v7159_v63 = vpop.f32.mrf.mxu0 }
 0x1f4   : > { %4967 = vmatmul.mubr.f32.gmra.mxu1 %v4306_v40  ;;  %5247 = vmatmul.mubr.f32.gmra.mxu0 %v4144_v11  ;;  %v7282_v47 = vpop.f32.mrf.mxu1  ;;  %v10108_v2 = vadd.f32 %v9981_v45, %v3205_v18  ;;  %v4169_v40 = vmul.f32 %v4165_v41, %v9808_v42  ;;  %v11907_v18 = vld [vmem:[#allocation32_spill] sm:$0xff] }
 0x1f5   : > { %4971 = vmatprep.mubr.f32.mxu1 %v11906_v9  ;;  %6595 = vmatprep.mubr.msk.f32.mxu0 %vm4534_vm8, %v4149_v61  ;;  %v3180_v29 = vpop.f32.mrf.mxu0  ;;  %v4330_v47 = vmul.f32 %v10052_v55, %v4313_v12  ;;  %v4168_v9 = vmul.f32 %v4161_v57, %v9836_v62 }
 0x1f6   : > { %v3206_v21 = vadd.f32 %v3180_v29, %v9874_v25  ;;  %v10118_v63 = vpop.f32.mrf.mxu1  ;;  %v11908_v29 = vld [vmem:[#allocation27_spill] sm:$0xff] }
 0x1f7   : > { %v7162_v11 = vpop.f32.mrf.mxu0 }
 0x1f8   : > { %4972 = vmatmul.mubr.f32.gmra.mxu1 %v4326_v0  ;;  %5252 = vmatmul.mubr.f32.gmra.mxu0 %v4148_v56  ;;  %v10121_v45 = vadd.f32 %v9994_v36, %v3206_v21  ;;  %v7285_v61 = vpop.f32.mrf.mxu1  ;;  %v4335_v11 = vmul.f32 %v10061_v13, %v11908_v29  ;;  %v4173_v0 = vmul.f32 %v4165_v41, %v9844_v16 }
 0x1f9   : > { %4976 = vmatprep.mubr.f32.mxu1 %v11907_v18  ;;  %6596 = vmatprep.mubr.msk.f32.mxu0 %vm4534_vm8, %v4169_v40  ;;  %v3185_v25 = vpop.f32.mrf.mxu0  ;;  %v4172_v61 = vmul.f32 %v4161_v57, %v9866_v52 }
 0x1fa   : > { %v3207_v27 = vadd.f32 %v3185_v25, %v9899_v35  ;;  %v10131_v36 = vpop.f32.mrf.mxu1  ;;  %v4334_v25 = vmul.f32 %v10074_v17, %v4313_v12 }
 0x1fb   : > { %v7165_v56 = vpop.f32.mrf.mxu0 }
 0x1fc   : > { %4977 = vmatmul.mubr.f32.gmra.mxu1 %v4330_v47  ;;  %5257 = vmatmul.mubr.f32.gmra.mxu0 %v4168_v9  ;;  %v10134_v21 = vadd.f32 %v10006_v26, %v3207_v27  ;;  %v7288_v40 = vpop.f32.mrf.mxu1  ;;  %v4339_v56 = vmul.f32 %v10083_v31, %v11908_v29  ;;  %v4177_v47 = vmul.f32 %v4165_v41, %v9871_v50 }
 0x1fd   : > { %4981 = vmatprep.mubr.f32.mxu1 %v4335_v11  ;;  %6597 = vmatprep.mubr.msk.f32.mxu0 %vm4534_vm8, %v4173_v0  ;;  %v3190_v35 = vpop.f32.mrf.mxu0  ;;  %v4338_v0 = vmul.f32 %v10096_v10, %v4313_v12  ;;  %v4176_v29 = vmul.f32 %v4161_v57, %v9891_v60  ;;  %v4181_v40 = vmul.f32 %v4165_v41, %v9896_v38 }
 0x1fe   : > { %v3208_v18 = vadd.f32 %v3190_v35, %v9921_v53  ;;  %v10143_v5 = vpop.f32.mrf.mxu1  ;;  %v4345_v35 = vrot.slane %v11894_v24, %v9116_v33 }
 0x1ff   : > { %v7168_v9 = vpop.f32.mrf.mxu0 }
 0x200   : > { %4982 = vmatmul.mubr.f32.gmra.mxu1 %v4334_v25  ;;  %5262 = vmatmul.mubr.f32.gmra.mxu0 %v4172_v61  ;;  %v10146_v26 = vadd.f32 %v10018_v30, %v3208_v18  ;;  %v7291_v27 = vpop.f32.mrf.mxu1  ;;  %v4197_v30 = vrot.slane %v11887_v4, %v9134_v39  ;;  %v4358_v41 = vmul.f32 %v10034_v43, %v4345_v35 }
 0x201   : > { %4986 = vmatprep.mubr.f32.mxu1 %v4339_v56  ;;  %6598 = vmatprep.mubr.msk.f32.mxu0 %vm4534_vm8, %v4177_v47  ;;  %v3498_v53 = vpop.f32.mrf.mxu0  ;;  %v4180_v47 = vmul.f32 %v4161_v57, %v9916_v22  ;;  %v4193_v4 = vrot.slane %v11889_v34, %v9134_v39  ;;  %v4362_v39 = vmul.f32 %v10052_v55, %v4345_v35 }
 0x202   : > { %v3572_v11 = vadd.f32 %v3498_v53, %v9935_v44  ;;  %v10155_v61 = vpop.f32.mrf.mxu1  ;;  %v11909_v44 = vld [vmem:[#allocation33_spill] sm:$0xff]  ;;  %v4201_v9 = vmul.f32 %v4197_v30, %v9808_v42 }
 0x203   : > { %v7224_v25 = vpop.f32.mrf.mxu0  ;;  %v4200_v34 = vmul.f32 %v4193_v4, %v9836_v62 }
 0x204   : > { %4987 = vmatmul.mubr.f32.gmra.mxu1 %v4338_v0  ;;  %5267 = vmatmul.mubr.f32.gmra.mxu0 %v4176_v29  ;;  %v10160_v18 = vadd.f32 %v10038_v14, %v3572_v11  ;;  %v7294_v56 = vpop.f32.mrf.mxu1  ;;  %v11910_v11 = vld [vmem:[#allocation34_spill] sm:$0xff]  ;;  %v4205_v25 = vmul.f32 %v4197_v30, %v9844_v16 }
 0x205   : > { %4991 = vmatprep.mubr.f32.mxu1 %v11909_v44  ;;  %6599 = vmatprep.mubr.msk.f32.mxu0 %vm4534_vm8, %v4181_v40  ;;  %v3503_v12 = vpop.f32.mrf.mxu0  ;;  %v11911_v29 = vld [vmem:[#allocation30_spill] sm:$0xff] }
 0x206   : > { %v3573_v24 = vadd.f32 %v3503_v12, %v9948_v6  ;;  %v10170_v14 = vpop.f32.mrf.mxu1  ;;  %v4367_v40 = vmul.f32 %v10061_v13, %v11911_v29 }
 0x207   : > { %v7227_v53 = vpop.f32.mrf.mxu0 }
 0x208   : > { %4992 = vmatmul.mubr.f32.gmra.mxu1 %v4358_v41  ;;  %5272 = vmatmul.mubr.f32.gmra.mxu0 %v4180_v47  ;;  %v10173_v27 = vadd.f32 %v10056_v8, %v3573_v24  ;;  %v7297_v0 = vpop.f32.mrf.mxu1  ;;  %v4366_v41 = vmul.f32 %v10074_v17, %v4345_v35  ;;  %v4204_v47 = vmul.f32 %v4193_v4, %v9866_v52 }
 0x209   : > { %4996 = vmatprep.mubr.f32.mxu1 %v11910_v11  ;;  %6600 = vmatprep.mubr.msk.f32.mxu0 %vm4534_vm8, %v4201_v9  ;;  %v3508_v6 = vpop.f32.mrf.mxu0  ;;  %v4371_v9 = vmul.f32 %v10083_v31, %v11911_v29  ;;  %v4209_v53 = vmul.f32 %v4197_v30, %v9871_v50  ;;  %v4370_v0 = vmul.f32 %v10096_v10, %v4345_v35 }
 0x20a   : > { %v3574_v57 = vadd.f32 %v3508_v6, %v9960_v19  ;;  %v10183_v8 = vpop.f32.mrf.mxu1  ;;  %v4213_v29 = vmul.f32 %v4197_v30, %v9896_v38  ;;  %v4212_v30 = vmul.f32 %v4193_v4, %v9916_v22 }
 0x20b   : > { %v7230_v44 = vpop.f32.mrf.mxu0 }
 0x20c   : > { %4997 = vmatmul.mubr.f32.gmra.mxu1 %v4362_v39  ;;  %5277 = vmatmul.mubr.f32.gmra.mxu0 %v4200_v34  ;;  %v10186_v12 = vadd.f32 %v10078_v23, %v3574_v57  ;;  %v7300_v56 = vpop.f32.mrf.mxu1  ;;  %v4208_v57 = vmul.f32 %v4193_v4, %v9891_v60  ;;  %v11912_v44 = vld [vmem:[#allocation38_spill] sm:$0xff] }
 0x20d   : > { %5001 = vmatprep.mubr.f32.mxu1 %v4367_v40  ;;  %6601 = vmatprep.mubr.msk.f32.mxu0 %vm4534_vm8, %v4205_v25  ;;  %v3513_v19 = vpop.f32.mrf.mxu0  ;;  %v4229_v40 = vrot.slane %v8864_v1, %v11886_v51  ;;  %v11913_v56 = vld [vmem:[#allocation36_spill] sm:$0xff] }
 0x20e   : > { %v3575_v24 = vadd.f32 %v3513_v19, %v9974_v32  ;;  %v10195_v23 = vpop.f32.mrf.mxu1 }
 0x20f   : > { %v7233_v11 = vpop.f32.mrf.mxu0 }
 0x210   : > { %5002 = vmatmul.mubr.f32.gmra.mxu1 %v4366_v41  ;;  %5282 = vmatmul.mubr.f32.gmra.mxu0 %v4204_v47  ;;  %v10198_v6 = vadd.f32 %v10100_v58, %v3575_v24  ;;  %v7303_v39 = vpop.f32.mrf.mxu1  ;;  %v11914_v41 = vld [vmem:[#allocation7_spill] sm:$0xff] }
 0x211   : > { %5006 = vmatprep.mubr.f32.mxu1 %v4371_v9  ;;  %6602 = vmatprep.mubr.msk.f32.mxu0 %vm4534_vm8, %v4209_v53  ;;  %v3518_v32 = vpop.f32.mrf.mxu0  ;;  %v4225_v47 = vrot.slane %v11914_v41, %v11886_v51  ;;  %v4233_v53 = vmul.f32 %v4229_v40, %v9808_v42  ;;  %v4394_v51 = vmul.f32 %v10052_v55, %v11913_v56 }
 0x212   : > { %v3576_v34 = vadd.f32 %v3518_v32, %v9987_v15  ;;  %v10207_v25 = vpop.f32.mrf.mxu1  ;;  %v4390_v15 = vmul.f32 %v10034_v43, %v11913_v56 }
 0x213   : > { %v7236_v58 = vpop.f32.mrf.mxu0 }
 0x214   : > { %5007 = vmatmul.mubr.f32.gmra.mxu1 %v4370_v0  ;;  %5287 = vmatmul.mubr.f32.gmra.mxu0 %v4208_v57  ;;  %v10212_v35 = vadd.f32 %v10118_v63, %v3576_v34  ;;  %v7306_v24 = vpop.f32.mrf.mxu1  ;;  %v11915_v63 = vld [vmem:[#allocation39_spill] sm:$0xff]  ;;  %v4237_v58 = vmul.f32 %v4229_v40, %v9844_v16 }
 0x215   : > { %5011 = vmatprep.mubr.f32.mxu1 %v11912_v44  ;;  %6603 = vmatprep.mubr.msk.f32.mxu0 %vm4534_vm8, %v4213_v29  ;;  %v3523_v19 = vpop.f32.mrf.mxu0  ;;  %v11916_v34 = vld [vmem:[#allocation35_spill] sm:$0xff] }
 0x216   : > { %v3577_v9 = vadd.f32 %v3523_v19, %v10000_v37  ;;  %v10221_v32 = vpop.f32.mrf.mxu1  ;;  %v4232_v37 = vmul.f32 %v4225_v47, %v9836_v62  ;;  %v4399_v29 = vmul.f32 %v10061_v13, %v11916_v34 }
 0x217   : > { %v7239_v11 = vpop.f32.mrf.mxu0 }
 0x218   : > { %5012 = vmatmul.mubr.f32.gmra.mxu1 %v4390_v15  ;;  %5292 = vmatmul.mubr.f32.gmra.mxu0 %v4212_v30  ;;  %v10226_v0 = vadd.f32 %v10131_v36, %v3577_v9  ;;  %v7309_v57 = vpop.f32.mrf.mxu1  ;;  %v4236_v30 = vmul.f32 %v4225_v47, %v9866_v52  ;;  %v4241_v11 = vmul.f32 %v4229_v40, %v9871_v50 }
 0x219   : > { %5016 = vmatprep.mubr.f32.mxu1 %v11915_v63  ;;  %6604 = vmatprep.mubr.msk.f32.mxu0 %vm4534_vm8, %v4233_v53  ;;  %v3528_v4 = vpop.f32.mrf.mxu0  ;;  %v4403_v53 = vmul.f32 %v10083_v31, %v11916_v34  ;;  %v4240_v57 = vmul.f32 %v4225_v47, %v9891_v60 }
 0x21a   : > { %v3578_v39 = vadd.f32 %v3528_v4, %v10012_v48  ;;  %v10235_v19 = vpop.f32.mrf.mxu1  ;;  %v4398_v48 = vmul.f32 %v10074_v17, %v11913_v56 }
 0x21b   : > { %v7242_v44 = vpop.f32.mrf.mxu0 }
 0x21c   : > { %5017 = vmatmul.mubr.f32.gmra.mxu1 %v4394_v51  ;;  %5297 = vmatmul.mubr.f32.gmra.mxu0 %v4232_v37  ;;  %v10239_v36 = vadd.f32 %v10143_v5, %v3578_v39  ;;  %v7312_v24 = vpop.f32.mrf.mxu1  ;;  %v11917_v51 = vld [vmem:[#allocation13_spill] sm:$0xff] }
 0x21d   : > { %5021 = vmatprep.mubr.f32.mxu1 %v4399_v29  ;;  %6605 = vmatprep.mubr.msk.f32.mxu0 %vm4534_vm8, %v4237_v58  ;;  %v3533_v15 = vpop.f32.mrf.mxu0  ;;  %v4409_v37 = vrot.slane %v11917_v51, %v8784_v54  ;;  %v4245_v29 = vmul.f32 %v4229_v40, %v9896_v38  ;;  %v4261_v58 = vrot.slane %v8864_v1, %v11895_v20 }
 0x21e   : > { %v3579_v9 = vadd.f32 %v3533_v15, %v10026_v7  ;;  %v10248_v4 = vpop.f32.mrf.mxu1  ;;  %v4402_v7 = vmul.f32 %v10096_v10, %v11913_v56 }
 0x21f   : > { %v7245_v63 = vpop.f32.mrf.mxu0  ;;  %v4422_v56 = vmul.f32 %v10034_v43, %v4409_v37 }
 0x220   : > { %5022 = vmatmul.mubr.f32.gmra.mxu1 %v4398_v48  ;;  %5302 = vmatmul.mubr.f32.gmra.mxu0 %v4236_v30  ;;  %v10252_v5 = vadd.f32 %v10155_v61, %v3579_v9  ;;  %v7315_v39 = vpop.f32.mrf.mxu1  ;;  %v11918_v61 = vld [vmem:[#allocation41_spill] sm:$0xff]  ;;  %v4244_v48 = vmul.f32 %v4225_v47, %v9916_v22  ;;  %v4257_v30 = vrot.slane %v11914_v41, %v11895_v20 }
 0x221   : > { %5026 = vmatprep.mubr.f32.mxu1 %v4403_v53  ;;  %6606 = vmatprep.mubr.msk.f32.mxu0 %vm4534_vm8, %v4241_v11  ;;  %v11920_v11 = vld [vmem:[#allocation44_spill] sm:$0xff]  ;;  %v4426_v20 = vmul.f32 %v10052_v55, %v4409_v37  ;;  %v11921_v39 = vld [vmem:[#allocation37_spill] sm:$0xff] }
 0x223   : > { %v3538_v34 = vpop.f32.mrf.mxu0 }
 0x224   : > { %v3580_v44 = vadd.f32 %v3538_v34, %v10044_v49  ;;  %5027 = vmatmul.mubr.f32.gmra.mxu1 %v4402_v7  ;;  %5307 = vmatmul.mubr.f32.gmra.mxu0 %v4240_v57  ;;  %v4265_v49 = vmul.f32 %v4261_v58, %v9808_v42  ;;  %v4269_v34 = vmul.f32 %v4261_v58, %v9844_v16 }
 0x225   : > { %5031 = vmatprep.mubr.f32.mxu1 %v11918_v61  ;;  %6607 = vmatprep.mubr.msk.f32.mxu0 %vm4534_vm8, %v4245_v29  ;;  %v7248_v15 = vpop.f32.mrf.mxu0 }
 0x226   : > { %v10270_v40 = vadd.f32 %v10170_v14, %v3580_v44  ;;  %v10274_v53 = vpop.f32.mrf.mxu1  ;;  %v4264_v14 = vmul.f32 %v4257_v30, %v9836_v62 }
 0x227   : > { %v3543_v24 = vpop.f32.mrf.mxu0  ;;  %11919 = vst [vmem:[#allocation3_spill] sm:$0xff] %v10274_v53 }
 0x228   : > { %v3581_v9 = vadd.f32 %v3543_v24, %v10067_v28  ;;  %5032 = vmatmul.mubr.f32.gmra.mxu1 %v4422_v56  ;;  %5312 = vmatmul.mubr.f32.gmra.mxu0 %v4244_v48  ;;  %v4795_v63 = vpop.f32.mrf.mxu1  ;;  %v4431_v28 = vmul.f32 %v10061_v13, %v11921_v39  ;;  %v4268_v56 = vmul.f32 %v4257_v30, %v9866_v52 }
 0x229   : > { %5036 = vmatprep.mubr.f32.mxu1 %v11920_v11  ;;  %6608 = vmatprep.mubr.msk.f32.mxu0 %vm4534_vm8, %v4265_v49  ;;  %v7251_v47 = vpop.f32.mrf.mxu0  ;;  %v4273_v49 = vmul.f32 %v4261_v58, %v9871_v50 }
 0x22a   : > { %v10281_v7 = vadd.f32 %v10183_v8, %v3581_v9  ;;  %v10287_v44 = vpop.f32.mrf.mxu1  ;;  %v4430_v8 = vmul.f32 %v10074_v17, %v4409_v37 }
 0x22b   : > { %v3548_v57 = vpop.f32.mrf.mxu0  ;;  %11922 = vst [vmem:[#allocation4_spill] sm:$0xff] %v10287_v44 }
 0x22c   : > { %v3582_v29 = vadd.f32 %v3548_v57, %v10089_v59  ;;  %5037 = vmatmul.mubr.f32.gmra.mxu1 %v4426_v20  ;;  %5317 = vmatmul.mubr.f32.gmra.mxu0 %v4264_v14  ;;  %v4800_v15 = vpop.f32.mrf.mxu1  ;;  %v4435_v59 = vmul.f32 %v10083_v31, %v11921_v39  ;;  %v4434_v20 = vmul.f32 %v10096_v10, %v4409_v37 }
 0x22d   : > { %5041 = vmatprep.mubr.f32.mxu1 %v4431_v28  ;;  %6609 = vmatprep.mubr.msk.f32.mxu0 %vm4534_vm8, %v4269_v34  ;;  %v7254_v61 = vpop.f32.mrf.mxu0  ;;  %v4272_v14 = vmul.f32 %v4257_v30, %v9891_v60  ;;  %v4277_v39 = vmul.f32 %v4261_v58, %v9896_v38  ;;  %v4293_v28 = vrot.slane %v8864_v1, %v11902_v46 }
 0x22e   : > { %v10293_v48 = vadd.f32 %v10195_v23, %v3582_v29  ;;  %v10299_v11 = vpop.f32.mrf.mxu1  ;;  %v4441_v23 = vrot.slane %v11917_v51, %v8799_v3  ;;  %v11925_v61 = vld [vmem:[#allocation45_spill] sm:$0xff]  ;;  %v4289_v58 = vrot.slane %v11914_v41, %v11902_v46 }
 0x22f   : > { %v3553_v24 = vpop.f32.mrf.mxu0  ;;  %11923 = vst [vmem:[#allocation40_spill] sm:$0xff] %v10299_v11 }
 0x230   : > { %v3583_v9 = vadd.f32 %v3553_v24, %v10108_v2  ;;  %5042 = vmatmul.mubr.f32.gmra.mxu1 %v4430_v8  ;;  %5322 = vmatmul.mubr.f32.gmra.mxu0 %v4268_v56  ;;  %v4805_v63 = vpop.f32.mrf.mxu1  ;;  %v4276_v8 = vmul.f32 %v4257_v30, %v9916_v22  ;;  %v4297_v24 = vmul.f32 %v4293_v28, %v9808_v42 }
 0x231   : > { %5046 = vmatprep.mubr.f32.mxu1 %v4435_v59  ;;  %6610 = vmatprep.mubr.msk.f32.mxu0 %vm4534_vm8, %v4273_v49  ;;  %v7257_v47 = vpop.f32.mrf.mxu0  ;;  %v4458_v63 = vmul.f32 %v10052_v55, %v4441_v23 }
 0x232   : > { %v10307_v57 = vadd.f32 %v10207_v25, %v3583_v9  ;;  %v10313_v29 = vpop.f32.mrf.mxu1  ;;  %v4454_v25 = vmul.f32 %v10034_v43, %v4441_v23  ;;  %v11927_v9 = vld [vmem:[#allocation47_spill] sm:$0xff] }
 0x233   : > { %v3558_v2 = vpop.f32.mrf.mxu0  ;;  %11924 = vst [vmem:[#allocation10_spill] sm:$0xff] %v10313_v29 }
 0x234   : > { %v3584_v34 = vadd.f32 %v3558_v2, %v10121_v45  ;;  %5047 = vmatmul.mubr.f32.gmra.mxu1 %v4434_v20  ;;  %5327 = vmatmul.mubr.f32.gmra.mxu0 %v4272_v14  ;;  %v4810_v15 = vpop.f32.mrf.mxu1  ;;  %v11928_v14 = vld [vmem:[#allocation42_spill] sm:$0xff]  ;;  %v4301_v2 = vmul.f32 %v4293_v28, %v9844_v16 }
 0x235   : > { %5051 = vmatprep.mubr.f32.mxu1 %v11925_v61  ;;  %6611 = vmatprep.mubr.msk.f32.mxu0 %vm4534_vm8, %v4277_v39  ;;  %v7260_v37 = vpop.f32.mrf.mxu0  ;;  %v4467_v16 = vmul.f32 %v10083_v31, %v11928_v14 }
 0x236   : > { %v10322_v56 = vadd.f32 %v10221_v32, %v3584_v34  ;;  %v4296_v32 = vmul.f32 %v4289_v58, %v9836_v62  ;;  %v4300_v37 = vmul.f32 %v4289_v58, %v9866_v52 }
 0x237   : > { %v3563_v45 = vpop.f32.mrf.mxu0  ;;  %v10326_v49 = vpop.f32.mrf.mxu1 }
 0x238   : > { %v3585_v59 = vadd.f32 %v3563_v45, %v10134_v21  ;;  %11926 = vst [vmem:[#allocation6_spill] sm:$0xff] %v10326_v49  ;;  %5052 = vmatmul.mubr.f32.gmra.mxu1 %v4454_v25  ;;  %5332 = vmatmul.mubr.f32.gmra.mxu0 %v4276_v8  ;;  %v4463_v21 = vmul.f32 %v10061_v13, %v11928_v14 }
 0x239   : > { %5056 = vmatprep.mubr.f32.mxu1 %v11927_v9  ;;  %6612 = vmatprep.mubr.msk.f32.mxu0 %vm4534_vm8, %v4297_v24  ;;  %v7263_v30 = vpop.f32.mrf.mxu0  ;;  %v4815_v47 = vpop.f32.mrf.mxu1  ;;  %v4473_v45 = vrot.slane %v11917_v51, %v11902_v46 }
 0x23a   : > { %v10333_v20 = vadd.f32 %v10235_v19, %v3585_v59  ;;  %v4462_v19 = vmul.f32 %v10074_v17, %v4441_v23  ;;  %v4304_v59 = vmul.f32 %v4289_v58, %v9891_v60  ;;  %v4309_v47 = vmul.f32 %v4293_v28, %v9896_v38  ;;  %v11933_v38 = vld [vmem:[#allocation48_spill] sm:$0xff] }
 0x23b   : > { %v3568_v42 = vpop.f32.mrf.mxu0  ;;  %v10339_v34 = vpop.f32.mrf.mxu1 }
 0x23c   : > { %v3586_v39 = vadd.f32 %v3568_v42, %v10146_v26  ;;  %11929 = vst [vmem:[#allocation16_spill] sm:$0xff] %v10339_v34  ;;  %5057 = vmatmul.mubr.f32.gmra.mxu1 %v4458_v63  ;;  %5337 = vmatmul.mubr.f32.gmra.mxu0 %v4296_v32  ;;  %v4305_v26 = vmul.f32 %v4293_v28, %v9871_v50  ;;  %v11931_v63 = vld [vmem:[#allocation25_spill] sm:$0xff]  ;;  %v10366_v42 = vld [vmem:[%s11714_s5] ss:$0 sm:$0xff] }
 0x23d   : > { %5061 = vmatprep.mubr.f32.mxu1 %v4463_v21  ;;  %6613 = vmatprep.mubr.msk.f32.mxu0 %vm4534_vm8, %v4301_v2  ;;  %v7266_v61 = vpop.f32.mrf.mxu0  ;;  %v4820_v62 = vpop.f32.mrf.mxu1  ;;  %v10361_v32 = vrot.slane %v8864_v1, %v11931_v63  ;;  %v4486_v28 = vmul.f32 %v10034_v43, %v4473_v45  ;;  %v10380_v2 = vrot.slane %v11914_v41, %v11931_v63 }
 0x23e   : > { %v10345_v15 = vadd.f32 %v10248_v4, %v3586_v39  ;;  %v4466_v4 = vmul.f32 %v10096_v10, %v4441_v23  ;;  %v4308_v61 = vmul.f32 %v4289_v58, %v9916_v22  ;;  %v11935_v62 = vld [vmem:[#allocation46_spill] sm:$0xff]  ;;  %v10402_v22 = vld [vmem:[%s11715_s6 + $0x38] sm:$0xff] }
 0x23f   : > { %v3836_v25 = vpop.f32.mrf.mxu0  ;;  %v10350_v8 = vpop.f32.mrf.mxu1  ;;  %v4333_v58 = vmul.f32 %v10402_v22, %v10361_v32 }
 0x240   : > { %11930 = vst [vmem:[#allocation5_spill] sm:$0xff] %v10350_v8  ;;  %5062 = vmatmul.mubr.f32.gmra.mxu1 %v4462_v19  ;;  %5342 = vmatmul.mubr.f32.gmra.mxu0 %v4300_v37  ;;  %v3910_v9 = vadd.f32 %v3836_v25, %v10160_v18  ;;  %v10373_v18 = vrot.slane %v11917_v51, %v11931_v63 }
 0x241   : > { %5066 = vmatprep.mubr.f32.mxu1 %v4467_v16  ;;  %6614 = vmatprep.mubr.msk.f32.mxu0 %vm4534_vm8, %v4305_v26  ;;  %v7322_v52 = vpop.f32.mrf.mxu0  ;;  %v4825_v24 = vpop.f32.mrf.mxu1  ;;  %v4490_v51 = vmul.f32 %v10052_v55, %v4473_v45  ;;  %v4495_v19 = vmul.f32 %v10061_v13, %v11935_v62  ;;  %v10395_v16 = vld [vmem:[%s11715_s6 + $0x18] sm:$0xff] }
 0x242   : > { %v10390_v37 = vadd.f32 %v10366_v42, %v3910_v9  ;;  %v4329_v26 = vmul.f32 %v10395_v16, %v10361_v32  ;;  %v4494_v52 = vmul.f32 %v10074_v17, %v4473_v45  ;;  %v4337_v9 = vmul.f32 %v10361_v32, %v9871_v50 }
 0x243   : > { %v3841_v30 = vpop.f32.mrf.mxu0  ;;  %v10369_v21 = vpop.f32.mrf.mxu1 }
 0x244   : > { %v3911_v14 = vadd.f32 %v3841_v30, %v10173_v27  ;;  %11932 = vst [vmem:[#allocation43_spill] sm:$0xff] %v10369_v21  ;;  %5067 = vmatmul.mubr.f32.gmra.mxu1 %v4466_v4  ;;  %5347 = vmatmul.mubr.f32.gmra.mxu0 %v4304_v59  ;;  %v4499_v59 = vmul.f32 %v10083_v31, %v11935_v62  ;;  %v11937_v30 = vld [vmem:[#allocation50_spill] sm:$0xff]  ;;  %v5507_v53 = vrot.slane %v10390_v37, 1 }
 0x245   : > { %5071 = vmatprep.mubr.f32.mxu1 %v11933_v38  ;;  %6615 = vmatprep.mubr.msk.f32.mxu0 %vm4534_vm8, %v4309_v47  ;;  %v7325_v23 = vpop.f32.mrf.mxu0  ;;  %v4830_v39 = vpop.f32.mrf.mxu1  ;;  %v10426_v38 = vld [vmem:[%s11715_s6 + $0x30] sm:$0xff]  ;;  %v4498_v62 = vmul.f32 %v10096_v10, %v4473_v45 }
 0x246   : > { %v10383_v27 = vadd.f32 %v10366_v42, %v3911_v14  ;;  %v10419_v14 = vld [vmem:[%s11715_s6 + $0x10] sm:$0xff]  ;;  %v4332_v50 = vmul.f32 %v10426_v38, %v10380_v2 }
 0x247   : > { %v3846_v25 = vpop.f32.mrf.mxu0  ;;  %v10408_v4 = vpop.f32.mrf.mxu1 }
 0x248   : > { %11934 = vst [vmem:[#allocation15_spill] sm:$0xff] %v10383_v27  ;;  %v3912_v24 = vadd.f32 %v3846_v25, %v10186_v12  ;;  %11936 = vst [vmem:[#allocation17_spill] sm:$0xff] %v10408_v4  ;;  %5072 = vmatmul.mubr.f32.gmra.mxu1 %v4486_v28  ;;  %5352 = vmatmul.mubr.f32.gmra.mxu0 %v4308_v61  ;;  %v4328_v12 = vmul.f32 %v10419_v14, %v10380_v2  ;;  %v5508_v28 = vrot.slane %v10383_v27, 1 }
 0x249   : > { %5076 = vmatprep.mubr.f32.mxu1 %v11937_v30  ;;  %6616 = vmatprep.mubr.msk.f32.mxu0 %vm4534_vm8, %v4329_v26  ;;  %v7328_v47 = vpop.f32.mrf.mxu0  ;;  %v4835_v61 = vpop.f32.mrf.mxu1  ;;  %v4336_v25 = vmul.f32 %v10380_v2, %v9891_v60  ;;  %v5609_v30 = vrot.slane %v10390_v37, 3  ;;  %v5692_v23 = vrot.slane %v10383_v27, 5  ;;  %v11939_v29 = vrot.slane %v10383_v27, 3 }
 0x24a   : > { %v10433_v39 = vadd.f32 %v10366_v42, %v3912_v24  ;;  %v5794_v47 = vrot.slane %v10383_v27, 7 }
 0x24b   : > { %v3851_v26 = vpop.f32.mrf.mxu0  ;;  %v5611_v49 = vsel %vm5608_vm9, %v5609_v30, %v11939_v29 }
 0x24c   : > { %v3913_v44 = vadd.f32 %v3851_v26, %v10198_v6  ;;  %v10443_v24 = vpop.f32.mrf.mxu1  ;;  %5077 = vmatmul.mubr.f32.gmra.mxu1 %v4490_v51  ;;  %5357 = vmatmul.mubr.f32.gmra.mxu0 %v4328_v12  ;;  %v5795_v45 = vrot.slane %v10433_v39, 7  ;;  %v5693_v61 = vrot.slane %v10433_v39, 5  ;;  %v5744_v60 = vrot.slane %v10433_v39, 6 }
 0x24d   : > { %11938 = vst [vmem:[#allocation14_spill] sm:$0xff] %v10443_v24  ;;  %5081 = vmatprep.mubr.f32.mxu1 %v4495_v19  ;;  %6617 = vmatprep.mubr.msk.f32.mxu0 %vm4534_vm8, %v4333_v58  ;;  %v7331_v11 = vpop.f32.mrf.mxu0  ;;  %v5509_v6 = vsel %vm470_vm1, %v5507_v53, %v5508_v28  ;;  %v5558_v26 = vrot.slane %v10383_v27, 2  ;;  %v5743_v51 = vrot.slane %v10383_v27, 6  ;;  %v10464_v53 = vld [vmem:[%s11715_s6 + $0x78] sm:$0xff] }
 0x24e   : > { %v10456_v12 = vadd.f32 %v10366_v42, %v3913_v44  ;;  %v4840_v34 = vpop.f32.mrf.mxu1  ;;  %v5796_v8 = vsel %vm1204_vm4, %v5794_v47, %v5795_v45  ;;  %v5694_v19 = vsel %vm1769_vm6, %v5692_v23, %v5693_v61  ;;  %v5510_v11 = vrot.slane %v10433_v39, 1 }
 0x24f   : > { %v3856_v58 = vpop.f32.mrf.mxu0  ;;  %v7391_v21 = vpack.i.bf16 %v5611_v49, %v5796_v8  ;;  %v7381_v4 = vpack.i.bf16 %v5509_v6, %v5694_v19  ;;  %v4341_v29 = vmul.f32 %v10464_v53, %v10361_v32  ;;  %v5557_v44 = vrot.slane %v10390_v37, 2 }
 0x250   : > { %11940 = vst [vmem:[#allocation12_spill] sm:$0xff] %v10456_v12  ;;  %v3914_v34 = vadd.f32 %v3856_v58, %v10212_v35  ;;  %v10470_v30 = vpop.f32.mrf.mxu1  ;;  %5082 = vmatmul.mubr.f32.gmra.mxu1 %v4494_v52  ;;  %5362 = vmatmul.mubr.f32.gmra.mxu0 %v4332_v50  ;;  %v5745_v23 = vsel %vm1012_vm3, %v5743_v51, %v5744_v60  ;;  %v5695_v49 = vrot.slane %v10456_v12, 5  ;;  %v5746_v8 = vrot.slane %v10456_v12, 6 }
 0x251   : > { %11941 = vst [vmem:[#allocation11_spill] sm:$0xff] %v10470_v30  ;;  %5086 = vmatprep.mubr.f32.mxu1 %v4499_v59  ;;  %6618 = vmatprep.mubr.msk.f32.mxu0 %vm4534_vm8, %v4337_v9  ;;  %v7334_v47 = vpop.f32.mrf.mxu0  ;;  %v5559_v32 = vsel %vm821_vm2, %v5557_v44, %v5558_v26  ;;  %v4518_v6 = vmul.f32 %v10034_v43, %v10373_v18  ;;  %v5560_v35 = vrot.slane %v10433_v39, 2  ;;  %v5797_v52 = vrot.slane %v10456_v12, 7 }
 0x252   : > { %v10482_v50 = vadd.f32 %v10366_v42, %v3914_v34  ;;  %7392 = vrot.lane.b32.xlu1 %v7391_v21, %s7614_s25  ;;  %7382 = vrot.lane.b32.xlu0 %v7381_v4, %s7615_s26  ;;  %v4845_v59 = vpop.f32.mrf.mxu1  ;;  %v5511_v9 = vsel %vm470_vm1, %v5508_v28, %v5510_v11  ;;  %v5696_v43 = vsel %vm1769_vm6, %v5693_v61, %v5695_v49  ;;  %v5612_v51 = vrot.slane %v10433_v39, 3  ;;  %v10494_v34 = vld [vmem:[%s11715_s6 + $0x70] sm:$0xff] }
 0x253   : > { %v3861_v19 = vpop.f32.mrf.mxu0  ;;  %v7386_v58 = vpack.i.bf16 %v5559_v32, %v5745_v23  ;;  %v7396_v44 = vpack.i.bf16 %v5511_v9, %v5696_v43  ;;  %v4340_v21 = vmul.f32 %v10494_v34, %v10380_v2  ;;  %v10500_v4 = vrot.slane %v8864_v1, %v9116_v33  ;;  %v11943_v59 = vld [vmem:[#allocation51_spill] sm:$0xff] }
 0x254   : > { %11942 = vst [vmem:[#allocation20_spill] sm:$0xff] %v10482_v50  ;;  %v3915_v28 = vadd.f32 %v3861_v19, %v10226_v0  ;;  %v10503_v61 = vpop.f32.mrf.mxu1  ;;  %5087 = vmatmul.mubr.f32.gmra.mxu1 %v4498_v62  ;;  %5367 = vmatmul.mubr.f32.gmra.mxu0 %v4336_v25  ;;  %v5747_v23 = vsel %vm1012_vm3, %v5744_v60, %v5746_v8  ;;  %v5748_v32 = vrot.slane %v10482_v50, 6  ;;  %v5697_v25 = vrot.slane %v10482_v50, 5 }
 0x255   : > { %v5798_v47 = vsel %vm1204_vm4, %v5795_v45, %v5797_v52  ;;  %5091 = vmatprep.mubr.f32.mxu1 %v11943_v59  ;;  %6619 = vmatprep.mubr.msk.f32.mxu0 %vm4534_vm8, %v4341_v29  ;;  %v7337_v1 = vpop.f32.mrf.mxu0  ;;  %v5561_v2 = vsel %vm821_vm2, %v5558_v26, %v5560_v35  ;;  %v4522_v0 = vmul.f32 %v10052_v55, %v10373_v18  ;;  %v11945_v26 = vrot.slane %v10383_v27, 3 }
 0x256   : > { %v10517_v62 = vrot.slane %v11914_v41, %v9116_v33  ;;  %v10521_v45 = vadd.f32 %v10366_v42, %v3915_v28  ;;  %7387 = vrot.lane.b32.xlu0 %v7386_v58, %s7616_s29  ;;  %7397 = vrot.lane.b32.xlu1 %v7396_v44, %s7615_s26  ;;  %v4850_v60 = vpop.f32.mrf.mxu1  ;;  %v5562_v33 = vrot.slane %v10456_v12, 2  ;;  %v5512_v41 = vrot.slane %v10456_v12, 1 }
 0x257   : > { %v5613_v55 = vsel %vm5608_vm9, %v11945_v26, %v5612_v51  ;;  %v3866_v29 = vpop.f32.mrf.mxu0  ;;  %v4361_v9 = vmul.f32 %v10395_v16, %v10500_v4  ;;  %v7401_v43 = vpack.i.bf16 %v5561_v2, %v5747_v23  ;;  %v5799_v58 = vrot.slane %v10482_v50, 7  ;;  %v11946_v26 = vld [vmem:[#allocation52_spill] sm:$0xff] }
 0x258   : > { %11944 = vst [vmem:[#allocation21_spill] sm:$0xff] %v10521_v45  ;;  %v7406_v19 = vpack.i.bf16 %v5613_v55, %v5798_v47  ;;  %v3916_v44 = vadd.f32 %v3866_v29, %v10239_v36  ;;  %v10536_v28 = vpop.f32.mrf.mxu1  ;;  %5092 = vmatmul.mubr.f32.gmra.mxu1 %v4518_v6  ;;  %5372 = vmatmul.mubr.f32.gmra.mxu0 %v4340_v21  ;;  %v5699_v60 = vrot.slane %v10521_v45, 5  ;;  %v11947_v47 = vld [vmem:[#allocation49_spill] sm:$0xff]  ;;  %v5614_v55 = vrot.slane %v10456_v12, 3 }
 0x259   : > { %v5749_v59 = vsel %vm1012_vm3, %v5746_v8, %v5748_v32  ;;  %v5698_v1 = vsel %vm1769_vm6, %v5695_v49, %v5697_v25  ;;  %5096 = vmatprep.mubr.f32.mxu1 %v11946_v26  ;;  %6620 = vmatprep.mubr.msk.f32.mxu0 %vm4534_vm8, %v4361_v9  ;;  %v7340_v23 = vpop.f32.mrf.mxu0  ;;  %v4360_v36 = vmul.f32 %v10419_v14, %v10517_v62 }
 0x25a   : > { %v4527_v6 = vmul.f32 %v10061_v13, %v11947_v47  ;;  %v4365_v21 = vmul.f32 %v10402_v22, %v10500_v4  ;;  %7402 = vrot.lane.b32.xlu0 %v7401_v43, %s7616_s29  ;;  %7407 = vrot.lane.b32.xlu1 %v7406_v19, %s7614_s25  ;;  %v4855_v49 = vpop.f32.mrf.mxu1  ;;  %v5563_v8 = vsel %vm821_vm2, %v5560_v35, %v5562_v33  ;;  %v5514_v13 = vrot.slane %v10482_v50, 1 }
 0x25b   : > { %v5513_v2 = vsel %vm470_vm1, %v5510_v11, %v5512_v41  ;;  %v3871_v29 = vpop.f32.mrf.mxu0  ;;  %v7416_v9 = vpack.i.bf16 %v5563_v8, %v5749_v59  ;;  %v5800_v43 = vsel %vm1204_vm4, %v5797_v52, %v5799_v58  ;;  %v5750_v19 = vrot.slane %v10521_v45, 6 }
 0x25c   : > { %v7411_v26 = vpack.i.bf16 %v5513_v2, %v5698_v1  ;;  %v10566_v23 = vadd.f32 %v10366_v42, %v3916_v44  ;;  %v3917_v35 = vadd.f32 %v3871_v29, %v10252_v5  ;;  %v10569_v49 = vpop.f32.mrf.mxu1  ;;  %5097 = vmatmul.mubr.f32.gmra.mxu1 %v4522_v0  ;;  %5377 = vmatmul.mubr.f32.gmra.mxu0 %v4360_v36  ;;  %v5801_v59 = vrot.slane %v10521_v45, 7 }
 0x25d   : > { %v5700_v11 = vsel %vm1769_vm6, %v5697_v25, %v5699_v60  ;;  %5101 = vmatprep.mubr.f32.mxu1 %v4527_v6  ;;  %6621 = vmatprep.mubr.msk.f32.mxu0 %vm4534_vm8, %v4365_v21  ;;  %v7343_v52 = vpop.f32.mrf.mxu0  ;;  %v4526_v44 = vmul.f32 %v10074_v17, %v10373_v18  ;;  %v4364_v5 = vmul.f32 %v10426_v38, %v10517_v62  ;;  %v5564_v17 = vrot.slane %v10482_v50, 2 }
 0x25e   : > { %11948 = vst [vmem:[#allocation18_spill] sm:$0xff] %v10566_v23  ;;  %v4531_v0 = vmul.f32 %v10083_v31, %v11947_v47  ;;  %7417 = vrot.lane.b32.xlu1 %v7416_v9, %s7616_s29  ;;  %7412 = vrot.lane.b32.xlu0 %v7411_v26, %s7615_s26  ;;  %v4860_v25 = vpop.f32.mrf.mxu1  ;;  %v5615_v1 = vsel %vm5608_vm9, %v5612_v51, %v5614_v55  ;;  %v5616_v6 = vrot.slane %v10482_v50, 3  ;;  %v10595_v31 = vld [vmem:[%s11715_s6 + $0x58] sm:$0xff]  ;;  %v11769_v26 = vrot.slane %v10566_v23, 6 }
 0x25f   : > { %v5515_v36 = vsel %vm470_vm1, %v5512_v41, %v5514_v13  ;;  %v3876_v21 = vpop.f32.mrf.mxu0  ;;  %v4369_v47 = vmul.f32 %v10595_v31, %v10500_v4  ;;  %v7421_v8 = vpack.i.bf16 %v5615_v1, %v5800_v43  ;;  %v5751_v51 = vsel %vm1012_vm3, %v5748_v32, %v5750_v19 }
 0x260   : > { %v7426_v2 = vpack.i.bf16 %v5515_v36, %v5700_v11  ;;  %v10603_v41 = vadd.f32 %v10366_v42, %v3917_v35  ;;  %v10605_v29 = vpop.f32.mrf.mxu1  ;;  %5102 = vmatmul.mubr.f32.gmra.mxu1 %v4526_v44  ;;  %5382 = vmatmul.mubr.f32.gmra.mxu0 %v4364_v5  ;;  %v5802_v9 = vsel %vm1204_vm4, %v5799_v58, %v5801_v59  ;;  %v5701_v43 = vrot.slane %v10566_v23, 5  ;;  %v10618_v35 = vld [vmem:[%s11715_s6 + $0x50] sm:$0xff] }
 0x261   : > { %5106 = vmatprep.mubr.f32.mxu1 %v4531_v0  ;;  %6622 = vmatprep.mubr.msk.f32.mxu0 %vm4534_vm8, %v4369_v47  ;;  %v7346_v11 = vpop.f32.mrf.mxu0  ;;  %v4530_v32 = vmul.f32 %v10096_v10, %v10373_v18  ;;  %v4368_v52 = vmul.f32 %v10618_v35, %v10517_v62  ;;  %v5565_v44 = vsel %vm821_vm2, %v5562_v33, %v5564_v17  ;;  %v11767_v18 = vrot.slane %v10521_v45, 2 }
 0x262   : > { %11949 = vst [vmem:[#allocation22_spill] sm:$0xff] %v10603_v41  ;;  %7422 = vrot.lane.b32.xlu0 %v7421_v8, %s7614_s25  ;;  %7427 = vrot.lane.b32.xlu1 %v7426_v2, %s7615_s26  ;;  %v4865_v58 = vpop.f32.mrf.mxu1  ;;  %v5617_v10 = vsel %vm5608_vm9, %v5614_v55, %v5616_v6  ;;  %v5516_v5 = vrot.slane %v10521_v45, 1  ;;  %v4373_v25 = vmul.f32 %v10464_v53, %v10500_v4  ;;  %v5803_v47 = vrot.slane %v10566_v23, 7 }
 0x263   : > { %v3881_v0 = vpop.f32.mrf.mxu0  ;;  %v7431_v1 = vpack.i.bf16 %v5565_v44, %v5751_v51  ;;  %v7436_v36 = vpack.i.bf16 %v5617_v10, %v5802_v9  ;;  %v3918_v8 = vadd.f32 %v3876_v21, %v10270_v40  ;;  %v5753_v33 = vsel %vm1012_vm3, %v5750_v19, %v11769_v26  ;;  %v11950_v51 = vld [vmem:[#allocation8_spill] sm:$0xff]  ;;  %v11951_v40 = vld [vmem:[#allocation9_spill] sm:$0xff]  ;;  %v11952_v10 = vld [vmem:[#allocation2_spill] sm:$0xff] }
 0x264   : > { %v10636_v2 = vpop.f32.mrf.mxu1  ;;  %5107 = vmatmul.mubr.f32.gmra.mxu1 %v4530_v32  ;;  %5387 = vmatmul.mubr.f32.gmra.mxu0 %v4368_v52  ;;  %v5702_v55 = vsel %vm1769_vm6, %v5699_v60, %v5701_v43  ;;  %v11768_v4 = vrot.slane %v10603_v41, 5  ;;  %v10647_v9 = vrot.slane %v11950_v51, %v8784_v54  ;;  %v10651_v21 = vrot.slane %v11951_v40, %v8784_v54 }
 0x265   : > { %6623 = vmatprep.mubr.msk.f32.mxu0 %vm4534_vm8, %v4373_v25  ;;  %v7349_v11 = vpop.f32.mrf.mxu0  ;;  %v4372_v19 = vmul.f32 %v10494_v34, %v10517_v62  ;;  %v5567_v32 = vsel %vm821_vm2, %v5564_v17, %v11767_v18  ;;  %v5517_v54 = vsel %vm470_vm1, %v5514_v13, %v5516_v5  ;;  %v5618_v52 = vrot.slane %v10521_v45, 3 }
 0x266   : > { %7432 = vrot.lane.b32.xlu0 %v7431_v1, %s7616_s29  ;;  %7437 = vrot.lane.b32.xlu1 %v7436_v36, %s7614_s25  ;;  %v4870_v60 = vpop.f32.mrf.mxu1  ;;  %v11770_v58 = vrot.slane %v10566_v23, 1  ;;  %v4393_v62 = vmul.f32 %v10395_v16, %v11952_v10  ;;  %v7446_v25 = vpack.i.bf16 %v5567_v32, %v5753_v33  ;;  %v7441_v1 = vpack.i.bf16 %v5517_v54, %v5702_v55 }
 0x267   : > { %v3886_v44 = vpop.f32.mrf.mxu0  ;;  %v5804_v36 = vsel %vm1204_vm4, %v5801_v59, %v5803_v47  ;;  %v10672_v17 = vadd.f32 %v10366_v42, %v3918_v8  ;;  %v3919_v11 = vadd.f32 %v3881_v0, %v10281_v7  ;;  %v5704_v60 = vsel %vm1769_vm6, %v5701_v43, %v11768_v4  ;;  %v11955_v0 = vld [vmem:[#allocation53_spill] sm:$0xff] }
 0x268   : > { %v10675_v13 = vpop.f32.mrf.mxu1  ;;  %5392 = vmatmul.mubr.f32.gmra.mxu0 %v4372_v19  ;;  %v5754_v18 = vrot.slane %v10603_v41, 6  ;;  %v5805_v55 = vrot.slane %v10603_v41, 7  ;;  %v10685_v59 = vmul.f32 %v10395_v16, %v10651_v21  ;;  %v10689_v7 = vmul.f32 %v10419_v14, %v10647_v9 }
 0x269   : > { %11953 = vst [vmem:[#allocation23_spill] sm:$0xff] %v10672_v17  ;;  %11954 = vst [vmem:[#allocation19_spill] sm:$0xff] %v10675_v13  ;;  %6624 = vmatprep.mubr.msk.f32.mxu0 %vm4534_vm8, %v4393_v62  ;;  %v7352_v33 = vpop.f32.mrf.mxu0  ;;  %v4392_v8 = vmul.f32 %v10419_v14, %v11955_v0  ;;  %v5619_v19 = vsel %vm5608_vm9, %v5616_v6, %v5618_v52  ;;  %v5519_v32 = vsel %vm470_vm1, %v5516_v5, %v11770_v58 }
 0x26a   : > { %7447 = vrot.lane.b32.xlu1 %v7446_v25, %s7616_s29  ;;  %7442 = vrot.lane.b32.xlu0 %v7441_v1, %s7615_s26  ;;  %v4875_v43 = vpop.f32.mrf.mxu1  ;;  %v5568_v54 = vrot.slane %v10566_v23, 2  ;;  %v4397_v25 = vmul.f32 %v10402_v22, %v11952_v10  ;;  %v7451_v33 = vpack.i.bf16 %v5619_v19, %v5804_v36  ;;  %v7456_v1 = vpack.i.bf16 %v5519_v32, %v5704_v60 }
 0x26b   : > { %v3891_v62 = vpop.f32.mrf.mxu0  ;;  %v5620_v43 = vrot.slane %v10566_v23, 3  ;;  %v10706_v4 = vadd.f32 %v10366_v42, %v3919_v11  ;;  %v11957_v6 = vrot.slane %v10566_v23, 6  ;;  %v5705_v13 = vrot.slane %v10672_v17, 5 }
 0x26c   : > { %v10708_v26 = vpop.f32.mrf.mxu1  ;;  %5397 = vmatmul.mubr.f32.gmra.mxu0 %v4392_v8  ;;  %v3920_v50 = vadd.f32 %v3886_v44, %v10293_v48  ;;  %v4396_v11 = vmul.f32 %v10426_v38, %v11955_v0  ;;  %v4401_v60 = vmul.f32 %v10595_v31, %v11952_v10  ;;  %v5806_v8 = vsel %vm1204_vm4, %v5803_v47, %v5805_v55 }
 0x26d   : > { %11956 = vst [vmem:[#allocation24_spill] sm:$0xff] %v10708_v26  ;;  %v5755_v5 = vsel %vm1012_vm3, %v11957_v6, %v5754_v18  ;;  %6625 = vmatprep.mubr.msk.f32.mxu0 %vm4534_vm8, %v4397_v25  ;;  %v7355_v36 = vpop.f32.mrf.mxu0  ;;  %v11958_v32 = vrot.slane %v10521_v45, 2  ;;  %v4400_v44 = vmul.f32 %v10618_v35, %v11955_v0  ;;  %v5520_v6 = vrot.slane %v10603_v41, 1 }
 0x26e   : > { %7452 = vrot.lane.b32.xlu0 %v7451_v33, %s7614_s25  ;;  %7457 = vrot.lane.b32.xlu1 %v7456_v1, %s7615_s26  ;;  %v4880_v19 = vpop.f32.mrf.mxu1  ;;  %v5621_v47 = vsel %vm5608_vm9, %v5618_v52, %v5620_v43  ;;  %v4405_v33 = vmul.f32 %v10464_v53, %v11952_v10  ;;  %v5807_v1 = vrot.slane %v10672_v17, 7  ;;  %v11960_v45 = vrot.slane %v10672_v17, 6 }
 0x26f   : > { %v5569_v48 = vsel %vm821_vm2, %v11958_v32, %v5568_v54  ;;  %v3896_v36 = vpop.f32.mrf.mxu0  ;;  %v7466_v32 = vpack.i.bf16 %v5621_v47, %v5806_v8  ;;  %v11961_v25 = vrot.slane %v10603_v41, 5  ;;  %v10745_v52 = vadd.f32 %v10366_v42, %v3920_v50 }
 0x270   : > { %v7461_v58 = vpack.i.bf16 %v5569_v48, %v5755_v5  ;;  %v10735_v19 = vpop.f32.mrf.mxu1  ;;  %5402 = vmatmul.mubr.f32.gmra.mxu0 %v4396_v11  ;;  %v5757_v26 = vsel %vm1012_vm3, %v5754_v18, %v11960_v45  ;;  %v5707_v5 = vrot.slane %v10706_v4, 5  ;;  %v4404_v11 = vmul.f32 %v10494_v34, %v11955_v0 }
 0x271   : > { %11959 = vst [vmem:[#allocation28_spill] sm:$0xff] %v10735_v19  ;;  %v5706_v12 = vsel %vm1769_vm6, %v11961_v25, %v5705_v13  ;;  %11962 = vst [vmem:[#allocation29_spill] sm:$0xff] %v10745_v52  ;;  %6626 = vmatprep.mubr.msk.f32.mxu0 %vm4534_vm8, %v4401_v60  ;;  %v7358_v10 = vpop.f32.mrf.mxu0  ;;  %v5622_v8 = vrot.slane %v10603_v41, 3  ;;  %v10753_v45 = vmul.f32 %v10402_v22, %v10651_v21  ;;  %v11963_v50 = vrot.slane %v10603_v41, 2 }
 0x272   : > { %7462 = vrot.lane.b32.xlu0 %v7461_v58, %s7616_s29  ;;  %7467 = vrot.lane.b32.xlu1 %v7466_v32, %s7614_s25  ;;  %v4885_v18 = vpop.f32.mrf.mxu1  ;;  %v11964_v60 = vrot.slane %v10566_v23, 1  ;;  %v5522_v0 = vrot.slane %v10672_v17, 1  ;;  %v10766_v47 = vmul.f32 %v10426_v38, %v10647_v9  ;;  %v5808_v32 = vsel %vm1204_vm4, %v5805_v55, %v5807_v1 }
 0x273   : > { %v5571_v48 = vsel %vm821_vm2, %v5568_v54, %v11963_v50  ;;  %v3901_v10 = vpop.f32.mrf.mxu0  ;;  %v5758_v18 = vrot.slane %v10706_v4, 6  ;;  %v3921_v24 = vadd.f32 %v3891_v62, %v10307_v57  ;;  %v5809_v23 = vrot.slane %v10706_v4, 7 }
 0x274   : > { %v5521_v25 = vsel %vm470_vm1, %v11964_v60, %v5520_v6  ;;  %v7476_v19 = vpack.i.bf16 %v5571_v48, %v5757_v26  ;;  %v3923_v54 = vadd.f32 %v3901_v10, %v10333_v20  ;;  %v10772_v50 = vpop.f32.mrf.mxu1  ;;  %5407 = vmatmul.mubr.f32.gmra.mxu0 %v4400_v44  ;;  %v5708_v60 = vsel %vm1769_vm6, %v5705_v13, %v5707_v5 }
 0x275   : > { %v7471_v58 = vpack.i.bf16 %v5521_v25, %v5706_v12  ;;  %v3922_v30 = vadd.f32 %v3896_v36, %v10322_v56  ;;  %6627 = vmatprep.mubr.msk.f32.mxu0 %vm4534_vm8, %v4405_v33  ;;  %v7361_v12 = vpop.f32.mrf.mxu0  ;;  %v5623_v26 = vsel %vm5608_vm9, %v5620_v43, %v5622_v8  ;;  %v5760_v55 = vrot.slane %v10745_v52, 6 }
 0x276   : > { %v5709_v57 = vrot.slane %v10745_v52, 5  ;;  %v10782_v20 = vadd.f32 %v10366_v42, %v3923_v54  ;;  %7477 = vrot.lane.b32.xlu1 %v7476_v19, %s7616_s29  ;;  %v4890_v13 = vpop.f32.mrf.mxu1  ;;  %v7481_v62 = vpack.i.bf16 %v5623_v26, %v5808_v32  ;;  %v5523_v56 = vsel %vm470_vm1, %v5520_v6, %v5522_v0 }
 0x277   : > { %7472 = vrot.lane.b32.xlu0 %v7471_v58, %s7615_s26  ;;  %v5572_v44 = vrot.slane %v10672_v17, 2  ;;  %v3906_v36 = vpop.f32.mrf.mxu0  ;;  %v7486_v33 = vpack.i.bf16 %v5523_v56, %v5708_v60  ;;  %v5624_v43 = vrot.slane %v10672_v17, 3  ;;  %v5574_v48 = vrot.slane %v10706_v4, 2 }
 0x278   : > { %11965 = vst [vmem:[#allocation26_spill] sm:$0xff] %v10782_v20  ;;  %v10791_v25 = vrot.slane %v10706_v4, 1  ;;  %v10794_v10 = vadd.f32 %v10366_v42, %v3921_v24  ;;  %v3924_v19 = vadd.f32 %v3906_v36, %v10345_v15  ;;  %v10797_v58 = vpop.f32.mrf.mxu1  ;;  %5412 = vmatmul.mubr.f32.gmra.mxu0 %v4404_v11  ;;  %v11967_v6 = vrot.slane %v10672_v17, 6 }
 0x279   : > { %v5810_v54 = vsel %vm1204_vm4, %v5807_v1, %v5809_v23  ;;  %v10804_v60 = vadd.f32 %v10366_v42, %v3922_v30  ;;  %6628 = vmatprep.mubr.msk.f32.mxu0 %vm4534_vm8, %v10685_v59  ;;  %v7364_v12 = vpop.f32.mrf.mxu0  ;;  %v5761_v15 = vsel %vm1012_vm3, %v5758_v18, %v5760_v55  ;;  %v5710_v24 = vsel %vm1769_vm6, %v5707_v5, %v5709_v57 }
 0x27a   : > { %11966 = vst [vmem:[#allocation31_spill] sm:$0xff] %v10794_v10  ;;  %v5759_v32 = vsel %vm1012_vm3, %v11967_v6, %v5758_v18  ;;  %v5811_v11 = vrot.slane %v10745_v52, 7  ;;  %v10816_v26 = vadd.f32 %v10366_v42, %v3924_v19  ;;  %7487 = vrot.lane.b32.xlu1 %v7486_v33, %s7615_s26  ;;  %v4895_v30 = vpop.f32.mrf.mxu1  ;;  %v11969_v59 = vrot.slane %v10603_v41, 2 }
 0x27b   : > { %11968 = vst [vmem:[#allocation32_spill] sm:$0xff] %v10804_v60  ;;  %7482 = vrot.lane.b32.xlu0 %v7481_v62, %s7614_s25  ;;  %v4433_v18 = vmul.f32 %v10595_v31, %v10651_v21  ;;  %v5626_v13 = vrot.slane %v10706_v4, 3  ;;  %v5625_v42 = vsel %vm5608_vm9, %v5622_v8, %v5624_v43  ;;  %v5575_v62 = vsel %vm821_vm2, %v5572_v44, %v5574_v48 }
 0x27c   : > { %v5573_v1 = vsel %vm821_vm2, %v11969_v59, %v5572_v44  ;;  %v5525_v56 = vsel %vm470_vm1, %v5522_v0, %v10791_v25  ;;  %v10834_v36 = vpop.f32.mrf.mxu1  ;;  %v10836_v33 = vpop.f32.mrf.mxu0  ;;  %5417 = vmatmul.mubr.f32.gmra.mxu0 %v10689_v7  ;;  %v7496_v19 = vpack.i.bf16 %v5625_v42, %v5810_v54  ;;  %v7506_v6 = vpack.i.bf16 %v5575_v62, %v5761_v15 }
 0x27d   : > { %v7491_v5 = vpack.i.bf16 %v5573_v1, %v5759_v32  ;;  %11970 = vst [vmem:[#allocation27_spill] sm:$0xff] %v10836_v33  ;;  %v7501_v32 = vpack.i.bf16 %v5525_v56, %v5710_v24  ;;  %v11784_v12 = vrot.slane %v10794_v10, 5  ;;  %6629 = vmatprep.mubr.msk.f32.mxu0 %vm4534_vm8, %v10753_v45  ;;  %v5812_v8 = vsel %vm1204_vm4, %v5809_v23, %v5811_v11 }
 0x27e   : > { %v11779_v0 = vrot.slane %v10782_v20, 5  ;;  %v11780_v44 = vrot.slane %v10804_v60, 3  ;;  %v5909_v30 = vrot.slane %v10816_v26, 5  ;;  %7497 = vrot.lane.b32.xlu1 %v7496_v19, %s7614_s25  ;;  %v4900_v7 = vpop.f32.mrf.mxu1  ;;  %v5180_v54 = vpop.f32.mrf.mxu0  ;;  %v11783_v15 = vrot.slane %v10782_v20, 7 }
 0x27f   : > { %7492 = vrot.lane.b32.xlu0 %v7491_v5, %s7616_s29  ;;  %v5884_v45 = vrot.slane %v10782_v20, 3  ;;  %v5939_v24 = vrot.slane %v10816_v26, 7  ;;  %v5869_v23 = vrot.slane %v10782_v20, 2  ;;  %v11781_v59 = vrot.slane %v10804_v60, 2 }
 0x280   : > { %v11782_v1 = vrot.slane %v10782_v20, 6  ;;  %v10859_v5 = vsel %vm1769_vm6, %v11779_v0, %v5909_v30  ;;  %v5924_v42 = vrot.slane %v10816_v26, 6  ;;  %v10862_v62 = vpop.f32.mrf.mxu1  ;;  %v10864_v56 = vpop.f32.mrf.mxu0  ;;  %5422 = vmatmul.mubr.f32.gmra.mxu0 %v10766_v47  ;;  %v5712_v19 = vsel %vm1769_vm6, %v5709_v57, %v11784_v12 }
 0x281   : > { %v11785_v7 = vrot.slane %v10794_v10, 6  ;;  %v10876_v30 = vsel %vm5608_vm9, %v11780_v44, %v5884_v45  ;;  %v10881_v54 = vsel %vm1204_vm4, %v11783_v15, %v5939_v24  ;;  %6630 = vmatprep.mubr.msk.f32.mxu0 %vm4534_vm8, %v4433_v18  ;;  %v5813_v47 = vrot.slane %v10794_v10, 7 }
 0x282   : > { %v10890_v57 = vsel %vm821_vm2, %v11781_v59, %v5869_v23  ;;  %v10895_v45 = vsel %vm1012_vm3, %v11782_v1, %v5924_v42  ;;  %v10899_v24 = vrot.slane %v11951_v40, %v8799_v3  ;;  %7507 = vrot.lane.b32.xlu1 %v7506_v6, %s7616_s29  ;;  %v4905_v18 = vpop.f32.mrf.mxu1  ;;  %v5185_v0 = vpop.f32.mrf.mxu0  ;;  %v4432_v44 = vmul.f32 %v10618_v35, %v10647_v9 }
 0x283   : > { %7502 = vrot.lane.b32.xlu0 %v7501_v32, %s7615_s26  ;;  %v4437_v42 = vmul.f32 %v10464_v53, %v10651_v21  ;;  %v5627_v59 = vsel %vm5608_vm9, %v5624_v43, %v5626_v13  ;;  %v5576_v6 = vrot.slane %v10745_v52, 2  ;;  %v5628_v32 = vrot.slane %v10745_v52, 3 }
 0x284   : > { %v5900_v0 = vrot.slane %v10816_v26, 4  ;;  %v10917_v18 = vpop.f32.mrf.mxu1  ;;  %v10919_v1 = vpop.f32.mrf.mxu0  ;;  %5427 = vmatmul.mubr.f32.gmra.mxu0 %v4432_v44  ;;  %v7511_v23 = vpack.i.bf16 %v5627_v59, %v5812_v8  ;;  %v7516_v21 = vpack.i.bf16 %v10791_v25, %v5712_v19  ;;  %v5763_v43 = vsel %vm1012_vm3, %v5760_v55, %v11785_v7 }
 0x285   : > { %6631 = vmatprep.mubr.msk.f32.mxu0 %vm4534_vm8, %v4437_v42  ;;  %v5814_v26 = vsel %vm1204_vm4, %v5811_v11, %v5813_v47  ;;  %v5935_v15 = vrot.slane %v10804_v60, 7  ;;  %v5905_v12 = vrot.slane %v10804_v60, 5  ;;  %v10935_v8 = vrot.slane %v11950_v51, %v8799_v3 }
 0x286   : > { %7517 = vrot.lane.b32.xlu1 %v7516_v21, %s7615_s26  ;;  %v4910_v44 = vpop.f32.mrf.mxu1  ;;  %v5190_v59 = vpop.f32.mrf.mxu0  ;;  %v4436_v55 = vmul.f32 %v10494_v34, %v10647_v9  ;;  %v4457_v11 = vmul.f32 %v10395_v16, %v10899_v24  ;;  %v11792_v19 = vrot.slane %v10782_v20, 4  ;;  %v5577_v42 = vsel %vm821_vm2, %v5574_v48, %v5576_v6 }
 0x287   : > { %7512 = vrot.lane.b32.xlu0 %v7511_v23, %s7614_s25  ;;  %v5629_v3 = vsel %vm5608_vm9, %v5626_v13, %v5628_v32  ;;  %v5880_v23 = vrot.slane %v10794_v10, 3  ;;  %v5846_v21 = vrot.slane %v10745_v52, 1  ;;  %v7521_v59 = vpack.i.bf16 %v5577_v42, %v5763_v43 }
 0x288   : > { %v10952_v44 = vpop.f32.mrf.mxu1  ;;  %v10954_v9 = vpop.f32.mrf.mxu0  ;;  %5432 = vmatmul.mubr.f32.gmra.mxu0 %v4436_v55  ;;  %v7526_v7 = vpack.i.bf16 %v5629_v3, %v5814_v26  ;;  %v10959_v17 = vsel %vm1577_vm5, %v11792_v19, %v5900_v0  ;;  %v5936_v48 = vsel %vm1204_vm4, %v5813_v47, %v5935_v15  ;;  %v11972_v13 = vrot.slane %v10794_v10, 5 }
 0x289   : > { %11971 = vst [vmem:[#allocation33_spill] sm:$0xff] %v10959_v17  ;;  %6632 = vmatprep.mubr.msk.f32.mxu0 %vm4534_vm8, %v4457_v11  ;;  %v5920_v41 = vrot.slane %v10804_v60, 6  ;;  %v4456_v0 = vmul.f32 %v10419_v14, %v10935_v8  ;;  %v4461_v55 = vmul.f32 %v10402_v22, %v10899_v24  ;;  %v5881_v47 = vsel %vm5608_vm9, %v5628_v32, %v5880_v23 }
 0x28a   : > { %v5906_v52 = vsel %vm1769_vm6, %v11972_v13, %v5905_v12  ;;  %7527 = vrot.lane.b32.xlu1 %v7526_v7, %s7614_s25  ;;  %v4915_v43 = vpop.f32.mrf.mxu1  ;;  %v5195_v26 = vpop.f32.mrf.mxu0  ;;  %v5847_v11 = vsel %vm470_vm1, %v10791_v25, %v5846_v21  ;;  %v5865_v42 = vrot.slane %v10794_v10, 2  ;;  %v5848_v3 = vrot.slane %v10794_v10, 1 }
 0x28b   : > { %7522 = vrot.lane.b32.xlu0 %v7521_v59, %s7616_s29  ;;  %v7541_v13 = vpack.i.bf16 %v5881_v47, %v5936_v48  ;;  %v7531_v43 = vpack.i.bf16 %v5906_v52, %v5847_v11  ;;  %v11973_v26 = vrot.slane %v10794_v10, 6  ;;  %v11974_v19 = vrot.slane %v10782_v20, 5 }
 0x28c   : > { %v10978_v59 = vpop.f32.mrf.mxu1  ;;  %v10980_v7 = vpop.f32.mrf.mxu0  ;;  %5437 = vmatmul.mubr.f32.gmra.mxu0 %v4456_v0  ;;  %v4460_v48 = vmul.f32 %v10426_v38, %v10935_v8  ;;  %v4465_v52 = vmul.f32 %v10595_v31, %v10899_v24  ;;  %v5866_v0 = vsel %vm821_vm2, %v5576_v6, %v5865_v42  ;;  %v4485_v6 = vrot.slane %v11951_v40, %v11902_v46 }
 0x28d   : > { %6633 = vmatprep.mubr.msk.f32.mxu0 %vm4534_vm8, %v4461_v55  ;;  %v5921_v32 = vsel %vm1012_vm3, %v11973_v26, %v5920_v41  ;;  %v5908_v25 = vsel %vm1769_vm6, %v5905_v12, %v11974_v19  ;;  %v5849_v55 = vsel %vm470_vm1, %v5846_v21, %v5848_v3 }
 0x28e   : > { %7542 = vrot.lane.b32.xlu1 %v7541_v13, %s7614_s25  ;;  %v4920_v17 = vpop.f32.mrf.mxu1  ;;  %v5200_v33 = vpop.f32.mrf.mxu0  ;;  %v7536_v12 = vpack.i.bf16 %v5866_v0, %v5921_v32  ;;  %v7546_v19 = vpack.i.bf16 %v5908_v25, %v5849_v55  ;;  %v11976_v13 = vrot.slane %v10782_v20, 6  ;;  %v4464_v32 = vmul.f32 %v10618_v35, %v10935_v8 }
 0x28f   : > { %7532 = vrot.lane.b32.xlu0 %v7531_v43, %s7615_s26  ;;  %v11975_v17 = vrot.slane %v10782_v20, 7  ;;  %v4469_v25 = vmul.f32 %v10464_v53, %v10899_v24  ;;  %v5850_v0 = vrot.slane %v10804_v60, 1  ;;  %v4481_v24 = vrot.slane %v11950_v51, %v11902_v46 }
 0x290   : > { %v10997_v47 = vpop.f32.mrf.mxu1  ;;  %v10999_v11 = vpop.f32.mrf.mxu0  ;;  %5442 = vmatmul.mubr.f32.gmra.mxu0 %v4460_v48  ;;  %v5923_v43 = vsel %vm1012_vm3, %v5920_v41, %v11976_v13  ;;  %v11978_v41 = vrot.slane %v10804_v60, 2  ;;  %v4468_v13 = vmul.f32 %v10494_v34, %v10935_v8 }
 0x291   : > { %6634 = vmatprep.mubr.msk.f32.mxu0 %vm4534_vm8, %v4465_v52  ;;  %v5938_v33 = vsel %vm1204_vm4, %v5935_v15, %v11975_v17  ;;  %v11977_v15 = vrot.slane %v10804_v60, 3  ;;  %v4488_v8 = vmul.f32 %v10419_v14, %v4481_v24 }
 0x292   : > { %7547 = vrot.lane.b32.xlu1 %v7546_v19, %s7615_s26  ;;  %v4925_v21 = vpop.f32.mrf.mxu1  ;;  %v5205_v26 = vpop.f32.mrf.mxu0  ;;  %v5868_v52 = vsel %vm821_vm2, %v5865_v42, %v11978_v41  ;;  %v11980_v41 = vpack.i.bf16 %v10890_v57, %v10895_v45  ;;  %v4517_v57 = vrot.slane %v11951_v40, %v11931_v63  ;;  %v4501_v45 = vmul.f32 %v10464_v53, %v4485_v6 }
 0x293   : > { %7537 = vrot.lane.b32.xlu0 %v7536_v12, %s7616_s29  ;;  %v5883_v48 = vsel %vm5608_vm9, %v5880_v23, %v11977_v15  ;;  %v7551_v17 = vpack.i.bf16 %v5868_v52, %v5923_v43  ;;  %v4489_v21 = vmul.f32 %v10395_v16, %v4485_v6  ;;  %v5851_v26 = vsel %vm470_vm1, %v5848_v3, %v5850_v0 }
 0x294   : > { %v11023_v55 = vpop.f32.mrf.mxu1  ;;  %v11025_v12 = vpop.f32.mrf.mxu0  ;;  %5447 = vmatmul.mubr.f32.gmra.mxu0 %v4464_v32  ;;  %v7556_v19 = vpack.i.bf16 %v5883_v48, %v5938_v33  ;;  %v7561_v46 = vpack.i.bf16 %v10859_v5, %v5851_v26  ;;  %v4493_v15 = vmul.f32 %v10402_v22, %v4485_v6  ;;  %v11979_v5 = vpack.i.bf16 %v10876_v30, %v10881_v54 }
 0x295   : > { %6635 = vmatprep.mubr.msk.f32.mxu0 %vm4534_vm8, %v4469_v25 }
 0x296   : > { %7552 = vrot.lane.b32.xlu1 %v7551_v17, %s7616_s29  ;;  %v4930_v23 = vpop.f32.mrf.mxu1  ;;  %v5210_v42 = vpop.f32.mrf.mxu0  ;;  %v4497_v17 = vmul.f32 %v10595_v31, %v4485_v6 }
 0x297   : > { %7557 = vrot.lane.b32.xlu0 %v7556_v19, %s7614_s25  ;;  %v4492_v19 = vmul.f32 %v10426_v38, %v4481_v24 }
 0x298   : > { %v11036_v33 = vpop.f32.mrf.mxu1  ;;  %v11038_v43 = vpop.f32.mrf.mxu0  ;;  %5452 = vmatmul.mubr.f32.gmra.mxu0 %v4468_v13  ;;  %v4496_v13 = vmul.f32 %v10618_v35, %v4481_v24 }
 0x299   : > { %6636 = vmatprep.mubr.msk.f32.mxu0 %vm4534_vm8, %v4489_v21 }
 0x29a   : > { %5858 = vrot.lane.b32.xlu1 %v5850_v0, %s7615_s26  ;;  %v4935_v32 = vpop.f32.mrf.mxu1  ;;  %v5215_v25 = vpop.f32.mrf.mxu0 }
 0x29b   : > { %7562 = vrot.lane.b32.xlu0 %v7561_v46, %s7615_s26  ;;  %v4513_v46 = vrot.slane %v11950_v51, %v11931_v63 }
 0x29c   : > { %v11046_v3 = vpop.f32.mrf.mxu1  ;;  %v11048_v48 = vpop.f32.mrf.mxu0  ;;  %5457 = vmatmul.mubr.f32.gmra.mxu0 %v4488_v8  ;;  %v4500_v8 = vmul.f32 %v10494_v34, %v4481_v24 }
 0x29d   : > { %6637 = vmatprep.mubr.msk.f32.mxu0 %vm4534_vm8, %v4493_v15  ;;  %v4521_v15 = vmul.f32 %v10395_v16, %v4517_v57 }
 0x29e   : > { %7572 = vrot.lane.b32.xlu1 %v11979_v5, %s7614_s25  ;;  %v4940_v52 = vpop.f32.mrf.mxu1  ;;  %v5220_v0 = vpop.f32.mrf.mxu0 }
 0x29f   : > { %7567 = vrot.lane.b32.xlu0 %v11980_v41, %s7616_s29  ;;  %v4520_v52 = vmul.f32 %v10419_v14, %v4513_v46  ;;  %v4525_v0 = vmul.f32 %v10402_v22, %v4517_v57 }
 0x2a0   : > { %v11061_v23 = vpop.f32.mrf.mxu1  ;;  %v11063_v42 = vpop.f32.mrf.mxu0  ;;  %5462 = vmatmul.mubr.f32.gmra.mxu0 %v4492_v19  ;;  %v4524_v19 = vmul.f32 %v10426_v38, %v4513_v46 }
 0x2a1   : > { %6638 = vmatprep.mubr.msk.f32.mxu0 %vm4534_vm8, %v4497_v17  ;;  %v4529_v17 = vmul.f32 %v10595_v31, %v4517_v57 }
 0x2a2   : > { %v4945_v30 = vpop.f32.mrf.mxu1  ;;  %v5225_v54 = vpop.f32.mrf.mxu0 }
 0x2a4   : > { %v11070_v21 = vpop.f32.mrf.mxu1  ;;  %v11072_v26 = vpop.f32.mrf.mxu0  ;;  %5467 = vmatmul.mubr.f32.gmra.mxu0 %v4496_v13  ;;  %v4528_v13 = vmul.f32 %v10618_v35, %v4513_v46 }
 0x2a5   : > { %6639 = vmatprep.mubr.msk.f32.mxu0 %vm4534_vm8, %v4501_v45  ;;  %v4533_v45 = vmul.f32 %v10464_v53, %v4517_v57 }
 0x2a6   : > { %v4950_v32 = vpop.f32.mrf.mxu1  ;;  %v5230_v25 = vpop.f32.mrf.mxu0 }
 0x2a8   : > { %v11079_v5 = vpop.f32.mrf.mxu1  ;;  %v11081_v40 = vpop.f32.mrf.mxu0  ;;  %5472 = vmatmul.mubr.f32.gmra.mxu0 %v4500_v8  ;;  %v4532_v8 = vmul.f32 %v10494_v34, %v4513_v46 }
 0x2a9   : > { %11981 = vst [vmem:[#allocation34_spill] sm:$0xff] %v11079_v5  ;;  %6640 = vmatprep.mubr.msk.f32.mxu0 %vm4534_vm8, %v4521_v15 }
 0x2aa   : > { %v4955_v6 = vpop.f32.mrf.mxu1  ;;  %v5235_v41 = vpop.f32.mrf.mxu0 }
 0x2ac   : > { %v11086_v63 = vpop.f32.mrf.mxu1  ;;  %v11088_v51 = vpop.f32.mrf.mxu0  ;;  %5477 = vmatmul.mubr.f32.gmra.mxu0 %v4520_v52 }
 0x2ad   : > { %11982 = vst [vmem:[#allocation30_spill] sm:$0xff] %v11086_v63  ;;  %6641 = vmatprep.mubr.msk.f32.mxu0 %vm4534_vm8, %v4525_v0 }
 0x2ae   : > { %v4960_v16 = vpop.f32.mrf.mxu1  ;;  %v5240_v24 = vpop.f32.mrf.mxu0 }
 0x2b0   : > { %v11093_v30 = vpop.f32.mrf.mxu1  ;;  %v11095_v54 = vpop.f32.mrf.mxu0  ;;  %5482 = vmatmul.mubr.f32.gmra.mxu0 %v4524_v19 }
 0x2b1   : > { %11983 = vst [vmem:[#allocation38_spill] sm:$0xff] %v11093_v30  ;;  %6642 = vmatprep.mubr.msk.f32.mxu0 %vm4534_vm8, %v4529_v17 }
 0x2b2   : > { %v4965_v22 = vpop.f32.mrf.mxu1  ;;  %v5245_v14 = vpop.f32.mrf.mxu0 }
 0x2b4   : > { %v11100_v32 = vpop.f32.mrf.mxu1  ;;  %v11102_v25 = vpop.f32.mrf.mxu0  ;;  %5487 = vmatmul.mubr.f32.gmra.mxu0 %v4528_v13  ;;  %v11796_v13 = vrot.slane %v10433_v39, 4 }
 0x2b5   : > { %11984 = vst [vmem:[#allocation36_spill] sm:$0xff] %v11100_v32  ;;  %6643 = vmatprep.mubr.msk.f32.mxu0 %vm4534_vm8, %v4533_v45 }
 0x2b6   : > { %v4970_v38 = vpop.f32.mrf.mxu1  ;;  %v5250_v31 = vpop.f32.mrf.mxu0 }
 0x2b8   : > { %v11106_v15 = vpop.f32.mrf.mxu1  ;;  %v11108_v6 = vpop.f32.mrf.mxu0  ;;  %5492 = vmatmul.mubr.f32.gmra.mxu0 %v4532_v8 }
 0x2b9   : > { %11985 = vst [vmem:[#allocation7_spill] sm:$0xff] %v11106_v15 }
 0x2ba   : > { %v4975_v41 = vpop.f32.mrf.mxu1  ;;  %v5255_v35 = vpop.f32.mrf.mxu0 }
 0x2bb   : > { %v5661_v41 = vrot.slane %v10383_v27, 4 }
 0x2bc   : > { %v11110_v52 = vpop.f32.mrf.mxu1  ;;  %v11112_v53 = vpop.f32.mrf.mxu0 }
 0x2bd   : > { %11986 = vst [vmem:[#allocation39_spill] sm:$0xff] %v11110_v52  ;;  %v5663_v60 = vsel %vm1577_vm5, %v5661_v41, %v11796_v13 }
 0x2be   : > { %v4980_v57 = vpop.f32.mrf.mxu1  ;;  %v5260_v0 = vpop.f32.mrf.mxu0 }
 0x2c0   : > { %v11114_v16 = vpop.f32.mrf.mxu1  ;;  %v11116_v24 = vpop.f32.mrf.mxu0 }
 0x2c1   : > { %11987 = vst [vmem:[#allocation35_spill] sm:$0xff] %v11114_v16 }
 0x2c2   : > { %v4985_v19 = vpop.f32.mrf.mxu1  ;;  %v5265_v17 = vpop.f32.mrf.mxu0 }
 0x2c4   : > { %v7393_v34 = vpop.permute.xlu1 %7392  ;;  %v7383_v46 = vpop.permute.xlu0 %7382 }
 0x2c5   : > { %v11118_v22 = vpop.f32.mrf.mxu1  ;;  %v11120_v14 = vpop.f32.mrf.mxu0  ;;  %v7385_v45 = vunpack.i.h.bf16 %v7383_v46  ;;  %v7384_v38 = vunpack.i.l.bf16 %v7383_v46  ;;  %v7395_v46 = vunpack.i.h.bf16 %v7393_v34  ;;  %v7394_v5 = vunpack.i.l.bf16 %v7393_v34 }
 0x2c6   : > { %11988 = vst [vmem:[#allocation13_spill] sm:$0xff] %v11118_v22 }
 0x2c7   : > { %v4990_v31 = vpop.f32.mrf.mxu1  ;;  %v5270_v8 = vpop.f32.mrf.mxu0 }
 0x2c8   : > { %v7388_v35 = vpop.permute.xlu0 %7387  ;;  %v11124_v57 = vpop.permute.xlu1 %7397  ;;  %v5951_v31 = vsel %vm5950_vm10, %v10390_v37, %v7385_v45  ;;  %v5982_v8 = vsel %vm5950_vm10, %v5663_v60, %v7384_v38 }
 0x2c9   : > { %v7390_v0 = vunpack.i.h.bf16 %v7388_v35  ;;  %v7389_v19 = vunpack.i.l.bf16 %v7388_v35  ;;  %v11126_v17 = vpop.f32.mrf.mxu1  ;;  %v11128_v20 = vpop.f32.mrf.mxu0 }
 0x2ca   : > { %11989 = vst [vmem:[#allocation41_spill] sm:$0xff] %v11126_v17 }
 0x2cb   : > { %v5962_v63 = vsel %vm5961_vm11, %v5951_v31, %v7390_v0  ;;  %v4995_v30 = vpop.f32.mrf.mxu1  ;;  %v5275_v32 = vpop.f32.mrf.mxu0  ;;  %v5992_v35 = vsel %vm5961_vm11, %v5982_v8, %v7389_v19 }
 0x2cc   : > { %v11138_v15 = vpop.permute.xlu0 %7402  ;;  %v11140_v52 = vpop.permute.xlu1 %7407  ;;  %v6002_v16 = vsel %vm4534_vm8, %v5992_v35, %v7394_v5  ;;  %v11144_v41 = vsel %vm4534_vm8, %v5962_v63, %v7395_v46 }
 0x2cd   : > { %11990 = vst [vmem:[#allocation44_spill] sm:$0xff] %v11140_v52  ;;  %11991 = vst [vmem:[#allocation37_spill] sm:$0xff] %v11144_v41  ;;  %v11146_v34 = vpop.f32.mrf.mxu1  ;;  %v11148_v37 = vpop.f32.mrf.mxu0  ;;  %6104 = vmatprep.mubr.f32.mxu1 %v6002_v16 }
 0x2ce   : > { %11992 = vst [vmem:[#allocation45_spill] sm:$0xff] %v11146_v34 }
 0x2cf   : > { %v5000_v60 = vpop.f32.mrf.mxu1  ;;  %v5280_v45 = vpop.f32.mrf.mxu0 }
 0x2d0   : > { %v11150_v30 = vpop.permute.xlu1 %7417  ;;  %v11152_v32 = vpop.permute.xlu0 %7412 }
 0x2d1   : > { %11993 = vst [vmem:[#allocation47_spill] sm:$0xff] %v11150_v30  ;;  %11994 = vst [vmem:[#allocation42_spill] sm:$0xff] %v11152_v32  ;;  %v11154_v38 = vpop.f32.mrf.mxu1  ;;  %v11156_v0 = vpop.f32.mrf.mxu0 }
 0x2d2   : > { %11995 = vst [vmem:[#allocation25_spill] sm:$0xff] %v11154_v38 }
 0x2d3   : > { %v5005_v19 = vpop.f32.mrf.mxu1  ;;  %v5285_v5 = vpop.f32.mrf.mxu0 }
 0x2d4   : > { %v11158_v31 = vpop.permute.xlu0 %7422  ;;  %v11160_v63 = vpop.permute.xlu1 %7427 }
 0x2d5   : > { %11996 = vst [vmem:[#allocation48_spill] sm:$0xff] %v11158_v31  ;;  %11997 = vst [vmem:[#allocation46_spill] sm:$0xff] %v11160_v63  ;;  %v11162_v46 = vpop.f32.mrf.mxu1  ;;  %v11164_v8 = vpop.f32.mrf.mxu0 }
 0x2d6   : > { %11998 = vst [vmem:[#allocation50_spill] sm:$0xff] %v11162_v46 }
 0x2d7   : > { %v5010_v16 = vpop.f32.mrf.mxu1  ;;  %v5290_v35 = vpop.f32.mrf.mxu0 }
 0x2d8   : > { %v11166_v60 = vpop.permute.xlu0 %7432  ;;  %v11168_v45 = vpop.permute.xlu1 %7437 }
 0x2d9   : > { %11999 = vst [vmem:[#allocation51_spill] sm:$0xff] %v11166_v60  ;;  %12000 = vst [vmem:[#allocation52_spill] sm:$0xff] %v11168_v45  ;;  %v11170_v13 = vpop.f32.mrf.mxu1  ;;  %v11172_v22 = vpop.f32.mrf.mxu0 }
 0x2da   : > { %12001 = vst [vmem:[#allocation49_spill] sm:$0xff] %v11170_v13 }
 0x2db   : > { %v5015_v19 = vpop.f32.mrf.mxu1  ;;  %v5295_v5 = vpop.f32.mrf.mxu0 }
 0x2dc   : > { %v11174_v17 = vpop.permute.xlu1 %7447  ;;  %v11176_v34 = vpop.permute.xlu0 %7442 }
 0x2dd   : > { %12002 = vst [vmem:[#allocation8_spill] sm:$0xff] %v11174_v17  ;;  %12003 = vst [vmem:[#allocation9_spill] sm:$0xff] %v11176_v34  ;;  %v11178_v38 = vpop.f32.mrf.mxu1  ;;  %v11180_v46 = vpop.f32.mrf.mxu0 }
 0x2de   : > { %12004 = vst [vmem:[#allocation2_spill] sm:$0xff] %v11178_v38 }
 0x2df   : > { %v5020_v16 = vpop.f32.mrf.mxu1  ;;  %v5300_v35 = vpop.f32.mrf.mxu0 }
 0x2e0   : > { %v11182_v10 = vpop.permute.xlu0 %7452  ;;  %v11184_v60 = vpop.permute.xlu1 %7457 }
 0x2e1   : > { %12005 = vst [vmem:[#allocation53_spill] sm:$0xff] %v11182_v10  ;;  %12006 = vst [vmem:[#allocation54_spill] sm:$0xff] %v11184_v60  ;;  %v11186_v45 = vpop.f32.mrf.mxu1  ;;  %v11188_v13 = vpop.f32.mrf.mxu0 }
 0x2e2   : > { %12007 = vst [vmem:[#allocation55_spill] sm:$0xff] %v11186_v45 }
 0x2e3   : > { %v5025_v19 = vpop.f32.mrf.mxu1  ;;  %v5305_v5 = vpop.f32.mrf.mxu0 }
 0x2e4   : > { %v11190_v41 = vpop.permute.xlu0 %7462  ;;  %v11192_v17 = vpop.permute.xlu1 %7467 }
 0x2e5   : > { %12008 = vst [vmem:[#allocation56_spill] sm:$0xff] %v11190_v41  ;;  %12009 = vst [vmem:[#allocation57_spill] sm:$0xff] %v11192_v17  ;;  %v11194_v34 = vpop.f32.mrf.mxu1  ;;  %v11196_v38 = vpop.f32.mrf.mxu0 }
 0x2e6   : > { %12010 = vst [vmem:[#allocation58_spill] sm:$0xff] %v11194_v34 }
 0x2e7   : > { %v5030_v16 = vpop.f32.mrf.mxu1  ;;  %v5310_v35 = vpop.f32.mrf.mxu0 }
 0x2e8   : > { %v11198_v63 = vpop.permute.xlu1 %7477 }
 0x2e9   : > { %12011 = vst [vmem:[#allocation59_spill] sm:$0xff] %v11198_v63  ;;  %v11200_v10 = vpop.permute.xlu0 %7472  ;;  %v11202_v60 = vpop.f32.mrf.mxu1 }
 0x2ea   : > { %12012 = vst [vmem:[#allocation60_spill] sm:$0xff] %v11200_v10  ;;  %12013 = vst [vmem:[#allocation61_spill] sm:$0xff] %v11202_v60  ;;  %v5313_v45 = vpop.f32.mrf.mxu0 }
 0x2eb   : > { %v5035_v31 = vpop.f32.mrf.mxu1 }
 0x2ec   : > { %v5315_v19 = vpop.f32.mrf.mxu0  ;;  %v11206_v41 = vpop.permute.xlu1 %7487 }
 0x2ed   : > { %v11204_v5 = vpop.permute.xlu0 %7482  ;;  %12015 = vst [vmem:[#allocation63_spill] sm:$0xff] %v11206_v41  ;;  %v11208_v17 = vpop.f32.mrf.mxu1 }
 0x2ee   : > { %12014 = vst [vmem:[#allocation62_spill] sm:$0xff] %v11204_v5  ;;  %12016 = vst [vmem:[#allocation64_spill] sm:$0xff] %v11208_v17  ;;  %v5318_v34 = vpop.f32.mrf.mxu0 }
 0x2ef   : > { %v5040_v30 = vpop.f32.mrf.mxu1 }
 0x2f0   : > { %v5320_v27 = vpop.f32.mrf.mxu0  ;;  %v11212_v35 = vpop.permute.xlu1 %7497 }
 0x2f1   : > { %v11210_v16 = vpop.permute.xlu0 %7492  ;;  %12018 = vst [vmem:[#allocation66_spill] sm:$0xff] %v11212_v35  ;;  %v11214_v63 = vpop.f32.mrf.mxu1 }
 0x2f2   : > { %12017 = vst [vmem:[#allocation65_spill] sm:$0xff] %v11210_v16  ;;  %12019 = vst [vmem:[#allocation67_spill] sm:$0xff] %v11214_v63  ;;  %v5323_v10 = vpop.f32.mrf.mxu0 }
 0x2f3   : > { %v5045_v60 = vpop.f32.mrf.mxu1 }
 0x2f4   : > { %v5325_v32 = vpop.f32.mrf.mxu0  ;;  %v11216_v31 = vpop.permute.xlu1 %7507 }
 0x2f5   : > { %12020 = vst [vmem:[#allocation68_spill] sm:$0xff] %v11216_v31  ;;  %v11218_v19 = vpop.permute.xlu0 %7502  ;;  %v11220_v5 = vpop.f32.mrf.mxu1  ;;  %v5254_v32 = vadd.f32 %v11108_v6, %v10636_v2  ;;  %v5244_v2 = vadd.f32 %v11095_v54, %v10569_v49  ;;  %v5314_v49 = vadd.f32 %v5313_v45, %v11023_v55  ;;  %v12025_v45 = vld [vmem:[#allocation11_spill] sm:$0xff] }
 0x2f6   : > { %12021 = vst [vmem:[#allocation69_spill] sm:$0xff] %v11218_v19  ;;  %12022 = vst [vmem:[#allocation70_spill] sm:$0xff] %v11220_v5  ;;  %v5328_v41 = vpop.f32.mrf.mxu0 }
 0x2f7   : > { %v5050_v17 = vpop.f32.mrf.mxu1  ;;  %v5329_v19 = vadd.f32 %v5328_v41, %v11061_v23  ;;  %v5319_v23 = vadd.f32 %v5318_v34, %v11036_v33  ;;  %v5234_v33 = vadd.f32 %v11081_v40, %v10503_v61 }
 0x2f8   : > { %v5330_v52 = vpop.f32.mrf.mxu0  ;;  %v11226_v35 = vpop.permute.xlu1 %7517 }
 0x2f9   : > { %v11222_v30 = vpop.permute.xlu0 %7512  ;;  %v11224_v27 = vpop.f32.mrf.mxu1  ;;  %v5249_v52 = vadd.f32 %v11102_v25, %v10605_v29  ;;  %v5239_v25 = vadd.f32 %v11088_v51, %v10536_v28  ;;  %v5309_v51 = vadd.f32 %v11196_v38, %v10997_v47  ;;  %v12027_v38 = vld [vmem:[#allocation14_spill] sm:$0xff] }
 0x2fa   : > { %12023 = vst [vmem:[#allocation71_spill] sm:$0xff] %v11224_v27  ;;  %v5333_v16 = vpop.f32.mrf.mxu0 }
 0x2fb   : > { %v5334_v63 = vadd.f32 %v5333_v16, %v11070_v21  ;;  %v5055_v60 = vpop.f32.mrf.mxu1  ;;  %v5324_v21 = vadd.f32 %v5323_v10, %v11046_v3 }
 0x2fc   : > { %v5335_v31 = vpop.f32.mrf.mxu0  ;;  %v11244_v41 = vpop.permute.xlu1 %7527  ;;  %v5304_v60 = vadd.f32 %v11188_v13, %v10978_v59 }
 0x2fd   : > { %6800 = vmatprep.subr.mxu1 %v5334_v63  ;;  %v11232_v5 = vpop.permute.xlu0 %7522  ;;  %v11236_v17 = vpop.f32.mrf.mxu1 }
 0x2fe   : > { %v11238_v27 = vpop.f32.mrf.mxu0  ;;  %6801 = vmatpush3.msra.mxu1 %v5254_v32  ;;  %v11822_v54 = vunpack.i.h.bf16 %v11232_v5  ;;  %v5229_v32 = vadd.f32 %v11072_v26, %v12025_v45  ;;  %v5299_v26 = vadd.f32 %v11180_v46, %v10952_v44  ;;  %v5289_v44 = vadd.f32 %v11164_v8, %v10862_v62 }
 0x2ff   : > { %6802 = vmatprep.subr.mxu1 %v5329_v19  ;;  %v5060_v6 = vpop.f32.mrf.mxu1  ;;  %v11821_v19 = vunpack.i.h.bf16 %v11244_v41  ;;  %v5279_v62 = vadd.f32 %v11148_v37, %v10797_v58  ;;  %v12034_v58 = vld [vmem:[#allocation12_spill] sm:$0xff] }
 0x300   : > { %v5340_v16 = vpop.f32.mrf.mxu0  ;;  %6803 = vmatpush3.msra.mxu1 %v5249_v52  ;;  %v5224_v52 = vadd.f32 %v11063_v42, %v12027_v38  ;;  %v12028_v6 = vld [vmem:[#allocation17_spill] sm:$0xff]  ;;  %v12029_v42 = vld [vmem:[#allocation43_spill] sm:$0xff]  ;;  %v5664_v37 = vrot.slane %v12034_v58, 4  ;;  %v7399_v38 = vunpack.i.l.bf16 %v11124_v57 }
 0x301   : > { %6804 = vmatprep.subr.mxu1 %v5324_v21  ;;  %v11246_v29 = vpop.permute.xlu0 %7532  ;;  %v11251_v10 = vpop.f32.mrf.mxu1  ;;  %v5219_v16 = vadd.f32 %v11048_v48, %v12028_v6  ;;  %v12030_v48 = vld [vmem:[#allocation5_spill] sm:$0xff]  ;;  %v7400_v6 = vunpack.i.h.bf16 %v11124_v57 }
 0x302   : > { %12024 = vst [vmem:[#allocation72_spill] sm:$0xff] %v11246_v29  ;;  %v7534_v63 = vunpack.i.l.bf16 %v11246_v29  ;;  %v11253_v3 = vpop.f32.mrf.mxu0  ;;  %6805 = vmatpush3.msra.mxu1 %v5244_v2  ;;  %v5209_v46 = vadd.f32 %v11025_v12, %v12030_v48  ;;  %v12032_v12 = vld [vmem:[#allocation6_spill] sm:$0xff]  ;;  %v12041_v48 = vld [vmem:[#allocation19_spill] sm:$0xff] }
 0x303   : > { %6806 = vmatprep.subr.mxu1 %v5319_v23  ;;  %v5065_v31 = vpop.f32.mrf.mxu1  ;;  %v5294_v23 = vadd.f32 %v11172_v22, %v10917_v18  ;;  %v5284_v18 = vadd.f32 %v11156_v0, %v10834_v36  ;;  %v5199_v8 = vadd.f32 %v10980_v7, %v12032_v12  ;;  %v5274_v36 = vadd.f32 %v11128_v20, %v10772_v50 }
 0x304   : > { %v6012_v34 = vsel %vm5950_vm10, %v10706_v4, %v7534_v63  ;;  %v5345_v28 = vpop.f32.mrf.mxu0  ;;  %6807 = vmatpush3.msra.mxu1 %v5239_v25  ;;  %v5214_v25 = vadd.f32 %v11038_v43, %v12029_v42  ;;  %v12031_v43 = vld [vmem:[#allocation16_spill] sm:$0xff]  ;;  %v7404_v50 = vunpack.i.l.bf16 %v11138_v15 }
 0x305   : > { %6808 = vmatprep.subr.mxu1 %v5314_v49  ;;  %v6016_v55 = vsel %vm5961_vm11, %v6012_v34, %v11822_v54  ;;  %v11269_v61 = vpop.f32.mrf.mxu1  ;;  %v5204_v22 = vadd.f32 %v10999_v11, %v12031_v43  ;;  %v12033_v11 = vld [vmem:[#allocation10_spill] sm:$0xff] }
 0x306   : > { %v11271_v40 = vpop.f32.mrf.mxu0  ;;  %6809 = vmatpush3.msra.mxu1 %v5234_v33  ;;  %v11278_v47 = vsel %vm4534_vm8, %v6016_v55, %v11821_v19  ;;  %v5194_v0 = vadd.f32 %v10954_v9, %v12033_v11  ;;  %v12037_v9 = vld [vmem:[#allocation24_spill] sm:$0xff]  ;;  %v12047_v11 = vld [vmem:[#allocation21_spill] sm:$0xff]  ;;  %v12066_v19 = vld [vmem:[#allocation63_spill] sm:$0xff] }
 0x307   : > { %6810 = vmatprep.subr.mxu1 %v5309_v51  ;;  %12026 = vst [vmem:[#allocation11_spill] sm:$0xff] %v11278_v47  ;;  %v5070_v21 = vpop.f32.mrf.mxu1  ;;  %v12069_v47 = vld [vmem:[#allocation66_spill] sm:$0xff] }
 0x308   : > { %v5350_v2 = vpop.f32.mrf.mxu0  ;;  %6811 = vmatpush3.msra.mxu1 %v5229_v32 }
 0x309   : > { %6812 = vmatprep.subr.mxu1 %v5304_v60  ;;  %v11286_v59 = vpop.f32.mrf.mxu1  ;;  %v12035_v60 = vld [vmem:[#allocation28_spill] sm:$0xff] }
 0x30a   : > { %v11288_v13 = vpop.f32.mrf.mxu0  ;;  %6813 = vmatpush3.msra.mxu1 %v5224_v52  ;;  %v5269_v7 = vadd.f32 %v11120_v14, %v12035_v60  ;;  %v12036_v52 = vld [vmem:[#allocation40_spill] sm:$0xff] }
 0x30b   : > { %6814 = vmatprep.subr.mxu1 %v5299_v26  ;;  %v5075_v63 = vpop.f32.mrf.mxu1  ;;  %v5189_v21 = vadd.f32 %v10919_v1, %v12036_v52  ;;  %v5264_v26 = vadd.f32 %v11116_v24, %v12037_v9  ;;  %v12038_v14 = vld [vmem:[#allocation4_spill] sm:$0xff]  ;;  %v5259_v24 = vadd.f32 %v11112_v53, %v12041_v48 }
 0x30c   : > { %v5355_v49 = vpop.f32.mrf.mxu0  ;;  %6815 = vmatpush3.msra.mxu1 %v5219_v16  ;;  %v5184_v16 = vadd.f32 %v10864_v56, %v12038_v14  ;;  %v12051_v14 = vld [vmem:[#allocation37_spill] sm:$0xff] }
 0x30d   : > { %6816 = vmatprep.subr.mxu1 %v5294_v23  ;;  %v11298_v33 = vpop.f32.mrf.mxu1  ;;  %v7405_v23 = vunpack.i.h.bf16 %v11138_v15  ;;  %v12040_v49 = vld [vmem:[#allocation20_spill] sm:$0xff]  ;;  %v12044_v15 = vld [vmem:[#allocation3_spill] sm:$0xff] }
 0x30e   : > { %v11300_v34 = vpop.f32.mrf.mxu0  ;;  %6817 = vmatpush3.msra.mxu1 %v5214_v25  ;;  %v12039_v25 = vrot.slane %v10433_v39, 4 }
 0x30f   : > { %6818 = vmatprep.subr.mxu1 %v5289_v44  ;;  %v5080_v31 = vpop.f32.mrf.mxu1  ;;  %v5666_v44 = vrot.slane %v12040_v49, 4 }
 0x310   : > { %v5360_v28 = vpop.f32.mrf.mxu0  ;;  %6819 = vmatpush3.msra.mxu1 %v5209_v46  ;;  %v5665_v63 = vsel %vm1577_vm5, %v12039_v25, %v5664_v37  ;;  %v12042_v46 = vld [vmem:[#allocation44_spill] sm:$0xff] }
 0x311   : > { %6820 = vmatprep.subr.mxu1 %v5284_v18  ;;  %v11310_v51 = vpop.f32.mrf.mxu1  ;;  %v7409_v57 = vunpack.i.l.bf16 %v12042_v46  ;;  %v12043_v18 = vld [vmem:[#allocation42_spill] sm:$0xff]  ;;  %v5983_v56 = vsel %vm5950_vm10, %v5665_v63, %v7399_v38 }
 0x312   : > { %v11312_v55 = vpop.f32.mrf.mxu0  ;;  %6821 = vmatpush3.msra.mxu1 %v5204_v22  ;;  %v7414_v43 = vunpack.i.l.bf16 %v12043_v18  ;;  %v12045_v22 = vld [vmem:[#allocation27_spill] sm:$0xff]  ;;  %v5993_v12 = vsel %vm5961_vm11, %v5983_v56, %v7404_v50  ;;  %v7415_v60 = vunpack.i.h.bf16 %v12043_v18  ;;  %v12049_v50 = vld [vmem:[#allocation48_spill] sm:$0xff] }
 0x313   : > { %6822 = vmatprep.subr.mxu1 %v5279_v62  ;;  %v5085_v45 = vpop.f32.mrf.mxu1  ;;  %v5179_v31 = vadd.f32 %v12045_v22, %v12044_v15  ;;  %v7424_v9 = vunpack.i.l.bf16 %v12049_v50 }
 0x314   : > { %v5365_v32 = vpop.f32.mrf.mxu0  ;;  %6823 = vmatpush3.msra.mxu1 %v5199_v8  ;;  %v12046_v8 = vld [vmem:[#allocation15_spill] sm:$0xff] }
 0x315   : > { %6824 = vmatprep.subr.mxu1 %v5274_v36  ;;  %v11325_v20 = vpop.f32.mrf.mxu1  ;;  %v5952_v53 = vsel %vm5950_vm10, %v12046_v8, %v7400_v6  ;;  %v7410_v36 = vunpack.i.h.bf16 %v12042_v46  ;;  %v12048_v45 = vld [vmem:[#allocation47_spill] sm:$0xff]  ;;  %v12054_v8 = vld [vmem:[#allocation52_spill] sm:$0xff] }
 0x316   : > { %v11327_v2 = vpop.f32.mrf.mxu0  ;;  %6825 = vmatpush3.msra.mxu1 %v5194_v0  ;;  %v5668_v0 = vrot.slane %v12047_v11, 4  ;;  %v7419_v32 = vunpack.i.l.bf16 %v12048_v45  ;;  %v5963_v52 = vsel %vm5961_vm11, %v5952_v53, %v7405_v23  ;;  %v12053_v23 = vld [vmem:[#allocation18_spill] sm:$0xff]  ;;  %v7439_v53 = vunpack.i.l.bf16 %v12054_v8 }
 0x317   : > { %6826 = vmatprep.subr.mxu1 %v5269_v7  ;;  %v5090_v42 = vpop.f32.mrf.mxu1  ;;  %v5973_v18 = vsel %vm4534_vm8, %v5963_v52, %v7410_v36  ;;  %v12056_v52 = vld [vmem:[#allocation22_spill] sm:$0xff] }
 0x318   : > { %v5370_v1 = vpop.f32.mrf.mxu0  ;;  %6827 = vmatpush3.msra.mxu1 %v5189_v21  ;;  %v5667_v21 = vsel %vm1577_vm5, %v5664_v37, %v5666_v44  ;;  %v7420_v37 = vunpack.i.h.bf16 %v12048_v45  ;;  %v5669_v56 = vsel %vm1577_vm5, %v5666_v44, %v5668_v0  ;;  %v12055_v45 = vld [vmem:[#allocation9_spill] sm:$0xff] }
 0x319   : > { %6828 = vmatprep.subr.mxu1 %v5264_v26  ;;  %v11346_v28 = vpop.f32.mrf.mxu1  ;;  %v12050_v26 = vld [vmem:[#allocation46_spill] sm:$0xff]  ;;  %v5984_v42 = vsel %vm5950_vm10, %v5667_v21, %v7414_v43  ;;  %v12052_v1 = vld [vmem:[#allocation51_spill] sm:$0xff]  ;;  %v7425_v43 = vunpack.i.h.bf16 %v12049_v50  ;;  %v5672_v21 = vrot.slane %v12056_v52, 4  ;;  %v7440_v50 = vunpack.i.h.bf16 %v12054_v8 }
 0x31a   : > { %v11348_v62 = vpop.f32.mrf.mxu0  ;;  %6829 = vmatpush3.msra.mxu1 %v5184_v16  ;;  %v7429_v6 = vunpack.i.l.bf16 %v12050_v26  ;;  %v6003_v16 = vsel %vm4534_vm8, %v5993_v12, %v7409_v57  ;;  %v7434_v25 = vunpack.i.l.bf16 %v12052_v1  ;;  %v7430_v46 = vunpack.i.h.bf16 %v12050_v26 }
 0x31b   : > { %6830 = vmatprep.subr.mxu1 %v5259_v24  ;;  %v5095_v7 = vpop.f32.mrf.mxu1  ;;  %v5670_v24 = vrot.slane %v12053_v23, 4  ;;  %v5953_v57 = vsel %vm5950_vm10, %v10433_v39, %v7415_v60  ;;  %v7435_v15 = vunpack.i.h.bf16 %v12052_v1  ;;  %v5994_v12 = vsel %vm5961_vm11, %v5984_v42, %v7419_v32 }
 0x31c   : > { %v5375_v38 = vpop.f32.mrf.mxu0  ;;  %6831 = vmatpush3.msra.mxu1 %v5179_v31  ;;  %v7444_v7 = vunpack.i.l.bf16 %v12055_v45  ;;  %v6004_v36 = vsel %vm4534_vm8, %v5994_v12, %v7424_v9  ;;  %v5985_v44 = vsel %vm5950_vm10, %v5669_v56, %v7429_v6  ;;  %v5954_v32 = vsel %vm5950_vm10, %v12034_v58, %v7430_v46  ;;  %v12058_v56 = vld [vmem:[#allocation53_spill] sm:$0xff] }
 0x31d   : > { %6105 = vmatmul.mubr.f32.vlgmr.msra.gmra.mxu1 %v12051_v14  ;;  %v11365_v63 = vpop.f32.mrf.mxu1  ;;  %v5995_v60 = vsel %vm5961_vm11, %v5985_v44, %v7434_v25  ;;  %v5964_v26 = vsel %vm5961_vm11, %v5953_v57, %v7420_v37  ;;  %v5671_v9 = vsel %vm1577_vm5, %v5668_v0, %v5670_v24  ;;  %v12057_v14 = vld [vmem:[#allocation8_spill] sm:$0xff]  ;;  %v5965_v25 = vsel %vm5961_vm11, %v5954_v32, %v7435_v15 }
 0x31e   : > { %v11367_v48 = vpop.f32.mrf.mxu0  ;;  %6109 = vmatprep.mubr.f32.mxu1 %v6003_v16  ;;  %v7449_v6 = vunpack.i.l.bf16 %v12057_v14  ;;  %v7445_v16 = vunpack.i.h.bf16 %v12055_v45  ;;  %v11401_v46 = vsel %vm4534_vm8, %v5995_v60, %v7439_v53  ;;  %v5986_v0 = vsel %vm5950_vm10, %v5671_v9, %v7444_v7  ;;  %v12060_v37 = vld [vmem:[#allocation56_spill] sm:$0xff] }
 0x31f   : > { %v5100_v22 = vpop.f32.mrf.mxu1  ;;  %v7464_v57 = vunpack.i.l.bf16 %v12060_v37  ;;  %v7450_v45 = vunpack.i.h.bf16 %v12057_v14  ;;  %v11414_v44 = vsel %vm4534_vm8, %v5965_v25, %v7440_v50  ;;  %v5673_v53 = vsel %vm1577_vm5, %v5670_v24, %v5672_v21 }
 0x320   : > { %v5380_v31 = vpop.f32.mrf.mxu0  ;;  %v7454_v22 = vunpack.i.l.bf16 %v12058_v56  ;;  %v5955_v7 = vsel %vm5950_vm10, %v12040_v49, %v7445_v16  ;;  %v7455_v60 = vunpack.i.h.bf16 %v12058_v56  ;;  %v7465_v32 = vunpack.i.h.bf16 %v12060_v37  ;;  %v12064_v37 = vld [vmem:[#allocation59_spill] sm:$0xff] }
 0x321   : > { %6110 = vmatmul.mubr.f32.gmra.mxu1 %v5973_v18  ;;  %v11383_v38 = vpop.f32.mrf.mxu1  ;;  %v5974_v18 = vsel %vm4534_vm8, %v5964_v26, %v7425_v43  ;;  %v12059_v31 = vld [vmem:[#allocation54_spill] sm:$0xff]  ;;  %v12061_v43 = vld [vmem:[#allocation23_spill] sm:$0xff]  ;;  %v5676_v25 = vrot.slane %v10706_v4, 4 }
 0x322   : > { %v11385_v39 = vpop.f32.mrf.mxu0  ;;  %6114 = vmatprep.mubr.f32.mxu1 %v6004_v36  ;;  %v7459_v58 = vunpack.i.l.bf16 %v12059_v31  ;;  %v5674_v15 = vrot.slane %v12061_v43, 4  ;;  %v7460_v36 = vunpack.i.h.bf16 %v12059_v31 }
 0x323   : > { %v5105_v42 = vpop.f32.mrf.mxu1 }
 0x324   : > { %v5385_v1 = vpop.f32.mrf.mxu0  ;;  %v5996_v42 = vsel %vm5961_vm11, %v5986_v0, %v7449_v6  ;;  %v5987_v24 = vsel %vm5950_vm10, %v5673_v53, %v7459_v58  ;;  %v5956_v6 = vsel %vm5950_vm10, %v12047_v11, %v7460_v36  ;;  %v5966_v0 = vsel %vm5961_vm11, %v5955_v7, %v7450_v45  ;;  %v12067_v36 = vld [vmem:[#allocation65_spill] sm:$0xff] }
 0x325   : > { %6115 = vmatmul.mubr.f32.gmra.mxu1 %v5974_v18  ;;  %v11405_v12 = vpop.f32.mrf.mxu1  ;;  %v12062_v1 = vld [vmem:[#allocation57_spill] sm:$0xff]  ;;  %v12063_v18 = vld [vmem:[#allocation60_spill] sm:$0xff]  ;;  %v11426_v50 = vsel %vm4534_vm8, %v5996_v42, %v7454_v22  ;;  %v5997_v16 = vsel %vm5961_vm11, %v5987_v24, %v7464_v57  ;;  %v5675_v22 = vsel %vm1577_vm5, %v5672_v21, %v5674_v15  ;;  %v5967_v57 = vsel %vm5961_vm11, %v5956_v6, %v7465_v32  ;;  %v12065_v42 = vld [vmem:[#allocation62_spill] sm:$0xff] }
 0x326   : > { %v11407_v8 = vpop.f32.mrf.mxu0  ;;  %6119 = vmatprep.mubr.f32.mxu1 %v11401_v46  ;;  %v7469_v14 = vunpack.i.l.bf16 %v12062_v1  ;;  %v7474_v31 = vunpack.i.l.bf16 %v12063_v18  ;;  %v7470_v56 = vunpack.i.h.bf16 %v12062_v1  ;;  %v7475_v58 = vunpack.i.h.bf16 %v12063_v18 }
 0x327   : > { %v5110_v26 = vpop.f32.mrf.mxu1  ;;  %v7484_v24 = vunpack.i.l.bf16 %v12065_v42  ;;  %v7489_v11 = vunpack.i.l.bf16 %v12066_v19  ;;  %v7494_v7 = vunpack.i.l.bf16 %v12067_v36  ;;  %v7480_v32 = vunpack.i.h.bf16 %v12064_v37 }
 0x328   : > { %v5390_v9 = vpop.f32.mrf.mxu0  ;;  %v7479_v26 = vunpack.i.l.bf16 %v12064_v37  ;;  %v11449_v45 = vsel %vm4534_vm8, %v5997_v16, %v7469_v14  ;;  %v5988_v21 = vsel %vm5950_vm10, %v5675_v22, %v7474_v31  ;;  %v7490_v6 = vunpack.i.h.bf16 %v12066_v19  ;;  %v12070_v37 = vld [vmem:[#allocation69_spill] sm:$0xff] }
 0x329   : > { %6120 = vmatmul.mubr.f32.gmra.mxu1 %v11414_v44  ;;  %v11442_v9 = vsel %vm4534_vm8, %v5966_v0, %v7455_v60  ;;  %v12068_v60 = vld [vmem:[#allocation29_spill] sm:$0xff]  ;;  %v11460_v0 = vsel %vm4534_vm8, %v5967_v57, %v7470_v56  ;;  %v5677_v14 = vsel %vm1577_vm5, %v5674_v15, %v5676_v25  ;;  %v5957_v31 = vsel %vm5950_vm10, %v12053_v23, %v7475_v58 }
 0x32a   : > { %v11429_v49 = vpop.f32.mrf.mxu0  ;;  %6124 = vmatprep.mubr.f32.mxu1 %v11426_v50  ;;  %v5678_v18 = vrot.slane %v12068_v60, 4  ;;  %v7485_v16 = vunpack.i.h.bf16 %v12065_v42  ;;  %v7495_v22 = vunpack.i.h.bf16 %v12067_v36  ;;  %v5998_v54 = vsel %vm5961_vm11, %v5988_v21, %v7479_v26  ;;  %v12071_v21 = vld [vmem:[#allocation31_spill] sm:$0xff] }
 0x32b   : > { %v7499_v60 = vunpack.i.l.bf16 %v12069_v47  ;;  %v7504_v29 = vunpack.i.l.bf16 %v12070_v37  ;;  %v11472_v19 = vsel %vm4534_vm8, %v5998_v54, %v7484_v24  ;;  %v5989_v15 = vsel %vm5950_vm10, %v5677_v14, %v7489_v11  ;;  %v12072_v24 = vld [vmem:[#allocation68_spill] sm:$0xff] }
 0x32c   : > { %v5395_v53 = vpop.f32.mrf.mxu0  ;;  %v5999_v23 = vsel %vm5961_vm11, %v5989_v15, %v7494_v7  ;;  %v5679_v58 = vsel %vm1577_vm5, %v5676_v25, %v5678_v18  ;;  %v5958_v26 = vsel %vm5950_vm10, %v12056_v52, %v7490_v6  ;;  %v7500_v57 = vunpack.i.h.bf16 %v12069_v47 }
 0x32d   : > { %6125 = vmatmul.mubr.f32.gmra.mxu1 %v11442_v9  ;;  %v5968_v42 = vsel %vm5961_vm11, %v5957_v31, %v7480_v32  ;;  %v11824_v54 = vrot.slane %v12071_v21, 4  ;;  %v7509_v36 = vunpack.i.l.bf16 %v12072_v24  ;;  %v7505_v11 = vunpack.i.h.bf16 %v12070_v37 }
 0x32e   : > { %v11453_v1 = vpop.f32.mrf.mxu0  ;;  %6129 = vmatprep.mubr.f32.mxu1 %v11449_v45  ;;  %v5969_v7 = vsel %vm5961_vm11, %v5958_v26, %v7495_v22  ;;  %v7514_v25 = vunpack.i.l.bf16 %v11222_v30  ;;  %v7519_v52 = vunpack.i.l.bf16 %v11226_v35  ;;  %v11495_v47 = vsel %vm4534_vm8, %v5999_v23, %v7499_v60 }
 0x32f   : > { %v5990_v32 = vsel %vm5950_vm10, %v5679_v58, %v7504_v29  ;;  %v7524_v6 = vunpack.i.l.bf16 %v11232_v5  ;;  %v11504_v22 = vsel %vm4534_vm8, %v5969_v7, %v7500_v57  ;;  %v5681_v37 = vsel %vm1577_vm5, %v5678_v18, %v11824_v54 }
 0x330   : > { %v5400_v53 = vpop.f32.mrf.mxu0  ;;  %v5959_v60 = vsel %vm5950_vm10, %v12061_v43, %v7505_v11  ;;  %v7515_v29 = vunpack.i.h.bf16 %v11222_v30  ;;  %v7520_v15 = vunpack.i.h.bf16 %v11226_v35  ;;  %v6000_v58 = vsel %vm5961_vm11, %v5990_v32, %v7509_v36 }
 0x331   : > { %6130 = vmatmul.mubr.f32.gmra.mxu1 %v11460_v0  ;;  %v11488_v53 = vsel %vm4534_vm8, %v5968_v42, %v7485_v16  ;;  %v7510_v16 = vunpack.i.h.bf16 %v12072_v24  ;;  %v7529_v26 = vunpack.i.l.bf16 %v11244_v41  ;;  %v11517_v57 = vsel %vm4534_vm8, %v6000_v58, %v7514_v25 }
 0x332   : > { %v11475_v56 = vpop.f32.mrf.mxu0  ;;  %6134 = vmatprep.mubr.f32.mxu1 %v11472_v19  ;;  %v5991_v42 = vsel %vm5950_vm10, %v5681_v37, %v7519_v52  ;;  %v5960_v35 = vsel %vm5950_vm10, %v10706_v4, %v7520_v15  ;;  %v12076_v4 = vunpack.i.h.bf16 %v11244_v41 }
 0x333   : > { %v6001_v43 = vsel %vm5961_vm11, %v5991_v42, %v7524_v6  ;;  %v5970_v30 = vsel %vm5961_vm11, %v5959_v60, %v7510_v16 }
 0x334   : > { %v5405_v14 = vpop.f32.mrf.mxu0  ;;  %v11526_v36 = vsel %vm4534_vm8, %v5970_v30, %v7515_v29  ;;  %v11530_v11 = vsel %vm4534_vm8, %v6001_v43, %v7529_v26 }
 0x335   : > { %6135 = vmatmul.mubr.f32.gmra.mxu1 %v11488_v53  ;;  %12073 = vst [vmem:[#allocation14_spill] sm:$0xff] %v11526_v36  ;;  %12074 = vst [vmem:[#allocation17_spill] sm:$0xff] %v11530_v11  ;;  %v12075_v14 = vunpack.i.h.bf16 %v11232_v5 }
 0x336   : > { %v11499_v31 = vpop.f32.mrf.mxu0  ;;  %6139 = vmatprep.mubr.f32.mxu1 %v11495_v47 }
 0x337   : > { %v5971_v7 = vsel %vm5961_vm11, %v5960_v35, %v12075_v14 }
 0x338   : > { %v5410_v23 = vpop.f32.mrf.mxu0  ;;  %v5981_v32 = vsel %vm4534_vm8, %v5971_v7, %v12076_v4 }
 0x339   : > { %6140 = vmatmul.mubr.f32.gmra.mxu1 %v11504_v22 }
 0x33a   : > { %v5413_v18 = vpop.f32.mrf.mxu0  ;;  %6144 = vmatprep.mubr.f32.mxu1 %v11517_v57 }
 0x33c   : > { %v5415_v24 = vpop.f32.mrf.mxu0 }
 0x33d   : > { %6145 = vmatmul.mubr.f32.gmra.mxu1 %v11526_v36 }
 0x33e   : > { %v11535_v25 = vpop.f32.mrf.mxu0  ;;  %6149 = vmatprep.mubr.f32.mxu1 %v11530_v11 }
 0x340   : > { %v5420_v52 = vpop.f32.mrf.mxu0 }
 0x341   : > { %6150 = vmatmul.mubr.f32.gmra.mxu1 %v5981_v32 }
 0x342   : > { %v11541_v6 = vpop.f32.mrf.mxu0  ;;  %6219 = vmatprep.mubr.f32.mxu1 %v11401_v46 }
 0x344   : > { %v5425_v16 = vpop.f32.mrf.mxu0 }
 0x346   : > { %v11544_v37 = vpop.f32.mrf.mxu0 }
 0x348   : > { %v5430_v5 = vpop.f32.mrf.mxu0 }
 0x34a   : > { %v11546_v60 = vpop.f32.mrf.mxu0 }
 0x34c   : > { %v5435_v29 = vpop.f32.mrf.mxu0 }
 0x34e   : > { %v11548_v15 = vpop.f32.mrf.mxu0 }
 0x350   : > { %v5440_v23 = vpop.f32.mrf.mxu0 }
 0x352   : > { %v5443_v58 = vpop.f32.mrf.mxu0 }
 0x354   : > { %v5445_v26 = vpop.f32.mrf.mxu0 }
 0x356   : > { %v5448_v41 = vpop.f32.mrf.mxu0 }
 0x358   : > { %v5450_v42 = vpop.f32.mrf.mxu0 }
 0x359   : > { %v12077_v42 = vld [vmem:[#allocation58_spill] sm:$0xff] }
 0x35a   : > { %v5453_v43 = vpop.f32.mrf.mxu0  ;;  %v5414_v21 = vadd.f32 %v5413_v18, %v12077_v42  ;;  %v12095_v42 = vld [vmem:[#allocation30_spill] sm:$0xff] }
 0x35c   : > { %v5455_v30 = vpop.f32.mrf.mxu0 }
 0x35e   : > { %v5458_v35 = vpop.f32.mrf.mxu0 }
 0x360   : > { %v5460_v24 = vpop.f32.mrf.mxu0 }
 0x362   : > { %v5463_v14 = vpop.f32.mrf.mxu0 }
 0x364   : > { %v5465_v46 = vpop.f32.mrf.mxu0 }
 0x365   : > { %v12078_v46 = vld [vmem:[#allocation55_spill] sm:$0xff] }
 0x366   : > { %v5468_v7 = vpop.f32.mrf.mxu0 }
 0x368   : > { %v5470_v52 = vpop.f32.mrf.mxu0 }
 0x369   : > { %v5409_v52 = vadd.f32 %v11499_v31, %v12078_v46  ;;  %v12082_v31 = vld [vmem:[#allocation25_spill] sm:$0xff] }
 0x36a   : > { %v5473_v4 = vpop.f32.mrf.mxu0 }
 0x36c   : > { %v5475_v32 = vpop.f32.mrf.mxu0 }
 0x36e   : > { %v5478_v16 = vpop.f32.mrf.mxu0 }
 0x370   : > { %v5480_v5 = vpop.f32.mrf.mxu0 }
 0x371   : > { %v12079_v5 = vld [vmem:[#allocation2_spill] sm:$0xff] }
 0x372   : > { %v5483_v29 = vpop.f32.mrf.mxu0 }
 0x373   : > { %v5484_v32 = vadd.f32 %v5483_v29, %v11365_v63  ;;  %v5469_v63 = vadd.f32 %v5468_v7, %v11310_v51  ;;  %v5454_v51 = vadd.f32 %v5453_v43, %v11269_v61  ;;  %v12085_v7 = vld [vmem:[#allocation13_spill] sm:$0xff]  ;;  %v12088_v61 = vld [vmem:[#allocation71_spill] sm:$0xff]  ;;  %v12093_v29 = vld [vmem:[#allocation38_spill] sm:$0xff] }
 0x374   : > { %v5485_v54 = vpop.f32.mrf.mxu0  ;;  %v5439_v43 = vadd.f32 %v11548_v15, %v12088_v61  ;;  %v5349_v15 = vadd.f32 %v11271_v40, %v12093_v29  ;;  %v7543_v40 = vpop.permute.xlu1 %7542 }
 0x375   : > { %v5404_v54 = vadd.f32 %v11475_v56, %v12079_v5  ;;  %v5389_v56 = vadd.f32 %v11407_v8, %v12082_v31  ;;  %v5374_v8 = vadd.f32 %v11348_v62, %v12085_v7  ;;  %v12089_v62 = vld [vmem:[#allocation7_spill] sm:$0xff] }
 0x376   : > { %v5488_v11 = vpop.f32.mrf.mxu0 }
 0x377   : > { %v5489_v24 = vadd.f32 %v5488_v11, %v11383_v38  ;;  %v5474_v38 = vadd.f32 %v5473_v4, %v11325_v20  ;;  %v12083_v11 = vld [vmem:[#allocation45_spill] sm:$0xff]  ;;  %v5459_v20 = vadd.f32 %v5458_v35, %v11286_v59  ;;  %v5444_v59 = vadd.f32 %v5443_v58, %v11236_v17  ;;  %v12087_v35 = vld [vmem:[#allocation39_spill] sm:$0xff] }
 0x378   : > { %v5490_v23 = vpop.f32.mrf.mxu0  ;;  %v12084_v4 = vld [vmem:[#allocation41_spill] sm:$0xff]  ;;  %v12092_v58 = vld [vmem:[#allocation67_spill] sm:$0xff] }
 0x379   : > { %v5479_v23 = vadd.f32 %v5478_v16, %v11346_v28  ;;  %v5464_v28 = vadd.f32 %v5463_v14, %v11298_v33  ;;  %v5449_v33 = vadd.f32 %v5448_v41, %v11251_v10  ;;  %v12086_v14 = vld [vmem:[#allocation35_spill] sm:$0xff]  ;;  %v5359_v16 = vadd.f32 %v11300_v34, %v12089_v62  ;;  %v12090_v10 = vld [vmem:[#allocation70_spill] sm:$0xff] }
 0x37a   : > { %v5493_v36 = vpop.f32.mrf.mxu0  ;;  %v5434_v41 = vadd.f32 %v11546_v60, %v12090_v10  ;;  %v5344_v60 = vadd.f32 %v11253_v3, %v12095_v42  ;;  %v7548_v3 = vpop.permute.xlu1 %7547  ;;  %v12108_v10 = vld [vmem:[#allocation33_spill] sm:$0xff] }
 0x37b   : > { %v5494_v26 = vadd.f32 %v5493_v36, %v11405_v12  ;;  %v12080_v12 = vld [vmem:[#allocation49_spill] sm:$0xff]  ;;  %v12081_v36 = vld [vmem:[#allocation50_spill] sm:$0xff] }
 0x37c   : > { %v5495_v30 = vpop.f32.mrf.mxu0  ;;  %v5399_v18 = vadd.f32 %v11453_v1, %v12080_v12  ;;  %v5384_v1 = vadd.f32 %v11385_v39, %v12083_v11  ;;  %v5369_v39 = vadd.f32 %v11327_v2, %v12086_v14  ;;  %v12091_v2 = vld [vmem:[#allocation36_spill] sm:$0xff] }
 0x37d   : > { %6862 = vmatprep.subr.mxu1 %v5494_v26  ;;  %v5354_v17 = vadd.f32 %v11288_v13, %v12091_v2  ;;  %v12094_v26 = vld [vmem:[#allocation64_spill] sm:$0xff]  ;;  %v12096_v30 = vld [vmem:[#allocation61_spill] sm:$0xff] }
 0x37e   : > { %6863 = vmatpush3.msra.mxu1 %v5414_v21  ;;  %v5394_v21 = vadd.f32 %v11429_v49, %v12081_v36  ;;  %v5379_v49 = vadd.f32 %v11367_v48, %v12084_v4  ;;  %v5364_v48 = vadd.f32 %v11312_v55, %v12087_v35  ;;  %v5429_v55 = vadd.f32 %v11544_v37, %v12092_v58 }
 0x37f   : > { %6864 = vmatprep.subr.mxu1 %v5489_v24  ;;  %v5424_v34 = vadd.f32 %v11541_v6, %v12094_v26  ;;  %v5419_v13 = vadd.f32 %v11535_v25, %v12096_v30  ;;  %v12097_v24 = vld [vmem:[#allocation34_spill] sm:$0xff]  ;;  %v7538_v6 = vpop.permute.xlu0 %7537 }
 0x380   : > { %6865 = vmatpush3.msra.mxu1 %v5409_v52  ;;  %v5339_v37 = vadd.f32 %v11238_v27, %v12097_v24  ;;  %v7553_v27 = vpop.permute.xlu1 %7552  ;;  %v12099_v52 = vld [vmem:[#allocation72_spill] sm:$0xff] }
 0x381   : > { %6866 = vmatprep.subr.mxu1 %v5484_v32  ;;  %v7554_v12 = vunpack.i.l.bf16 %v7553_v27  ;;  %v7555_v35 = vunpack.i.h.bf16 %v7553_v27 }
 0x382   : > { %6867 = vmatpush3.msra.mxu1 %v5404_v54 }
 0x383   : > { %6868 = vmatprep.subr.mxu1 %v5479_v23  ;;  %v7558_v25 = vpop.permute.xlu0 %7557  ;;  %v7540_v23 = vunpack.i.h.bf16 %v7538_v6 }
 0x384   : > { %6869 = vmatpush3.msra.mxu1 %v5399_v18  ;;  %v5859_v5 = vpop.permute.xlu1 %5858  ;;  %v7560_v2 = vunpack.i.h.bf16 %v7558_v25 }
 0x385   : > { %6870 = vmatprep.subr.mxu1 %v5474_v38  ;;  %v12103_v38 = vld [vmem:[#allocation29_spill] sm:$0xff] }
 0x386   : > { %6871 = vmatpush3.msra.mxu1 %v5394_v21  ;;  %v12104_v21 = vld [vmem:[#allocation17_spill] sm:$0xff] }
 0x387   : > { %6872 = vmatprep.subr.mxu1 %v5469_v63  ;;  %v7563_v32 = vpop.permute.xlu0 %7562  ;;  %v7544_v63 = vunpack.i.l.bf16 %v7543_v40 }
 0x388   : > { %6873 = vmatpush3.msra.mxu1 %v5389_v56  ;;  %v12105_v56 = vld [vmem:[#allocation26_spill] sm:$0xff]  ;;  %v7565_v4 = vunpack.i.h.bf16 %v7563_v32 }
 0x389   : > { %6874 = vmatprep.subr.mxu1 %v5464_v28  ;;  %v12106_v28 = vrot.slane %v12105_v56, 4 }
 0x38a   : > { %6875 = vmatpush3.msra.mxu1 %v5384_v1  ;;  %v7559_v1 = vunpack.i.l.bf16 %v7558_v25 }
 0x38b   : > { %6876 = vmatprep.subr.mxu1 %v5459_v20  ;;  %v7568_v31 = vpop.permute.xlu0 %7567 }
 0x38c   : > { %6877 = vmatpush3.msra.mxu1 %v5379_v49  ;;  %v12107_v49 = vld [vmem:[#allocation11_spill] sm:$0xff]  ;;  %v7570_v62 = vunpack.i.h.bf16 %v7568_v31 }
 0x38d   : > { %6878 = vmatprep.subr.mxu1 %v5454_v51 }
 0x38e   : > { %6879 = vmatpush3.msra.mxu1 %v5374_v8 }
 0x38f   : > { %6880 = vmatprep.subr.mxu1 %v5449_v33  ;;  %v7545_v33 = vunpack.i.h.bf16 %v7543_v40 }
 0x390   : > { %6881 = vmatpush3.msra.mxu1 %v5369_v39  ;;  %v7573_v39 = vpop.permute.xlu1 %7572 }
 0x391   : > { %6882 = vmatprep.subr.mxu1 %v5444_v59  ;;  %v7569_v59 = vunpack.i.l.bf16 %v7568_v31 }
 0x392   : > { %6883 = vmatpush3.msra.mxu1 %v5364_v48 }
 0x393   : > { %6884 = vmatprep.subr.mxu1 %v5439_v43  ;;  %v7574_v43 = vunpack.i.l.bf16 %v7573_v39 }
 0x394   : > { %6885 = vmatpush3.msra.mxu1 %v5359_v16 }
 0x395   : > { %6886 = vmatprep.subr.mxu1 %v5434_v41  ;;  %v6026_v41 = vsel %vm5950_vm10, %v12108_v10, %v7565_v4 }
 0x396   : > { %6887 = vmatpush3.msra.mxu1 %v5354_v17  ;;  %v6029_v17 = vsel %vm5961_vm11, %v6026_v41, %v7569_v59 }
 0x397   : > { %6888 = vmatprep.subr.mxu1 %v5429_v55  ;;  %v7575_v55 = vunpack.i.h.bf16 %v7573_v39  ;;  %v6032_v26 = vsel %vm4534_vm8, %v6029_v17, %v7574_v43 }
 0x398   : > { %6889 = vmatpush3.msra.mxu1 %v5349_v15 }
 0x399   : > { %6890 = vmatprep.subr.mxu1 %v5424_v34 }
 0x39a   : > { %6891 = vmatpush3.msra.mxu1 %v5344_v60 }
 0x39b   : > { %6892 = vmatprep.subr.mxu1 %v5419_v13 }
 0x39c   : > { %6893 = vmatpush3.msra.mxu1 %v5339_v37 }
 0x39d   : > { %6220 = vmatmul.mubr.f32.vlgmr.msra.gmra.mxu1 %v11414_v44  ;;  %v12098_v44 = vld [vmem:[#allocation32_spill] sm:$0xff] }
 0x39e   : > { %6224 = vmatprep.mubr.f32.mxu1 %v11426_v50  ;;  %v5896_v46 = vrot.slane %v12098_v44, 4  ;;  %v7535_v50 = vunpack.i.h.bf16 %v12099_v52  ;;  %v6015_v58 = vsel %vm5950_vm10, %v12098_v44, %v5859_v5 }
 0x39f   : > { %v6019_v15 = vsel %vm5961_vm11, %v6015_v58, %v7570_v62 }
 0x3a0   : > { %v5899_v11 = vsel %vm1577_vm5, %v5896_v46, %v12106_v28  ;;  %v6023_v34 = vsel %vm4534_vm8, %v6019_v15, %v7575_v55 }
 0x3a1   : > { %6225 = vmatmul.mubr.f32.gmra.mxu1 %v11442_v9  ;;  %v7539_v9 = vunpack.i.l.bf16 %v7538_v6 }
 0x3a2   : > { %6229 = vmatprep.mubr.f32.mxu1 %v11449_v45  ;;  %v7549_v45 = vunpack.i.l.bf16 %v7548_v3 }
 0x3a4   : > { %v6013_v36 = vsel %vm5950_vm10, %v12103_v38, %v7549_v45 }
 0x3a5   : > { %6230 = vmatmul.mubr.f32.gmra.mxu1 %v11460_v0  ;;  %v7550_v0 = vunpack.i.h.bf16 %v7548_v3  ;;  %v6017_v7 = vsel %vm5961_vm11, %v6013_v36, %v7540_v23 }
 0x3a6   : > { %6234 = vmatprep.mubr.f32.mxu1 %v11472_v19  ;;  %v12100_v19 = vld [vmem:[#allocation31_spill] sm:$0xff]  ;;  %v6021_v48 = vsel %vm4534_vm8, %v6017_v7, %v7545_v33 }
 0x3a7   : > { %v12101_v54 = vrot.slane %v12100_v19, 4  ;;  %v6025_v20 = vsel %vm5950_vm10, %v5899_v11, %v7550_v0 }
 0x3a8   : > { %v6028_v8 = vsel %vm5961_vm11, %v6025_v20, %v7554_v12 }
 0x3a9   : > { %6235 = vmatmul.mubr.f32.gmra.mxu1 %v11488_v53  ;;  %v5897_v53 = vsel %vm1577_vm5, %v12101_v54, %v5896_v46  ;;  %v6031_v61 = vsel %vm4534_vm8, %v6028_v8, %v7559_v1 }
 0x3aa   : > { %6239 = vmatprep.mubr.f32.mxu1 %v11495_v47  ;;  %v12102_v47 = vld [vmem:[#allocation14_spill] sm:$0xff]  ;;  %v6024_v18 = vsel %vm5950_vm10, %v5897_v53, %v7535_v50 }
 0x3ad   : > { %6240 = vmatmul.mubr.f32.gmra.mxu1 %v11504_v22  ;;  %v7564_v22 = vunpack.i.l.bf16 %v7563_v32 }
 0x3ae   : > { %6244 = vmatprep.mubr.f32.mxu1 %v11517_v57  ;;  %v6027_v57 = vsel %vm5961_vm11, %v6024_v18, %v7539_v9 }
 0x3af   : > { %v6030_v51 = vsel %vm4534_vm8, %v6027_v57, %v7544_v63  ;;  %v6014_v14 = vsel %vm5950_vm10, %v12100_v19, %v7564_v22 }
 0x3b0   : > { %v6018_v16 = vsel %vm5961_vm11, %v6014_v14, %v7555_v35 }
 0x3b1   : > { %6245 = vmatmul.mubr.f32.gmra.mxu1 %v12102_v47  ;;  %v6022_v29 = vsel %vm4534_vm8, %v6018_v16, %v7560_v2  ;;  %v11660_v47 = vld [vmem:[%s11717_s8] ss:$0 sm:$0xff] }
 0x3b2   : > { %6249 = vmatprep.mubr.f32.mxu1 %v12104_v21 }
 0x3b5   : > { %6250 = vmatmul.mubr.f32.gmra.mxu1 %v12107_v49 }
 0x3b6   : > { %6254 = vmatprep.mubr.f32.mxu1 %v6030_v51 }
 0x3b9   : > { %6255 = vmatmul.mubr.f32.gmra.mxu1 %v6021_v48 }
 0x3ba   : > { %6259 = vmatprep.mubr.f32.mxu1 %v6031_v61 }
 0x3bd   : > { %6260 = vmatmul.mubr.f32.gmra.mxu1 %v6022_v29 }
 0x3be   : > { %6264 = vmatprep.mubr.f32.mxu1 %v6032_v26 }
 0x3c1   : > { %6265 = vmatmul.mubr.f32.gmra.mxu1 %v6023_v34 }
 0x3dd   : > { %v6832_v42 = vpop.f32.mrf.mxu1 }
 0x3df   : > { %v6833_v60 = vpop.f32.mrf.mxu1 }
 0x3e0   : > { %v6834_v12 = vadd.f32 %v6833_v60, %v6832_v42 }
 0x3e1   : > { %v6835_v30 = vpop.f32.mrf.mxu1 }
 0x3e2   : > { %v6107_v63 = vadd.f32 %v6834_v12, %v11660_v47 }
 0x3e3   : > { %v6836_v13 = vpop.f32.mrf.mxu1 }
 0x3e4   : > { %v6837_v53 = vadd.f32 %v6836_v13, %v6835_v30 }
 0x3e5   : > { %v6838_v24 = vpop.f32.mrf.mxu1 }
 0x3e6   : > { %v6112_v36 = vadd.f32 %v6837_v53, %v11660_v47 }
 0x3e7   : > { %v6839_v37 = vpop.f32.mrf.mxu1 }
 0x3e8   : > { %v6840_v18 = vadd.f32 %v6839_v37, %v6838_v24 }
 0x3e9   : > { %v6841_v40 = vpop.f32.mrf.mxu1 }
 0x3ea   : > { %v6117_v56 = vadd.f32 %v6840_v18, %v11660_v47 }
 0x3eb   : > { %v6842_v6 = vpop.f32.mrf.mxu1 }
 0x3ec   : > { %v6843_v11 = vadd.f32 %v6842_v6, %v6841_v40 }
 0x3ed   : > { %v6844_v3 = vpop.f32.mrf.mxu1 }
 0x3ee   : > { %v6122_v33 = vadd.f32 %v6843_v11, %v11660_v47 }
 0x3ef   : > { %v6845_v25 = vpop.f32.mrf.mxu1 }
 0x3f0   : > { %v6846_v14 = vadd.f32 %v6845_v25, %v6844_v3 }
 0x3f1   : > { %v6847_v27 = vpop.f32.mrf.mxu1 }
 0x3f2   : > { %v6127_v43 = vadd.f32 %v6846_v14, %v11660_v47 }
 0x3f3   : > { %v6848_v44 = vpop.f32.mrf.mxu1 }
 0x3f4   : > { %v6849_v62 = vadd.f32 %v6848_v44, %v6847_v27 }
 0x3f5   : > { %v6850_v46 = vpop.f32.mrf.mxu1 }
 0x3f6   : > { %v6132_v29 = vadd.f32 %v6849_v62, %v11660_v47 }
 0x3f7   : > { %v6851_v52 = vpop.f32.mrf.mxu1 }
 0x3f8   : > { %v6852_v15 = vadd.f32 %v6851_v52, %v6850_v46 }
 0x3f9   : > { %v11645_v50 = vpop.f32.mrf.mxu1 }
 0x3fa   : > { %v6137_v24 = vadd.f32 %v6852_v15, %v11660_v47 }
 0x3fb   : > { %v11647_v32 = vpop.f32.mrf.mxu1 }
 0x3fc   : > { %v6855_v3 = vadd.f32 %v11647_v32, %v11645_v50 }
 0x3fd   : > { %v11649_v9 = vpop.f32.mrf.mxu1 }
 0x3fe   : > { %v6142_v53 = vadd.f32 %v6855_v3, %v11660_v47 }
 0x3ff   : > { %v11651_v45 = vpop.f32.mrf.mxu1 }
 0x400   : > { %v6858_v44 = vadd.f32 %v11651_v45, %v11649_v9 }
 0x401   : > { %v11653_v0 = vpop.f32.mrf.mxu1 }
 0x402   : > { %v6147_v50 = vadd.f32 %v6858_v44, %v11660_v47 }
 0x403   : > { %v11655_v5 = vpop.f32.mrf.mxu1 }
 0x404   : > { %v6861_v32 = vadd.f32 %v11655_v5, %v11653_v0 }
 0x45d   : > { %v6894_v19 = vpop.f32.mrf.mxu1 }
 0x45f   : > { %v6895_v54 = vpop.f32.mrf.mxu1 }
 0x460   : > { %v6896_v22 = vadd.f32 %v6895_v54, %v6894_v19 }
 0x461   : > { %v6897_v23 = vpop.f32.mrf.mxu1 }
 0x462   : > { %v6222_v1 = vadd.f32 %v6896_v22, %v6107_v63  ;;  %v6152_v22 = vadd.f32 %v6861_v32, %v11660_v47 }
 0x463   : > { %v6898_v38 = vpop.f32.mrf.mxu1 }
 0x464   : > { %v6899_v21 = vadd.f32 %v6898_v38, %v6897_v23 }
 0x465   : > { %v6900_v57 = vpop.f32.mrf.mxu1 }
 0x466   : > { %v6227_v31 = vadd.f32 %v6899_v21, %v6112_v36 }
 0x467   : > { %v6901_v28 = vpop.f32.mrf.mxu1 }
 0x468   : > { %v6272_v20 = vrot.slane %v6227_v31, 5  ;;  %v6902_v4 = vadd.f32 %v6901_v28, %v6900_v57 }
 0x469   : > { %v6903_v49 = vpop.f32.mrf.mxu1 }
 0x46a   : > { %v6300_v51 = vsel %vm470_vm1, %v6222_v1, %v6272_v20  ;;  %v6232_v7 = vadd.f32 %v6902_v4, %v6117_v56 }
 0x46b   : > { %6307 = vst.msk [vmem:[%s11669_s21] sm:$0xff] %vm6306_vm12, %v6300_v51  ;;  %v6904_v8 = vpop.f32.mrf.mxu1 }
 0x46c   : > { %v6905_v39 = vadd.f32 %v6904_v8, %v6903_v49  ;;  %v6273_v59 = vrot.slane %v6232_v7, 5 }
 0x46d   : > { %v6906_v35 = vpop.f32.mrf.mxu1 }
 0x46e   : > { %v6237_v48 = vadd.f32 %v6905_v39, %v6122_v33  ;;  %v6274_v41 = vsel %vm1769_vm6, %v6272_v20, %v6273_v59 }
 0x46f   : > { %v6907_v61 = vpop.f32.mrf.mxu1 }
 0x470   : > { %v6278_v16 = vrot.slane %v6237_v48, 2  ;;  %v6908_v10 = vadd.f32 %v6907_v61, %v6906_v35 }
 0x471   : > { %v6909_v2 = vpop.f32.mrf.mxu1 }
 0x472   : > { %v6301_v17 = vsel %vm821_vm2, %v6274_v41, %v6278_v16  ;;  %v6242_v58 = vadd.f32 %v6908_v10, %v6127_v43 }
 0x473   : > { %6308 = vst.msk [vmem:[%s11669_s21 + $0x8] sm:$0xff] %vm6306_vm12, %v6301_v17  ;;  %v6910_v55 = vpop.f32.mrf.mxu1 }
 0x474   : > { %v6282_v26 = vrot.slane %v6242_v58, 7  ;;  %v6911_v34 = vadd.f32 %v6910_v55, %v6909_v2 }
 0x475   : > { %v6912_v42 = vpop.f32.mrf.mxu1 }
 0x476   : > { %v6302_v60 = vsel %vm5608_vm9, %v6278_v16, %v6282_v26  ;;  %v6247_v30 = vadd.f32 %v6911_v34, %v6132_v29 }
 0x477   : > { %6309 = vst.msk [vmem:[%s11669_s21 + $0x10] sm:$0xff] %vm6306_vm12, %v6302_v60  ;;  %v6913_v13 = vpop.f32.mrf.mxu1 }
 0x478   : > { %v6914_v37 = vadd.f32 %v6913_v13, %v6912_v42  ;;  %v6283_v40 = vrot.slane %v6247_v30, 7 }
 0x479   : > { %v6915_v6 = vpop.f32.mrf.mxu1 }
 0x47a   : > { %v6252_v25 = vadd.f32 %v6914_v37, %v6137_v24  ;;  %v6284_v19 = vsel %vm1204_vm4, %v6282_v26, %v6283_v40 }
 0x47b   : > { %v6916_v27 = vpop.f32.mrf.mxu1 }
 0x47c   : > { %v6288_v46 = vrot.slane %v6252_v25, 4  ;;  %v6917_v52 = vadd.f32 %v6916_v27, %v6915_v6 }
 0x47d   : > { %v6918_v54 = vpop.f32.mrf.mxu1 }
 0x47e   : > { %v6303_v23 = vsel %vm1577_vm5, %v6284_v19, %v6288_v46  ;;  %v6257_v18 = vadd.f32 %v6917_v52, %v6142_v53 }
 0x47f   : > { %6310 = vst.msk [vmem:[%s11669_s21 + $0x18] sm:$0xff] %vm6306_vm12, %v6303_v23  ;;  %v6919_v12 = vpop.f32.mrf.mxu1 }
 0x480   : > { %v6920_v9 = vadd.f32 %v6919_v12, %v6918_v54  ;;  %v6292_v21 = vrot.slane %v6257_v18, 1 }
 0x481   : > { %v6921_v45 = vpop.f32.mrf.mxu1 }
 0x482   : > { %v6262_v38 = vadd.f32 %v6920_v9, %v6147_v50 }
 0x483   : > { %v6922_v36 = vpop.f32.mrf.mxu1 }
 0x484   : > { %v6293_v57 = vrot.slane %v6262_v38, 1  ;;  %v6923_v63 = vadd.f32 %v6922_v36, %v6921_v45 }
 0x486   : > { %v6294_v31 = vsel %vm470_vm1, %v6292_v21, %v6293_v57  ;;  %v6267_v56 = vadd.f32 %v6923_v63, %v6152_v22 }
 0x487   : > { %v6304_v28 = vsel %vm1769_vm6, %v6288_v46, %v6294_v31 }
 0x488   : > { %6311 = vst.msk [vmem:[%s11669_s21 + $0x20] sm:$0xff] %vm6306_vm12, %v6304_v28  ;;  %v6298_v0 = vrot.slane %v6267_v56, 6 }
 0x48a   : > { %v6305_v5 = vsel %vm1012_vm3, %v6293_v57, %v6298_v0  ;;  %6314 = vst.msk [vmem:[%s11669_s21 + $0x30] sm:$0x1] %vm6313_vm13, %v6298_v0 }
 0x48b   : > { %6312 = vst.msk [vmem:[%s11669_s21 + $0x28] sm:$0xff] %vm6306_vm12, %v6305_v5 }
 0x48c PF: > { %s19_s30 = sadd.s32 1, %s7610_s30  }
 0x48d   : > { %p16_p4 = scmp.ge.s32.totalorder %s19_s30, 4  }
 0x48f   :  { %18 = sbr.rel (!%p16_p4) target bundleno = 1 (0x1), region = 89 }

</bundles_post_ra>
